<compile_context>
chip_gen: v5e
topology: v5e:2x2
jax: 0.10.0
libtpu: 0.0.40
codegen_flags: <defaults>
</compile_context>

<pallas_src>
import functools

import jax
import jax.numpy as jnp
import numpy as np
from jax.experimental import pallas as pl
from jax.experimental.pallas import tpu as pltpu


# ---------------------------------------------------------------------------
# Fused TransformerBlock kernel: one grid step == one batch element.
# ---------------------------------------------------------------------------
def _transformer_block_kernel(
    x_ref,                      # (1, C, HW)   input, flattened spatial
    t_ref,                      # (NH,)        temperature (SMEM)
    mask_ref,                   # (9, HW)      dw-conv boundary masks (1 = valid)
    ln1_w_ref, ln1_b_ref,       # (C, 1), (C, 1)
    w_qkv_ref, b_qkv_ref,       # (3C, C), (3C, 1)
    w_dw1_ref, b_dw1_ref,       # (3C, 9), (3C, 1)
    w_proj_ref, b_proj_ref,     # (C, C), (C, 1)
    ln2_w_ref, ln2_b_ref,       # (C, 1), (C, 1)
    w_in_ref, b_in_ref,         # (2Hd, C), (2Hd, 1)
    w_dw2_ref, b_dw2_ref,       # (2Hd, 9), (2Hd, 1)
    w_out_ref, b_out_ref,       # (C, Hd), (C, 1)
    o_ref,                      # (1, C, HW)
    *, num_heads, H, W,
):
    C = x_ref.shape[1]
    HW = x_ref.shape[2]
    hidden = w_out_ref.shape[1]

    x = x_ref[0]                                           # (C, HW) f32
    mask9 = mask_ref[...]                                  # (9, HW), shared by both dwconvs

    # -- per-pixel LayerNorm over the channel (sublane) axis ----------------
    def layernorm(z, w_ref, b_ref):
        mu = jnp.mean(z, axis=0, keepdims=True)
        zc = z - mu
        var = jnp.mean(zc * zc, axis=0, keepdims=True)
        return zc * jax.lax.rsqrt(var + 1e-5) * w_ref[...] + b_ref[...]

    # -- 1x1 conv == (Cout,Cin) @ (Cin,HW) MXU matmul -----------------------
    def pconv(w_ref, z, b_ref):
        return jnp.dot(w_ref[...], z, preferred_element_type=jnp.float32) + b_ref[...]

    # -- 3x3 depthwise conv on the flattened lane-dense (Cz, HW) layout -----
    # tap (dy,dx): out[s] += w[dy+1,dx+1] * z[s + dy*W + dx]   (0 if OOB)
    def dwconv3x3(z, w_ref, b_ref):
        w9 = w_ref[...]                                    # (Cz, 9)
        acc = jnp.zeros(z.shape, jnp.float32)
        for dy in (-1, 0, 1):
            for dx in (-1, 0, 1):
                ti = (dy + 1) * 3 + (dx + 1)
                off = dy * W + dx
                shifted = z if off == 0 else pltpu.roll(z, (-off) % HW, axis=1)
                acc = acc + shifted * mask9[ti:ti + 1, :] * w9[:, ti:ti + 1]
        return acc + b_ref[...]

    # ----------------------- attention branch ------------------------------
    y1 = layernorm(x, ln1_w_ref, ln1_b_ref)
    qkv = dwconv3x3(pconv(w_qkv_ref, y1, b_qkv_ref), w_dw1_ref, b_dw1_ref)  # (3C, HW)

    q = qkv[0:C, :]
    k = qkv[C:2 * C, :]
    v = qkv[2 * C:3 * C, :]
    eps = 1e-12                                            # torch F.normalize default
    q = q / jnp.maximum(jnp.sqrt(jnp.sum(q * q, axis=-1, keepdims=True)), eps)
    k = k / jnp.maximum(jnp.sqrt(jnp.sum(k * k, axis=-1, keepdims=True)), eps)

    cph = C // num_heads
    head_outs = []
    for h in range(num_heads):                             # unrolled, all heads in-kernel
        qh = q[h * cph:(h + 1) * cph, :]
        kh = k[h * cph:(h + 1) * cph, :]
        vh = v[h * cph:(h + 1) * cph, :]
        a = jax.lax.dot_general(qh, kh, (((1,), (1,)), ((), ())),
                                preferred_element_type=jnp.float32)   # (cph, cph)
        a = a * t_ref[h]                                   # scalar from SMEM
        a = a - jnp.max(a, axis=-1, keepdims=True)
        a = jnp.exp(a)
        a = a / jnp.sum(a, axis=-1, keepdims=True)
        head_outs.append(jnp.dot(a, vh, preferred_element_type=jnp.float32))
    attn_out = jnp.concatenate(head_outs, axis=0)          # (C, HW)
    x1 = x + pconv(w_proj_ref, attn_out, b_proj_ref)       # residual 1

    # ----------------------- feed-forward branch ---------------------------
    y2 = layernorm(x1, ln2_w_ref, ln2_b_ref)
    g = dwconv3x3(pconv(w_in_ref, y2, b_in_ref), w_dw2_ref, b_dw2_ref)  # (2Hd, HW)
    g1 = g[0:hidden, :]
    g2 = g[hidden:2 * hidden, :]
    gelu = 0.5 * g1 * (1.0 + jax.lax.erf(g1 * 0.7071067811865476))      # exact GELU
    ffn_out = pconv(w_out_ref, gelu * g2, b_out_ref)       # (C, HW)

    o_ref[0] = (x1 + ffn_out).astype(o_ref.dtype)          # residual 2


# ---------------------------------------------------------------------------
# Host wrapper
# ---------------------------------------------------------------------------
def _build_dw_masks(H, W):
    """(9, H*W) validity masks for the 3x3 depthwise conv taps (padding=1)."""
    HW = H * W
    row = np.arange(HW) // W
    col = np.arange(HW) % W
    m = np.zeros((9, HW), np.float32)
    for dy in (-1, 0, 1):
        for dx in (-1, 0, 1):
            ti = (dy + 1) * 3 + (dx + 1)
            m[ti] = (((row + dy) >= 0) & ((row + dy) < H) &
                     ((col + dx) >= 0) & ((col + dx) < W)).astype(np.float32)
    return jnp.asarray(m)


def transformer_block_forward(x, params, num_heads):
    B, C, H, W = x.shape
    HW = H * W

    def col2(v):                                           # (n,) -> (n, 1)
        return v.reshape(-1, 1)

    weights = [
        col2(params["ln1_w"]), col2(params["ln1_b"]),
        params["w_qkv"], col2(params["b_qkv"]),
        params["w_dw1"].reshape(-1, 9), col2(params["b_dw1"]),
        params["w_proj"], col2(params["b_proj"]),
        col2(params["ln2_w"]), col2(params["ln2_b"]),
        params["w_in"], col2(params["b_in"]),
        params["w_dw2"].reshape(-1, 9), col2(params["b_dw2"]),
        params["w_out"], col2(params["b_out"]),
    ]
    masks = _build_dw_masks(H, W)

    kernel = functools.partial(_transformer_block_kernel,
                               num_heads=num_heads, H=H, W=W)
    in_specs = (
        [pl.BlockSpec((1, C, HW), lambda b: (b, 0, 0)),                  # x
         pl.BlockSpec(memory_space=pltpu.MemorySpace.SMEM),              # temperature
         pl.BlockSpec((9, HW), lambda b: (0, 0))]                        # dw masks
        + [pl.BlockSpec(w.shape, lambda b: (0, 0)) for w in weights]     # all weights
    )
    out = pl.pallas_call(
        kernel,
        out_shape=jax.ShapeDtypeStruct((B, C, HW), x.dtype),
        grid=(B,),
        in_specs=in_specs,
        out_specs=pl.BlockSpec((1, C, HW), lambda b: (b, 0, 0)),
        compiler_params=pltpu.CompilerParams(
            dimension_semantics=("parallel",)),
    )(x.reshape(B, C, HW), params["temperature"], masks, *weights)
    return out.reshape(B, C, H, W)


# ---------------------------------------------------------------------------
# Pure-JAX reference (same math, no Pallas) for a correctness cross-check
# ---------------------------------------------------------------------------
def reference_forward(x, params, num_heads):
    B, C, H, W = x.shape
    HW = H * W

    def layernorm(z, w, b):
        mu = jnp.mean(z, axis=1, keepdims=True)
        var = jnp.mean((z - mu) ** 2, axis=1, keepdims=True)
        return (z - mu) * jax.lax.rsqrt(var + 1e-5) * w[None, :, None, None] \
            + b[None, :, None, None]

    def pconv(z, w, b):
        return jnp.einsum("oc,bchw->bohw", w, z) + b[None, :, None, None]

    def dwconv(z, w, b):
        zp = jnp.pad(z, ((0, 0), (0, 0), (1, 1), (1, 1)))
        out = jnp.zeros_like(z)
        for di in range(3):
            for dj in range(3):
                out = out + zp[:, :, di:di + H, dj:dj + W] * w[None, :, di, dj, None, None]
        return out + b[None, :, None, None]

    # attention branch
    y1 = layernorm(x, params["ln1_w"], params["ln1_b"])
    qkv = dwconv(pconv(y1, params["w_qkv"], params["b_qkv"]),
                 params["w_dw1"], params["b_dw1"])
    q, k, v = jnp.split(qkv.reshape(B, 3 * C, HW), 3, axis=1)
    cph = C // num_heads
    q = q.reshape(B, num_heads, cph, HW)
    k = k.reshape(B, num_heads, cph, HW)
    v = v.reshape(B, num_heads, cph, HW)
    eps = 1e-12
    q = q / jnp.maximum(jnp.sqrt(jnp.sum(q * q, -1, keepdims=True)), eps)
    k = k / jnp.maximum(jnp.sqrt(jnp.sum(k * k, -1, keepdims=True)), eps)
    attn = jnp.einsum("bhcs,bhds->bhcd", q, k) * params["temperature"][None, :, None, None]
    attn = jax.nn.softmax(attn, axis=-1)
    out = jnp.einsum("bhcd,bhds->bhcs", attn, v).reshape(B, C, H, W)
    x1 = x + pconv(out, params["w_proj"], params["b_proj"])

    # feed-forward branch
    y2 = layernorm(x1, params["ln2_w"], params["ln2_b"])
    g = dwconv(pconv(y2, params["w_in"], params["b_in"]),
               params["w_dw2"], params["b_dw2"])
    g1, g2 = jnp.split(g, 2, axis=1)
    gelu = 0.5 * g1 * (1.0 + jax.lax.erf(g1 * 0.7071067811865476))
    return x1 + pconv(gelu * g2, params["w_out"], params["b_out"])


if __name__ == "__main__":
    # TransformerBlock(dim=8, num_heads=2, ffn_expansion_factor=2.0,
    #                  bias=True, LayerNorm_type='WithBias')
    dim, num_heads = 8, 2
    hidden = int(dim * 2.0)
    B, H, W = 2, 16, 16

    key = jax.random.PRNGKey(0)
    ks = jax.random.split(key, 18)
    f32 = jnp.float32
    params = {
        "ln1_w": 1.0 + 0.1 * jax.random.normal(ks[0], (dim,), f32),
        "ln1_b": 0.1 * jax.random.normal(ks[1], (dim,), f32),
        "temperature": 1.0 + 0.1 * jax.random.normal(ks[2], (num_heads,), f32),
        "w_qkv": 0.2 * jax.random.normal(ks[3], (3 * dim, dim), f32),
        "b_qkv": 0.1 * jax.random.normal(ks[4], (3 * dim,), f32),
        "w_dw1": 0.2 * jax.random.normal(ks[5], (3 * dim, 3, 3), f32),
        "b_dw1": 0.1 * jax.random.normal(ks[6], (3 * dim,), f32),
        "w_proj": 0.2 * jax.random.normal(ks[7], (dim, dim), f32),
        "b_proj": 0.1 * jax.random.normal(ks[8], (dim,), f32),
        "ln2_w": 1.0 + 0.1 * jax.random.normal(ks[9], (dim,), f32),
        "ln2_b": 0.1 * jax.random.normal(ks[10], (dim,), f32),
        "w_in": 0.2 * jax.random.normal(ks[11], (2 * hidden, dim), f32),
        "b_in": 0.1 * jax.random.normal(ks[12], (2 * hidden,), f32),
        "w_dw2": 0.2 * jax.random.normal(ks[13], (2 * hidden, 3, 3), f32),
        "b_dw2": 0.1 * jax.random.normal(ks[14], (2 * hidden,), f32),
        "w_out": 0.2 * jax.random.normal(ks[15], (dim, hidden), f32),
        "b_out": 0.1 * jax.random.normal(ks[16], (dim,), f32),
    }
    x = jax.random.normal(ks[17], (B, dim, H, W), f32)

    fwd = jax.jit(functools.partial(transformer_block_forward, num_heads=num_heads))
    out = jax.block_until_ready(fwd(x, params))

    ref = reference_forward(x, params, num_heads)
    assert out.shape == (B, dim, H, W)
    assert jnp.allclose(out, ref, rtol=5e-4, atol=5e-4), "mismatch vs reference"
    print("KERNEL_OK")
</pallas_src>

<mosaic_0001>
module attributes {stable_mosaic.version = 11 : i64} {
  func.func @_transformer_block_kernel(%arg0: i32, %arg1: memref<1x8x256xf32, #tpu.memory_space<vmem>>, %arg2: memref<2xf32, #tpu.memory_space<smem>>, %arg3: memref<9x256xf32, #tpu.memory_space<vmem>>, %arg4: memref<8x1xf32, #tpu.memory_space<vmem>>, %arg5: memref<8x1xf32, #tpu.memory_space<vmem>>, %arg6: memref<24x8xf32, #tpu.memory_space<vmem>>, %arg7: memref<24x1xf32, #tpu.memory_space<vmem>>, %arg8: memref<24x9xf32, #tpu.memory_space<vmem>>, %arg9: memref<24x1xf32, #tpu.memory_space<vmem>>, %arg10: memref<8x8xf32, #tpu.memory_space<vmem>>, %arg11: memref<8x1xf32, #tpu.memory_space<vmem>>, %arg12: memref<8x1xf32, #tpu.memory_space<vmem>>, %arg13: memref<8x1xf32, #tpu.memory_space<vmem>>, %arg14: memref<32x8xf32, #tpu.memory_space<vmem>>, %arg15: memref<32x1xf32, #tpu.memory_space<vmem>>, %arg16: memref<32x9xf32, #tpu.memory_space<vmem>>, %arg17: memref<32x1xf32, #tpu.memory_space<vmem>>, %arg18: memref<8x16xf32, #tpu.memory_space<vmem>>, %arg19: memref<8x1xf32, #tpu.memory_space<vmem>>, %arg20: memref<1x8x256xf32, #tpu.memory_space<vmem>>) attributes {dimension_semantics = [#tpu.dimension_semantics<parallel>], iteration_bounds = array<i64: 2>, scalar_prefetch = 0 : i64, scratch_operands = 0 : i64, tpu.core_type = #tpu.core_type<tc>, window_params = [{transform_indices = @transform_0, window_bounds = array<i64: 1, 8, 256>}, {transform_indices = @transform_1, window_bounds = array<i64: 2>}, {pipeline_mode = #tpu.pipeline_mode<synchronous>, transform_indices = @transform_2, window_bounds = array<i64: 9, 256>}, {pipeline_mode = #tpu.pipeline_mode<synchronous>, transform_indices = @transform_3, window_bounds = array<i64: 8, 1>}, {pipeline_mode = #tpu.pipeline_mode<synchronous>, transform_indices = @transform_4, window_bounds = array<i64: 8, 1>}, {pipeline_mode = #tpu.pipeline_mode<synchronous>, transform_indices = @transform_5, window_bounds = array<i64: 24, 8>}, {pipeline_mode = #tpu.pipeline_mode<synchronous>, transform_indices = @transform_6, window_bounds = array<i64: 24, 1>}, {pipeline_mode = #tpu.pipeline_mode<synchronous>, transform_indices = @transform_7, window_bounds = array<i64: 24, 9>}, {pipeline_mode = #tpu.pipeline_mode<synchronous>, transform_indices = @transform_8, window_bounds = array<i64: 24, 1>}, {pipeline_mode = #tpu.pipeline_mode<synchronous>, transform_indices = @transform_9, window_bounds = array<i64: 8, 8>}, {pipeline_mode = #tpu.pipeline_mode<synchronous>, transform_indices = @transform_10, window_bounds = array<i64: 8, 1>}, {pipeline_mode = #tpu.pipeline_mode<synchronous>, transform_indices = @transform_11, window_bounds = array<i64: 8, 1>}, {pipeline_mode = #tpu.pipeline_mode<synchronous>, transform_indices = @transform_12, window_bounds = array<i64: 8, 1>}, {pipeline_mode = #tpu.pipeline_mode<synchronous>, transform_indices = @transform_13, window_bounds = array<i64: 32, 8>}, {pipeline_mode = #tpu.pipeline_mode<synchronous>, transform_indices = @transform_14, window_bounds = array<i64: 32, 1>}, {pipeline_mode = #tpu.pipeline_mode<synchronous>, transform_indices = @transform_15, window_bounds = array<i64: 32, 9>}, {pipeline_mode = #tpu.pipeline_mode<synchronous>, transform_indices = @transform_16, window_bounds = array<i64: 32, 1>}, {pipeline_mode = #tpu.pipeline_mode<synchronous>, transform_indices = @transform_17, window_bounds = array<i64: 8, 16>}, {pipeline_mode = #tpu.pipeline_mode<synchronous>, transform_indices = @transform_18, window_bounds = array<i64: 8, 1>}, {transform_indices = @transform_19, window_bounds = array<i64: 1, 8, 256>}]} {
    %c0 = arith.constant 0 : index
    %c0_0 = arith.constant 0 : index
    %c0_1 = arith.constant 0 : index
    %0 = vector.load %arg1[%c0, %c0_0, %c0_1] : memref<1x8x256xf32, #tpu.memory_space<vmem>>, vector<1x8x256xf32>
    %1 = vector.shape_cast %0 : vector<1x8x256xf32> to vector<8x256xf32>
    %c0_2 = arith.constant 0 : index
    %c0_3 = arith.constant 0 : index
    %2 = vector.load %arg3[%c0_2, %c0_3] : memref<9x256xf32, #tpu.memory_space<vmem>>, vector<9x256xf32>
    %cst = arith.constant dense<0.000000e+00> : vector<256xf32>
    %3 = vector.multi_reduction <add>, %1, %cst [0] : vector<8x256xf32> to vector<256xf32>
    %4 = vector.shape_cast %3 : vector<256xf32> to vector<1x256xf32>
    %cst_4 = arith.constant 8.000000e+00 : f32
    %5 = vector.broadcast %cst_4 : f32 to vector<1x256xf32>
    %6 = arith.divf %4, %5 : vector<1x256xf32>
    %7 = vector.broadcast %6 : vector<1x256xf32> to vector<8x256xf32>
    %8 = arith.subf %1, %7 : vector<8x256xf32>
    %9 = arith.mulf %8, %8 : vector<8x256xf32>
    %cst_5 = arith.constant dense<0.000000e+00> : vector<256xf32>
    %10 = vector.multi_reduction <add>, %9, %cst_5 [0] : vector<8x256xf32> to vector<256xf32>
    %11 = vector.shape_cast %10 : vector<256xf32> to vector<1x256xf32>
    %cst_6 = arith.constant 8.000000e+00 : f32
    %12 = vector.broadcast %cst_6 : f32 to vector<1x256xf32>
    %13 = arith.divf %11, %12 : vector<1x256xf32>
    %cst_7 = arith.constant 9.99999974E-6 : f32
    %14 = vector.broadcast %cst_7 : f32 to vector<1x256xf32>
    %15 = arith.addf %13, %14 : vector<1x256xf32>
    %16 = math.rsqrt %15 : vector<1x256xf32>
    %17 = vector.broadcast %16 : vector<1x256xf32> to vector<8x256xf32>
    %18 = arith.mulf %8, %17 : vector<8x256xf32>
    %c0_8 = arith.constant 0 : index
    %c0_9 = arith.constant 0 : index
    %19 = vector.load %arg4[%c0_8, %c0_9] : memref<8x1xf32, #tpu.memory_space<vmem>>, vector<8x1xf32>
    %20 = vector.broadcast %19 : vector<8x1xf32> to vector<8x256xf32>
    %21 = arith.mulf %18, %20 : vector<8x256xf32>
    %c0_10 = arith.constant 0 : index
    %c0_11 = arith.constant 0 : index
    %22 = vector.load %arg5[%c0_10, %c0_11] : memref<8x1xf32, #tpu.memory_space<vmem>>, vector<8x1xf32>
    %23 = vector.broadcast %22 : vector<8x1xf32> to vector<8x256xf32>
    %24 = arith.addf %21, %23 : vector<8x256xf32>
    %c0_12 = arith.constant 0 : index
    %c0_13 = arith.constant 0 : index
    %25 = vector.load %arg6[%c0_12, %c0_13] : memref<24x8xf32, #tpu.memory_space<vmem>>, vector<24x8xf32>
    %cst_14 = arith.constant dense<0.000000e+00> : vector<24x256xf32>
    %26 = tpu.matmul %25, %24, %cst_14 {dimension_numbers = #tpu.dot_dimension_numbers<[1], [0], [0], [1], [0, 0, 1, 1], [], []>} : vector<24x8xf32>, vector<8x256xf32>, vector<24x256xf32> -> vector<24x256xf32>
    %c0_15 = arith.constant 0 : index
    %c0_16 = arith.constant 0 : index
    %27 = vector.load %arg7[%c0_15, %c0_16] : memref<24x1xf32, #tpu.memory_space<vmem>>, vector<24x1xf32>
    %28 = vector.broadcast %27 : vector<24x1xf32> to vector<24x256xf32>
    %29 = arith.addf %26, %28 : vector<24x256xf32>
    %c0_17 = arith.constant 0 : index
    %c0_18 = arith.constant 0 : index
    %30 = vector.load %arg8[%c0_17, %c0_18] : memref<24x9xf32, #tpu.memory_space<vmem>>, vector<24x9xf32>
    %cst_19 = arith.constant 0.000000e+00 : f32
    %31 = vector.broadcast %cst_19 : f32 to vector<24x256xf32>
    %c17_i32 = arith.constant 17 : i32
    %32 = tpu.dynamic_rotate %29 by %c17_i32 dim 1 : vector<24x256xf32>, i32 -> vector<24x256xf32>
    %33 = vector.extract_strided_slice %2 {offsets = [0, 0], sizes = [1, 256], strides = [1, 1]} : vector<9x256xf32> to vector<1x256xf32>
    %34 = vector.broadcast %33 : vector<1x256xf32> to vector<24x256xf32>
    %35 = arith.mulf %32, %34 : vector<24x256xf32>
    %36 = vector.extract_strided_slice %30 {offsets = [0, 0], sizes = [24, 1], strides = [1, 1]} : vector<24x9xf32> to vector<24x1xf32>
    %37 = vector.broadcast %36 : vector<24x1xf32> to vector<24x256xf32>
    %38 = arith.mulf %35, %37 : vector<24x256xf32>
    %39 = arith.addf %31, %38 : vector<24x256xf32>
    %c16_i32 = arith.constant 16 : i32
    %40 = tpu.dynamic_rotate %29 by %c16_i32 dim 1 : vector<24x256xf32>, i32 -> vector<24x256xf32>
    %41 = vector.extract_strided_slice %2 {offsets = [1, 0], sizes = [1, 256], strides = [1, 1]} : vector<9x256xf32> to vector<1x256xf32>
    %42 = vector.broadcast %41 : vector<1x256xf32> to vector<24x256xf32>
    %43 = arith.mulf %40, %42 : vector<24x256xf32>
    %44 = vector.extract_strided_slice %30 {offsets = [0, 1], sizes = [24, 1], strides = [1, 1]} : vector<24x9xf32> to vector<24x1xf32>
    %45 = vector.broadcast %44 : vector<24x1xf32> to vector<24x256xf32>
    %46 = arith.mulf %43, %45 : vector<24x256xf32>
    %47 = arith.addf %39, %46 : vector<24x256xf32>
    %c15_i32 = arith.constant 15 : i32
    %48 = tpu.dynamic_rotate %29 by %c15_i32 dim 1 : vector<24x256xf32>, i32 -> vector<24x256xf32>
    %49 = vector.extract_strided_slice %2 {offsets = [2, 0], sizes = [1, 256], strides = [1, 1]} : vector<9x256xf32> to vector<1x256xf32>
    %50 = vector.broadcast %49 : vector<1x256xf32> to vector<24x256xf32>
    %51 = arith.mulf %48, %50 : vector<24x256xf32>
    %52 = vector.extract_strided_slice %30 {offsets = [0, 2], sizes = [24, 1], strides = [1, 1]} : vector<24x9xf32> to vector<24x1xf32>
    %53 = vector.broadcast %52 : vector<24x1xf32> to vector<24x256xf32>
    %54 = arith.mulf %51, %53 : vector<24x256xf32>
    %55 = arith.addf %47, %54 : vector<24x256xf32>
    %c1_i32 = arith.constant 1 : i32
    %56 = tpu.dynamic_rotate %29 by %c1_i32 dim 1 : vector<24x256xf32>, i32 -> vector<24x256xf32>
    %57 = vector.extract_strided_slice %2 {offsets = [3, 0], sizes = [1, 256], strides = [1, 1]} : vector<9x256xf32> to vector<1x256xf32>
    %58 = vector.broadcast %57 : vector<1x256xf32> to vector<24x256xf32>
    %59 = arith.mulf %56, %58 : vector<24x256xf32>
    %60 = vector.extract_strided_slice %30 {offsets = [0, 3], sizes = [24, 1], strides = [1, 1]} : vector<24x9xf32> to vector<24x1xf32>
    %61 = vector.broadcast %60 : vector<24x1xf32> to vector<24x256xf32>
    %62 = arith.mulf %59, %61 : vector<24x256xf32>
    %63 = arith.addf %55, %62 : vector<24x256xf32>
    %64 = vector.extract_strided_slice %2 {offsets = [4, 0], sizes = [1, 256], strides = [1, 1]} : vector<9x256xf32> to vector<1x256xf32>
    %65 = vector.broadcast %64 : vector<1x256xf32> to vector<24x256xf32>
    %66 = arith.mulf %29, %65 : vector<24x256xf32>
    %67 = vector.extract_strided_slice %30 {offsets = [0, 4], sizes = [24, 1], strides = [1, 1]} : vector<24x9xf32> to vector<24x1xf32>
    %68 = vector.broadcast %67 : vector<24x1xf32> to vector<24x256xf32>
    %69 = arith.mulf %66, %68 : vector<24x256xf32>
    %70 = arith.addf %63, %69 : vector<24x256xf32>
    %c255_i32 = arith.constant 255 : i32
    %71 = tpu.dynamic_rotate %29 by %c255_i32 dim 1 : vector<24x256xf32>, i32 -> vector<24x256xf32>
    %72 = vector.extract_strided_slice %2 {offsets = [5, 0], sizes = [1, 256], strides = [1, 1]} : vector<9x256xf32> to vector<1x256xf32>
    %73 = vector.broadcast %72 : vector<1x256xf32> to vector<24x256xf32>
    %74 = arith.mulf %71, %73 : vector<24x256xf32>
    %75 = vector.extract_strided_slice %30 {offsets = [0, 5], sizes = [24, 1], strides = [1, 1]} : vector<24x9xf32> to vector<24x1xf32>
    %76 = vector.broadcast %75 : vector<24x1xf32> to vector<24x256xf32>
    %77 = arith.mulf %74, %76 : vector<24x256xf32>
    %78 = arith.addf %70, %77 : vector<24x256xf32>
    %c241_i32 = arith.constant 241 : i32
    %79 = tpu.dynamic_rotate %29 by %c241_i32 dim 1 : vector<24x256xf32>, i32 -> vector<24x256xf32>
    %80 = vector.extract_strided_slice %2 {offsets = [6, 0], sizes = [1, 256], strides = [1, 1]} : vector<9x256xf32> to vector<1x256xf32>
    %81 = vector.broadcast %80 : vector<1x256xf32> to vector<24x256xf32>
    %82 = arith.mulf %79, %81 : vector<24x256xf32>
    %83 = vector.extract_strided_slice %30 {offsets = [0, 6], sizes = [24, 1], strides = [1, 1]} : vector<24x9xf32> to vector<24x1xf32>
    %84 = vector.broadcast %83 : vector<24x1xf32> to vector<24x256xf32>
    %85 = arith.mulf %82, %84 : vector<24x256xf32>
    %86 = arith.addf %78, %85 : vector<24x256xf32>
    %c240_i32 = arith.constant 240 : i32
    %87 = tpu.dynamic_rotate %29 by %c240_i32 dim 1 : vector<24x256xf32>, i32 -> vector<24x256xf32>
    %88 = vector.extract_strided_slice %2 {offsets = [7, 0], sizes = [1, 256], strides = [1, 1]} : vector<9x256xf32> to vector<1x256xf32>
    %89 = vector.broadcast %88 : vector<1x256xf32> to vector<24x256xf32>
    %90 = arith.mulf %87, %89 : vector<24x256xf32>
    %91 = vector.extract_strided_slice %30 {offsets = [0, 7], sizes = [24, 1], strides = [1, 1]} : vector<24x9xf32> to vector<24x1xf32>
    %92 = vector.broadcast %91 : vector<24x1xf32> to vector<24x256xf32>
    %93 = arith.mulf %90, %92 : vector<24x256xf32>
    %94 = arith.addf %86, %93 : vector<24x256xf32>
    %c239_i32 = arith.constant 239 : i32
    %95 = tpu.dynamic_rotate %29 by %c239_i32 dim 1 : vector<24x256xf32>, i32 -> vector<24x256xf32>
    %96 = vector.extract_strided_slice %2 {offsets = [8, 0], sizes = [1, 256], strides = [1, 1]} : vector<9x256xf32> to vector<1x256xf32>
    %97 = vector.broadcast %96 : vector<1x256xf32> to vector<24x256xf32>
    %98 = arith.mulf %95, %97 : vector<24x256xf32>
    %99 = vector.extract_strided_slice %30 {offsets = [0, 8], sizes = [24, 1], strides = [1, 1]} : vector<24x9xf32> to vector<24x1xf32>
    %100 = vector.broadcast %99 : vector<24x1xf32> to vector<24x256xf32>
    %101 = arith.mulf %98, %100 : vector<24x256xf32>
    %102 = arith.addf %94, %101 : vector<24x256xf32>
    %c0_20 = arith.constant 0 : index
    %c0_21 = arith.constant 0 : index
    %103 = vector.load %arg9[%c0_20, %c0_21] : memref<24x1xf32, #tpu.memory_space<vmem>>, vector<24x1xf32>
    %104 = vector.broadcast %103 : vector<24x1xf32> to vector<24x256xf32>
    %105 = arith.addf %102, %104 : vector<24x256xf32>
    %106 = vector.extract_strided_slice %105 {offsets = [0, 0], sizes = [8, 256], strides = [1, 1]} : vector<24x256xf32> to vector<8x256xf32>
    %107 = vector.extract_strided_slice %105 {offsets = [8, 0], sizes = [8, 256], strides = [1, 1]} : vector<24x256xf32> to vector<8x256xf32>
    %108 = vector.extract_strided_slice %105 {offsets = [16, 0], sizes = [8, 256], strides = [1, 1]} : vector<24x256xf32> to vector<8x256xf32>
    %109 = arith.mulf %106, %106 : vector<8x256xf32>
    %cst_22 = arith.constant dense<0.000000e+00> : vector<8xf32>
    %110 = vector.multi_reduction <add>, %109, %cst_22 [1] : vector<8x256xf32> to vector<8xf32>
    %111 = vector.shape_cast %110 : vector<8xf32> to vector<8x1xf32>
    %112 = math.sqrt %111 : vector<8x1xf32>
    %cst_23 = arith.constant 9.99999996E-13 : f32
    %113 = vector.broadcast %cst_23 : f32 to vector<8x1xf32>
    %114 = arith.maximumf %112, %113 : vector<8x1xf32>
    %115 = vector.broadcast %114 : vector<8x1xf32> to vector<8x256xf32>
    %116 = arith.divf %106, %115 : vector<8x256xf32>
    %117 = arith.mulf %107, %107 : vector<8x256xf32>
    %cst_24 = arith.constant dense<0.000000e+00> : vector<8xf32>
    %118 = vector.multi_reduction <add>, %117, %cst_24 [1] : vector<8x256xf32> to vector<8xf32>
    %119 = vector.shape_cast %118 : vector<8xf32> to vector<8x1xf32>
    %120 = math.sqrt %119 : vector<8x1xf32>
    %cst_25 = arith.constant 9.99999996E-13 : f32
    %121 = vector.broadcast %cst_25 : f32 to vector<8x1xf32>
    %122 = arith.maximumf %120, %121 : vector<8x1xf32>
    %123 = vector.broadcast %122 : vector<8x1xf32> to vector<8x256xf32>
    %124 = arith.divf %107, %123 : vector<8x256xf32>
    %125 = vector.extract_strided_slice %116 {offsets = [0, 0], sizes = [4, 256], strides = [1, 1]} : vector<8x256xf32> to vector<4x256xf32>
    %126 = vector.extract_strided_slice %124 {offsets = [0, 0], sizes = [4, 256], strides = [1, 1]} : vector<8x256xf32> to vector<4x256xf32>
    %127 = vector.extract_strided_slice %108 {offsets = [0, 0], sizes = [4, 256], strides = [1, 1]} : vector<8x256xf32> to vector<4x256xf32>
    %cst_26 = arith.constant dense<0.000000e+00> : vector<4x4xf32>
    %128 = tpu.matmul %125, %126, %cst_26 {dimension_numbers = #tpu.dot_dimension_numbers<[1], [1], [0], [0], [0, 0, 1, 0], [], []>} : vector<4x256xf32>, vector<4x256xf32>, vector<4x4xf32> -> vector<4x4xf32>
    %c0_27 = arith.constant 0 : index
    %129 = memref.load %arg2[%c0_27] : memref<2xf32, #tpu.memory_space<smem>>
    %130 = vector.broadcast %129 : f32 to vector<4x4xf32>
    %131 = arith.mulf %128, %130 : vector<4x4xf32>
    %cst_28 = arith.constant dense<0xFF800000> : vector<4xf32>
    %132 = vector.multi_reduction <maximumf>, %131, %cst_28 [1] : vector<4x4xf32> to vector<4xf32>
    %133 = vector.shape_cast %132 : vector<4xf32> to vector<4x1xf32>
    %134 = vector.broadcast %133 : vector<4x1xf32> to vector<4x4xf32>
    %135 = arith.subf %131, %134 : vector<4x4xf32>
    %136 = math.exp %135 : vector<4x4xf32>
    %cst_29 = arith.constant dense<0.000000e+00> : vector<4xf32>
    %137 = vector.multi_reduction <add>, %136, %cst_29 [1] : vector<4x4xf32> to vector<4xf32>
    %138 = vector.shape_cast %137 : vector<4xf32> to vector<4x1xf32>
    %139 = vector.broadcast %138 : vector<4x1xf32> to vector<4x4xf32>
    %140 = arith.divf %136, %139 : vector<4x4xf32>
    %cst_30 = arith.constant dense<0.000000e+00> : vector<4x256xf32>
    %141 = tpu.matmul %140, %127, %cst_30 {dimension_numbers = #tpu.dot_dimension_numbers<[1], [0], [0], [1], [0, 0, 1, 1], [], []>} : vector<4x4xf32>, vector<4x256xf32>, vector<4x256xf32> -> vector<4x256xf32>
    %142 = vector.extract_strided_slice %116 {offsets = [4, 0], sizes = [4, 256], strides = [1, 1]} : vector<8x256xf32> to vector<4x256xf32>
    %143 = vector.extract_strided_slice %124 {offsets = [4, 0], sizes = [4, 256], strides = [1, 1]} : vector<8x256xf32> to vector<4x256xf32>
    %144 = vector.extract_strided_slice %108 {offsets = [4, 0], sizes = [4, 256], strides = [1, 1]} : vector<8x256xf32> to vector<4x256xf32>
    %cst_31 = arith.constant dense<0.000000e+00> : vector<4x4xf32>
    %145 = tpu.matmul %142, %143, %cst_31 {dimension_numbers = #tpu.dot_dimension_numbers<[1], [1], [0], [0], [0, 0, 1, 0], [], []>} : vector<4x256xf32>, vector<4x256xf32>, vector<4x4xf32> -> vector<4x4xf32>
    %c1 = arith.constant 1 : index
    %146 = memref.load %arg2[%c1] : memref<2xf32, #tpu.memory_space<smem>>
    %147 = vector.broadcast %146 : f32 to vector<4x4xf32>
    %148 = arith.mulf %145, %147 : vector<4x4xf32>
    %cst_32 = arith.constant dense<0xFF800000> : vector<4xf32>
    %149 = vector.multi_reduction <maximumf>, %148, %cst_32 [1] : vector<4x4xf32> to vector<4xf32>
    %150 = vector.shape_cast %149 : vector<4xf32> to vector<4x1xf32>
    %151 = vector.broadcast %150 : vector<4x1xf32> to vector<4x4xf32>
    %152 = arith.subf %148, %151 : vector<4x4xf32>
    %153 = math.exp %152 : vector<4x4xf32>
    %cst_33 = arith.constant dense<0.000000e+00> : vector<4xf32>
    %154 = vector.multi_reduction <add>, %153, %cst_33 [1] : vector<4x4xf32> to vector<4xf32>
    %155 = vector.shape_cast %154 : vector<4xf32> to vector<4x1xf32>
    %156 = vector.broadcast %155 : vector<4x1xf32> to vector<4x4xf32>
    %157 = arith.divf %153, %156 : vector<4x4xf32>
    %cst_34 = arith.constant dense<0.000000e+00> : vector<4x256xf32>
    %158 = tpu.matmul %157, %144, %cst_34 {dimension_numbers = #tpu.dot_dimension_numbers<[1], [0], [0], [1], [0, 0, 1, 1], [], []>} : vector<4x4xf32>, vector<4x256xf32>, vector<4x256xf32> -> vector<4x256xf32>
    %159 = tpu.concatenate %141, %158 in 0 : vector<4x256xf32>, vector<4x256xf32> -> vector<8x256xf32>
    %c0_35 = arith.constant 0 : index
    %c0_36 = arith.constant 0 : index
    %160 = vector.load %arg10[%c0_35, %c0_36] : memref<8x8xf32, #tpu.memory_space<vmem>>, vector<8x8xf32>
    %cst_37 = arith.constant dense<0.000000e+00> : vector<8x256xf32>
    %161 = tpu.matmul %160, %159, %cst_37 {dimension_numbers = #tpu.dot_dimension_numbers<[1], [0], [0], [1], [0, 0, 1, 1], [], []>} : vector<8x8xf32>, vector<8x256xf32>, vector<8x256xf32> -> vector<8x256xf32>
    %c0_38 = arith.constant 0 : index
    %c0_39 = arith.constant 0 : index
    %162 = vector.load %arg11[%c0_38, %c0_39] : memref<8x1xf32, #tpu.memory_space<vmem>>, vector<8x1xf32>
    %163 = vector.broadcast %162 : vector<8x1xf32> to vector<8x256xf32>
    %164 = arith.addf %161, %163 : vector<8x256xf32>
    %165 = arith.addf %1, %164 : vector<8x256xf32>
    %cst_40 = arith.constant dense<0.000000e+00> : vector<256xf32>
    %166 = vector.multi_reduction <add>, %165, %cst_40 [0] : vector<8x256xf32> to vector<256xf32>
    %167 = vector.shape_cast %166 : vector<256xf32> to vector<1x256xf32>
    %cst_41 = arith.constant 8.000000e+00 : f32
    %168 = vector.broadcast %cst_41 : f32 to vector<1x256xf32>
    %169 = arith.divf %167, %168 : vector<1x256xf32>
    %170 = vector.broadcast %169 : vector<1x256xf32> to vector<8x256xf32>
    %171 = arith.subf %165, %170 : vector<8x256xf32>
    %172 = arith.mulf %171, %171 : vector<8x256xf32>
    %cst_42 = arith.constant dense<0.000000e+00> : vector<256xf32>
    %173 = vector.multi_reduction <add>, %172, %cst_42 [0] : vector<8x256xf32> to vector<256xf32>
    %174 = vector.shape_cast %173 : vector<256xf32> to vector<1x256xf32>
    %cst_43 = arith.constant 8.000000e+00 : f32
    %175 = vector.broadcast %cst_43 : f32 to vector<1x256xf32>
    %176 = arith.divf %174, %175 : vector<1x256xf32>
    %cst_44 = arith.constant 9.99999974E-6 : f32
    %177 = vector.broadcast %cst_44 : f32 to vector<1x256xf32>
    %178 = arith.addf %176, %177 : vector<1x256xf32>
    %179 = math.rsqrt %178 : vector<1x256xf32>
    %180 = vector.broadcast %179 : vector<1x256xf32> to vector<8x256xf32>
    %181 = arith.mulf %171, %180 : vector<8x256xf32>
    %c0_45 = arith.constant 0 : index
    %c0_46 = arith.constant 0 : index
    %182 = vector.load %arg12[%c0_45, %c0_46] : memref<8x1xf32, #tpu.memory_space<vmem>>, vector<8x1xf32>
    %183 = vector.broadcast %182 : vector<8x1xf32> to vector<8x256xf32>
    %184 = arith.mulf %181, %183 : vector<8x256xf32>
    %c0_47 = arith.constant 0 : index
    %c0_48 = arith.constant 0 : index
    %185 = vector.load %arg13[%c0_47, %c0_48] : memref<8x1xf32, #tpu.memory_space<vmem>>, vector<8x1xf32>
    %186 = vector.broadcast %185 : vector<8x1xf32> to vector<8x256xf32>
    %187 = arith.addf %184, %186 : vector<8x256xf32>
    %c0_49 = arith.constant 0 : index
    %c0_50 = arith.constant 0 : index
    %188 = vector.load %arg14[%c0_49, %c0_50] : memref<32x8xf32, #tpu.memory_space<vmem>>, vector<32x8xf32>
    %cst_51 = arith.constant dense<0.000000e+00> : vector<32x256xf32>
    %189 = tpu.matmul %188, %187, %cst_51 {dimension_numbers = #tpu.dot_dimension_numbers<[1], [0], [0], [1], [0, 0, 1, 1], [], []>} : vector<32x8xf32>, vector<8x256xf32>, vector<32x256xf32> -> vector<32x256xf32>
    %c0_52 = arith.constant 0 : index
    %c0_53 = arith.constant 0 : index
    %190 = vector.load %arg15[%c0_52, %c0_53] : memref<32x1xf32, #tpu.memory_space<vmem>>, vector<32x1xf32>
    %191 = vector.broadcast %190 : vector<32x1xf32> to vector<32x256xf32>
    %192 = arith.addf %189, %191 : vector<32x256xf32>
    %c0_54 = arith.constant 0 : index
    %c0_55 = arith.constant 0 : index
    %193 = vector.load %arg16[%c0_54, %c0_55] : memref<32x9xf32, #tpu.memory_space<vmem>>, vector<32x9xf32>
    %cst_56 = arith.constant 0.000000e+00 : f32
    %194 = vector.broadcast %cst_56 : f32 to vector<32x256xf32>
    %c17_i32_57 = arith.constant 17 : i32
    %195 = tpu.dynamic_rotate %192 by %c17_i32_57 dim 1 : vector<32x256xf32>, i32 -> vector<32x256xf32>
    %196 = vector.extract_strided_slice %2 {offsets = [0, 0], sizes = [1, 256], strides = [1, 1]} : vector<9x256xf32> to vector<1x256xf32>
    %197 = vector.broadcast %196 : vector<1x256xf32> to vector<32x256xf32>
    %198 = arith.mulf %195, %197 : vector<32x256xf32>
    %199 = vector.extract_strided_slice %193 {offsets = [0, 0], sizes = [32, 1], strides = [1, 1]} : vector<32x9xf32> to vector<32x1xf32>
    %200 = vector.broadcast %199 : vector<32x1xf32> to vector<32x256xf32>
    %201 = arith.mulf %198, %200 : vector<32x256xf32>
    %202 = arith.addf %194, %201 : vector<32x256xf32>
    %c16_i32_58 = arith.constant 16 : i32
    %203 = tpu.dynamic_rotate %192 by %c16_i32_58 dim 1 : vector<32x256xf32>, i32 -> vector<32x256xf32>
    %204 = vector.extract_strided_slice %2 {offsets = [1, 0], sizes = [1, 256], strides = [1, 1]} : vector<9x256xf32> to vector<1x256xf32>
    %205 = vector.broadcast %204 : vector<1x256xf32> to vector<32x256xf32>
    %206 = arith.mulf %203, %205 : vector<32x256xf32>
    %207 = vector.extract_strided_slice %193 {offsets = [0, 1], sizes = [32, 1], strides = [1, 1]} : vector<32x9xf32> to vector<32x1xf32>
    %208 = vector.broadcast %207 : vector<32x1xf32> to vector<32x256xf32>
    %209 = arith.mulf %206, %208 : vector<32x256xf32>
    %210 = arith.addf %202, %209 : vector<32x256xf32>
    %c15_i32_59 = arith.constant 15 : i32
    %211 = tpu.dynamic_rotate %192 by %c15_i32_59 dim 1 : vector<32x256xf32>, i32 -> vector<32x256xf32>
    %212 = vector.extract_strided_slice %2 {offsets = [2, 0], sizes = [1, 256], strides = [1, 1]} : vector<9x256xf32> to vector<1x256xf32>
    %213 = vector.broadcast %212 : vector<1x256xf32> to vector<32x256xf32>
    %214 = arith.mulf %211, %213 : vector<32x256xf32>
    %215 = vector.extract_strided_slice %193 {offsets = [0, 2], sizes = [32, 1], strides = [1, 1]} : vector<32x9xf32> to vector<32x1xf32>
    %216 = vector.broadcast %215 : vector<32x1xf32> to vector<32x256xf32>
    %217 = arith.mulf %214, %216 : vector<32x256xf32>
    %218 = arith.addf %210, %217 : vector<32x256xf32>
    %c1_i32_60 = arith.constant 1 : i32
    %219 = tpu.dynamic_rotate %192 by %c1_i32_60 dim 1 : vector<32x256xf32>, i32 -> vector<32x256xf32>
    %220 = vector.extract_strided_slice %2 {offsets = [3, 0], sizes = [1, 256], strides = [1, 1]} : vector<9x256xf32> to vector<1x256xf32>
    %221 = vector.broadcast %220 : vector<1x256xf32> to vector<32x256xf32>
    %222 = arith.mulf %219, %221 : vector<32x256xf32>
    %223 = vector.extract_strided_slice %193 {offsets = [0, 3], sizes = [32, 1], strides = [1, 1]} : vector<32x9xf32> to vector<32x1xf32>
    %224 = vector.broadcast %223 : vector<32x1xf32> to vector<32x256xf32>
    %225 = arith.mulf %222, %224 : vector<32x256xf32>
    %226 = arith.addf %218, %225 : vector<32x256xf32>
    %227 = vector.extract_strided_slice %2 {offsets = [4, 0], sizes = [1, 256], strides = [1, 1]} : vector<9x256xf32> to vector<1x256xf32>
    %228 = vector.broadcast %227 : vector<1x256xf32> to vector<32x256xf32>
    %229 = arith.mulf %192, %228 : vector<32x256xf32>
    %230 = vector.extract_strided_slice %193 {offsets = [0, 4], sizes = [32, 1], strides = [1, 1]} : vector<32x9xf32> to vector<32x1xf32>
    %231 = vector.broadcast %230 : vector<32x1xf32> to vector<32x256xf32>
    %232 = arith.mulf %229, %231 : vector<32x256xf32>
    %233 = arith.addf %226, %232 : vector<32x256xf32>
    %c255_i32_61 = arith.constant 255 : i32
    %234 = tpu.dynamic_rotate %192 by %c255_i32_61 dim 1 : vector<32x256xf32>, i32 -> vector<32x256xf32>
    %235 = vector.extract_strided_slice %2 {offsets = [5, 0], sizes = [1, 256], strides = [1, 1]} : vector<9x256xf32> to vector<1x256xf32>
    %236 = vector.broadcast %235 : vector<1x256xf32> to vector<32x256xf32>
    %237 = arith.mulf %234, %236 : vector<32x256xf32>
    %238 = vector.extract_strided_slice %193 {offsets = [0, 5], sizes = [32, 1], strides = [1, 1]} : vector<32x9xf32> to vector<32x1xf32>
    %239 = vector.broadcast %238 : vector<32x1xf32> to vector<32x256xf32>
    %240 = arith.mulf %237, %239 : vector<32x256xf32>
    %241 = arith.addf %233, %240 : vector<32x256xf32>
    %c241_i32_62 = arith.constant 241 : i32
    %242 = tpu.dynamic_rotate %192 by %c241_i32_62 dim 1 : vector<32x256xf32>, i32 -> vector<32x256xf32>
    %243 = vector.extract_strided_slice %2 {offsets = [6, 0], sizes = [1, 256], strides = [1, 1]} : vector<9x256xf32> to vector<1x256xf32>
    %244 = vector.broadcast %243 : vector<1x256xf32> to vector<32x256xf32>
    %245 = arith.mulf %242, %244 : vector<32x256xf32>
    %246 = vector.extract_strided_slice %193 {offsets = [0, 6], sizes = [32, 1], strides = [1, 1]} : vector<32x9xf32> to vector<32x1xf32>
    %247 = vector.broadcast %246 : vector<32x1xf32> to vector<32x256xf32>
    %248 = arith.mulf %245, %247 : vector<32x256xf32>
    %249 = arith.addf %241, %248 : vector<32x256xf32>
    %c240_i32_63 = arith.constant 240 : i32
    %250 = tpu.dynamic_rotate %192 by %c240_i32_63 dim 1 : vector<32x256xf32>, i32 -> vector<32x256xf32>
    %251 = vector.extract_strided_slice %2 {offsets = [7, 0], sizes = [1, 256], strides = [1, 1]} : vector<9x256xf32> to vector<1x256xf32>
    %252 = vector.broadcast %251 : vector<1x256xf32> to vector<32x256xf32>
    %253 = arith.mulf %250, %252 : vector<32x256xf32>
    %254 = vector.extract_strided_slice %193 {offsets = [0, 7], sizes = [32, 1], strides = [1, 1]} : vector<32x9xf32> to vector<32x1xf32>
    %255 = vector.broadcast %254 : vector<32x1xf32> to vector<32x256xf32>
    %256 = arith.mulf %253, %255 : vector<32x256xf32>
    %257 = arith.addf %249, %256 : vector<32x256xf32>
    %c239_i32_64 = arith.constant 239 : i32
    %258 = tpu.dynamic_rotate %192 by %c239_i32_64 dim 1 : vector<32x256xf32>, i32 -> vector<32x256xf32>
    %259 = vector.extract_strided_slice %2 {offsets = [8, 0], sizes = [1, 256], strides = [1, 1]} : vector<9x256xf32> to vector<1x256xf32>
    %260 = vector.broadcast %259 : vector<1x256xf32> to vector<32x256xf32>
    %261 = arith.mulf %258, %260 : vector<32x256xf32>
    %262 = vector.extract_strided_slice %193 {offsets = [0, 8], sizes = [32, 1], strides = [1, 1]} : vector<32x9xf32> to vector<32x1xf32>
    %263 = vector.broadcast %262 : vector<32x1xf32> to vector<32x256xf32>
    %264 = arith.mulf %261, %263 : vector<32x256xf32>
    %265 = arith.addf %257, %264 : vector<32x256xf32>
    %c0_65 = arith.constant 0 : index
    %c0_66 = arith.constant 0 : index
    %266 = vector.load %arg17[%c0_65, %c0_66] : memref<32x1xf32, #tpu.memory_space<vmem>>, vector<32x1xf32>
    %267 = vector.broadcast %266 : vector<32x1xf32> to vector<32x256xf32>
    %268 = arith.addf %265, %267 : vector<32x256xf32>
    %269 = vector.extract_strided_slice %268 {offsets = [0, 0], sizes = [16, 256], strides = [1, 1]} : vector<32x256xf32> to vector<16x256xf32>
    %270 = vector.extract_strided_slice %268 {offsets = [16, 0], sizes = [16, 256], strides = [1, 1]} : vector<32x256xf32> to vector<16x256xf32>
    %cst_67 = arith.constant 5.000000e-01 : f32
    %271 = vector.broadcast %cst_67 : f32 to vector<16x256xf32>
    %272 = arith.mulf %271, %269 : vector<16x256xf32>
    %cst_68 = arith.constant 0.707106769 : f32
    %273 = vector.broadcast %cst_68 : f32 to vector<16x256xf32>
    %274 = arith.mulf %269, %273 : vector<16x256xf32>
    %275 = math.erf %274 : vector<16x256xf32>
    %cst_69 = arith.constant 1.000000e+00 : f32
    %276 = vector.broadcast %cst_69 : f32 to vector<16x256xf32>
    %277 = arith.addf %276, %275 : vector<16x256xf32>
    %278 = arith.mulf %272, %277 : vector<16x256xf32>
    %279 = arith.mulf %278, %270 : vector<16x256xf32>
    %c0_70 = arith.constant 0 : index
    %c0_71 = arith.constant 0 : index
    %280 = vector.load %arg18[%c0_70, %c0_71] : memref<8x16xf32, #tpu.memory_space<vmem>>, vector<8x16xf32>
    %cst_72 = arith.constant dense<0.000000e+00> : vector<8x256xf32>
    %281 = tpu.matmul %280, %279, %cst_72 {dimension_numbers = #tpu.dot_dimension_numbers<[1], [0], [0], [1], [0, 0, 1, 1], [], []>} : vector<8x16xf32>, vector<16x256xf32>, vector<8x256xf32> -> vector<8x256xf32>
    %c0_73 = arith.constant 0 : index
    %c0_74 = arith.constant 0 : index
    %282 = vector.load %arg19[%c0_73, %c0_74] : memref<8x1xf32, #tpu.memory_space<vmem>>, vector<8x1xf32>
    %283 = vector.broadcast %282 : vector<8x1xf32> to vector<8x256xf32>
    %284 = arith.addf %281, %283 : vector<8x256xf32>
    %285 = arith.addf %165, %284 : vector<8x256xf32>
    %c0_75 = arith.constant 0 : index
    %c0_76 = arith.constant 0 : index
    %c0_77 = arith.constant 0 : index
    %286 = vector.load %arg20[%c0_75, %c0_76, %c0_77] : memref<1x8x256xf32, #tpu.memory_space<vmem>>, vector<1x8x256xf32>
    %287 = vector.shape_cast %286 : vector<1x8x256xf32> to vector<8x256xf32>
    %288 = vector.shape_cast %285 : vector<8x256xf32> to vector<1x8x256xf32>
    tpu.vector_store %arg20[%c0_75, %c0_76, %c0_77], %288 {strides = array<i32>} : memref<1x8x256xf32, #tpu.memory_space<vmem>>, vector<1x8x256xf32>,
    return
  }
  func.func @transform_0(%arg0: i32) -> (i32, i32, i32) {
    %c0_i32 = arith.constant 0 : i32
    %c0_i32_0 = arith.constant 0 : i32
    %c0_i32_1 = arith.constant 0 : i32
    return %arg0, %c0_i32, %c0_i32_0 : i32, i32, i32
  }
  func.func @transform_1(%arg0: i32) -> i32 {
    %c0_i32 = arith.constant 0 : i32
    %c0_i32_0 = arith.constant 0 : i32
    return %c0_i32 : i32
  }
  func.func @transform_2(%arg0: i32) -> (i32, i32) {
    %c0_i32 = arith.constant 0 : i32
    %c0_i32_0 = arith.constant 0 : i32
    %c0_i32_1 = arith.constant 0 : i32
    return %c0_i32, %c0_i32_0 : i32, i32
  }
  func.func @transform_3(%arg0: i32) -> (i32, i32) {
    %c0_i32 = arith.constant 0 : i32
    %c0_i32_0 = arith.constant 0 : i32
    %c0_i32_1 = arith.constant 0 : i32
    return %c0_i32, %c0_i32_0 : i32, i32
  }
  func.func @transform_4(%arg0: i32) -> (i32, i32) {
    %c0_i32 = arith.constant 0 : i32
    %c0_i32_0 = arith.constant 0 : i32
    %c0_i32_1 = arith.constant 0 : i32
    return %c0_i32, %c0_i32_0 : i32, i32
  }
  func.func @transform_5(%arg0: i32) -> (i32, i32) {
    %c0_i32 = arith.constant 0 : i32
    %c0_i32_0 = arith.constant 0 : i32
    %c0_i32_1 = arith.constant 0 : i32
    return %c0_i32, %c0_i32_0 : i32, i32
  }
  func.func @transform_6(%arg0: i32) -> (i32, i32) {
    %c0_i32 = arith.constant 0 : i32
    %c0_i32_0 = arith.constant 0 : i32
    %c0_i32_1 = arith.constant 0 : i32
    return %c0_i32, %c0_i32_0 : i32, i32
  }
  func.func @transform_7(%arg0: i32) -> (i32, i32) {
    %c0_i32 = arith.constant 0 : i32
    %c0_i32_0 = arith.constant 0 : i32
    %c0_i32_1 = arith.constant 0 : i32
    return %c0_i32, %c0_i32_0 : i32, i32
  }
  func.func @transform_8(%arg0: i32) -> (i32, i32) {
    %c0_i32 = arith.constant 0 : i32
    %c0_i32_0 = arith.constant 0 : i32
    %c0_i32_1 = arith.constant 0 : i32
    return %c0_i32, %c0_i32_0 : i32, i32
  }
  func.func @transform_9(%arg0: i32) -> (i32, i32) {
    %c0_i32 = arith.constant 0 : i32
    %c0_i32_0 = arith.constant 0 : i32
    %c0_i32_1 = arith.constant 0 : i32
    return %c0_i32, %c0_i32_0 : i32, i32
  }
  func.func @transform_10(%arg0: i32) -> (i32, i32) {
    %c0_i32 = arith.constant 0 : i32
    %c0_i32_0 = arith.constant 0 : i32
    %c0_i32_1 = arith.constant 0 : i32
    return %c0_i32, %c0_i32_0 : i32, i32
  }
  func.func @transform_11(%arg0: i32) -> (i32, i32) {
    %c0_i32 = arith.constant 0 : i32
    %c0_i32_0 = arith.constant 0 : i32
    %c0_i32_1 = arith.constant 0 : i32
    return %c0_i32, %c0_i32_0 : i32, i32
  }
  func.func @transform_12(%arg0: i32) -> (i32, i32) {
    %c0_i32 = arith.constant 0 : i32
    %c0_i32_0 = arith.constant 0 : i32
    %c0_i32_1 = arith.constant 0 : i32
    return %c0_i32, %c0_i32_0 : i32, i32
  }
  func.func @transform_13(%arg0: i32) -> (i32, i32) {
    %c0_i32 = arith.constant 0 : i32
    %c0_i32_0 = arith.constant 0 : i32
    %c0_i32_1 = arith.constant 0 : i32
    return %c0_i32, %c0_i32_0 : i32, i32
  }
  func.func @transform_14(%arg0: i32) -> (i32, i32) {
    %c0_i32 = arith.constant 0 : i32
    %c0_i32_0 = arith.constant 0 : i32
    %c0_i32_1 = arith.constant 0 : i32
    return %c0_i32, %c0_i32_0 : i32, i32
  }
  func.func @transform_15(%arg0: i32) -> (i32, i32) {
    %c0_i32 = arith.constant 0 : i32
    %c0_i32_0 = arith.constant 0 : i32
    %c0_i32_1 = arith.constant 0 : i32
    return %c0_i32, %c0_i32_0 : i32, i32
  }
  func.func @transform_16(%arg0: i32) -> (i32, i32) {
    %c0_i32 = arith.constant 0 : i32
    %c0_i32_0 = arith.constant 0 : i32
    %c0_i32_1 = arith.constant 0 : i32
    return %c0_i32, %c0_i32_0 : i32, i32
  }
  func.func @transform_17(%arg0: i32) -> (i32, i32) {
    %c0_i32 = arith.constant 0 : i32
    %c0_i32_0 = arith.constant 0 : i32
    %c0_i32_1 = arith.constant 0 : i32
    return %c0_i32, %c0_i32_0 : i32, i32
  }
  func.func @transform_18(%arg0: i32) -> (i32, i32) {
    %c0_i32 = arith.constant 0 : i32
    %c0_i32_0 = arith.constant 0 : i32
    %c0_i32_1 = arith.constant 0 : i32
    return %c0_i32, %c0_i32_0 : i32, i32
  }
  func.func @transform_19(%arg0: i32) -> (i32, i32, i32) {
    %c0_i32 = arith.constant 0 : i32
    %c0_i32_0 = arith.constant 0 : i32
    %c0_i32_1 = arith.constant 0 : i32
    return %arg0, %c0_i32, %c0_i32_0 : i32, i32, i32
  }
}

</mosaic_0001>

<bundles_post_ra>
// kernel: transformer_block_forward.1
= control target key start
LH: loop header
LB: loop body
LE: loop exit
PB: predicated region body
PF: predicated region fallthrough
CT: control target
= control target key end

     0   :  { %s4640_s0 = inlined_call_operand.vmem [shape: f32[2,8,256], index: 0, kind: input, shape index: {}]   ;;  %s4641_s1 = inlined_call_operand.vmem [shape: f32[2], index: 1, kind: input, shape index: {}]   ;;  %s4642_s2 = inlined_call_operand.vmem [shape: f32[9,256], index: 2, kind: input, shape index: {}]   ;;  %s4643_s3 = inlined_call_operand.vmem [shape: f32[8,1], index: 3, kind: input, shape index: {}]   ;;  %s4644_s4 = inlined_call_operand.vmem [shape: f32[8,1], index: 4, kind: input, shape index: {}]   ;;  %s4645_s5 = inlined_call_operand.vmem [shape: f32[24,8], index: 5, kind: input, shape index: {}]   ;;  %s4646_s6 = inlined_call_operand.vmem [shape: f32[24,1], index: 6, kind: input, shape index: {}]   ;;  %s4647_s7 = inlined_call_operand.vmem [shape: f32[24,9], index: 7, kind: input, shape index: {}]   ;;  %s4648_s8 = inlined_call_operand.vmem [shape: f32[24,1], index: 8, kind: input, shape index: {}]   ;;  %s4649_s9 = inlined_call_operand.vmem [shape: f32[8,8], index: 9, kind: input, shape index: {}]   ;;  %s4650_s10 = inlined_call_operand.vmem [shape: f32[8,1], index: 10, kind: input, shape index: {}]   ;;  %s4651_s11 = inlined_call_operand.vmem [shape: f32[8,1], index: 11, kind: input, shape index: {}]   ;;  %s4652_s12 = inlined_call_operand.vmem [shape: f32[8,1], index: 12, kind: input, shape index: {}]   ;;  %s4653_s13 = inlined_call_operand.vmem [shape: f32[32,8], index: 13, kind: input, shape index: {}]   ;;  %s4654_s14 = inlined_call_operand.vmem [shape: f32[32,1], index: 14, kind: input, shape index: {}]   ;;  %s4655_s15 = inlined_call_operand.vmem [shape: f32[32,9], index: 15, kind: input, shape index: {}]   ;;  %s4656_s16 = inlined_call_operand.vmem [shape: f32[32,1], index: 16, kind: input, shape index: {}]   ;;  %s4657_s17 = inlined_call_operand.vmem [shape: f32[8,16], index: 17, kind: input, shape index: {}]   ;;  %s4658_s18 = inlined_call_operand.vmem [shape: f32[8,1], index: 18, kind: input, shape index: {}]   ;;  %s4659_s19 = inlined_call_operand.vmem [shape: f32[2,8,256], index: 19, kind: output, shape index: {}]  }
   0x1   :  { %4732 = sst [smem:[#allocation28_spill]] %s4640_s0 }
   0x2   :  { %4733 = sst [smem:[#allocation29_spill]] %s4641_s1 }
   0x3   :  { %4734 = sst [smem:[#allocation30_spill]] %s4642_s2 }
   0x4   :  { %4735 = sst [smem:[#allocation31_spill]] %s4643_s3 }
   0x5   :  { %24 = vsyncpa [#allocation3], 0  ;;  %s3029_s0 = smov 0  }
   0x6 LB: > { %s2696_s30 = sadd.s32 4294967295, %s2908_s0   ;;  %p2698_p0 = scmp.ge.s32.totalorder %s2908_s0, 1  ;;  %s2908_s0 = sphi %s3029_s0, %s30_s0  }
   0x7   : > { %p465_p1 = scmp.lt.s32.totalorder %s2908_s0, 3  ;;  %s4736_s1 = sld [smem:[#allocation29_spill]] }
   0x8   : > { %p2752_p3 = scmp.eq.s32.totalorder %s2696_s30, 0  ;;  %s2910_s2 = smov [#allocation2]  }
   0x9   : > { %p466_p2 = pnand %p2698_p0, %p465_p1 }
   0xb   : > { %p2748_p4 = pneg %p466_p2  ;;  %549 = sbr.rel (%p466_p2) target bundleno = 2391 (0x957), region = 96 }
   0xd   : > { %s477_s22 = sshll.u32 %s4736_s1, 4  ;;  %p2749_p5 = pnand %p2752_p3, %p2748_p4  ;;  %s478_s22 = int_to_ptr.vmem [resolvable:$true] %s477_s22 }
   0xf   : > { %2751 = dma.vmem_to_smem (!%p2749_p5), %s478_s22, 16, %s2910_s2, [#allocation3]  }
  0x10   : > { %2903 = dma.done.wait (%p2752_p3), [#allocation3], 16  }
  0x11   : > { %2905 = vsyncadd (%p2752_p3), [#allocation3], 4294967280 }
  0x12   : > { %556 = sfence }
  0x13   : > { %s4737_s25 = sld [smem:[#allocation31_spill]]  ;;  %v4666_v1 = vmov 0   ;;  %v706_v2 = vld [vmem:[%s4646_s6 + $0x8] sm:$0xff]  ;;  %v4680_v3 = vmov 1   ;;  %v694_v4 = vld [vmem:[%s4644_s4] sm:$0xff]  ;;  %p607_p6 = scmp.lt.s32.totalorder %s2696_s30, 1 }
  0x14   : > { %2781 = vset.pattern.permute.xlu0 %v4666_v1  ;;  %2782 = vset.pattern.permute.xlu1 %v4666_v1  ;;  %v3055_v5 = vld [vmem:[%s4647_s7 + $0x8] sm:$0xff]  ;;  %s4738_s2 = sld [smem:[#allocation28_spill]]  ;;  %v2913_v6 = vmov 8.0   ;;  %v4678_v15 = vmov 2   ;;  %v705_v50 = vld [vmem:[%s4646_s6] sm:$0xff]  ;;  %v4676_v53 = vmov 3  }
  0x15   : > { %715 = vperm.xlu1 %2782, %v706_v2   ;;  %2785 = vset.pattern.permute.xlu2 %v4680_v3  ;;  %s4832_s30 = smov (!%p607_p6, %s2696_s30), 1  ;;  %2844 = vrcp.f32 %v2913_v6  ;;  %v3088_v56 = vld [vmem:[%s4647_s7] sm:$0xff]  ;;  %v4672_v61 = vmov 4   ;;  %vm723_vm7 = vcmask 64512   ;;  %s4702_s1 = smov 127  }
  0x16   : > { %s4661_s21 = sshll.u32 %s4832_s30, 4  ;;  %872 = vperm.xlu2 %2785, %v3088_v56   ;;  %s2921_s22 = smov 17  }
  0x17   : > { %s2923_s24 = smov 16   ;;  %s4704_s3 = smov 1  }
  0x18   : > { %s4698_s26 = smov 111   ;;  %s4700_s27 = smov 113  }
  0x19   : > { %v686_v0 = vld [vmem:[%s4737_s25] sm:$0xff]  ;;  %s4706_s25 = smov 15   ;;  %s4742_s29 = sld [smem:[#allocation30_spill]] }
  0x1a   : > { %689 = vperm.xlu0 %2781, %v686_v0   ;;  %s3068_s23 = scalar_lea.vmem %s4738_s2, %s4661_s21  ;;  %s4662_s2 = smov 112  }
  0x1b   : > { %v617_v7 = vld [vmem:[%s3068_s23] sm:$0xff]  ;;  %v618_v8 = vld [vmem:[%s3068_s23 + $0x8] sm:$0xff]  ;;  %v2845_v11 = vpop.eup %2844  ;;  %s4759_s28 = smov 112   ;;  %s1365_s20 = sld [smem:[#allocation2]] }
  0x1c   : > { %v623_v9 = vrot.slane %v617_v7, 4  ;;  %v629_v10 = vrot.slane %v618_v8, 4  ;;  %v636_v14 = vmul.f32 8.0, %v2845_v11  ;;  %vm640_vm0 = vweird.f32 %v2845_v11  ;;  %s4783_s21 = smov 111  }
  0x1d   : > { %710 = vperm.xlu1 %2782, %v705_v50  }
  0x1e   : > { %v624_v12 = vadd.f32 %v623_v9, %v617_v7  ;;  %v630_v13 = vadd.f32 %v629_v10, %v618_v8  ;;  %v637_v18 = vsub.f32 1.0, %v636_v14  ;;  %2788 = vset.pattern.permute.xlu2 %v4672_v61 }
  0x1f   : > { %1010 = vperm.xlu2 %2788, %v3055_v5  }
  0x20   : > { %v625_v16 = vrot.slane %v624_v12, 2  ;;  %v631_v17 = vrot.slane %v630_v13, 2  ;;  %v638_v21 = vmul.f32 %v2845_v11, %v637_v18  ;;  %v4674_v18 = vmov 5  }
  0x22   : > { %697 = vperm.xlu0 %2781, %v694_v4   ;;  %v626_v19 = vadd.f32 %v625_v16, %v624_v12  ;;  %v632_v20 = vadd.f32 %v631_v17, %v630_v13  ;;  %v639_v24 = vadd.f32 %v2845_v11, %v638_v21  ;;  %v702_v16 = vld [vmem:[%s4645_s5] sm:$0xff]  ;;  %v703_v17 = vld [vmem:[%s4645_s5 + $0x8] sm:$0xff] }
  0x24   : > { %v627_v22 = vrot.slane %v626_v19, 1  ;;  %v633_v23 = vrot.slane %v632_v20, 1  ;;  %v3074_v27 = vsel %vm640_vm0, %v2845_v11, %v639_v24 }
  0x25   : > { %4739 = vst [vmem:[#allocation5_spill] sm:$0xff] %v3074_v27  ;;  %819 = vperm.xlu1 %2782, %v3088_v56  }
  0x26   : > { %v628_v25 = vadd.f32 %v627_v22, %v626_v19  ;;  %v634_v26 = vadd.f32 %v633_v23, %v632_v20  ;;  %v4670_v19 = vmov 6   ;;  %v4668_v20 = vmov 7  }
  0x27   : > { %2789 = vset.pattern.permute.xlu2 %v4674_v18 }
  0x28   : > { %v642_v28 = vmul.f32 %v3074_v27, %v628_v25  ;;  %v643_v29 = vmul.f32 %v3074_v27, %v634_v26  ;;  %1061 = vperm.xlu2 %2789, %v3055_v5  }
  0x2a   : > { %824 = vperm.xlu0 %2781, %v3055_v5   ;;  %v644_v30 = vsub.f32 %v617_v7, %v642_v28  ;;  %v645_v31 = vsub.f32 %v618_v8, %v643_v29 }
  0x2c   : > { %v646_v32 = vmul.f32 %v644_v30, %v644_v30  ;;  %v647_v33 = vmul.f32 %v645_v31, %v645_v31 }
  0x2d   : > { %2787 = vset.pattern.permute.xlu1 %v4678_v15 }
  0x2e   : > { %v648_v34 = vrot.slane %v646_v32, 4  ;;  %v654_v35 = vrot.slane %v647_v33, 4  ;;  %923 = vperm.xlu1 %2787, %v3088_v56  }
  0x30   : > { %v649_v36 = vadd.f32 %v648_v34, %v646_v32  ;;  %v655_v37 = vadd.f32 %v654_v35, %v647_v33  ;;  %2794 = vset.pattern.permute.xlu2 %v4670_v19  ;;  %v4664_v32 = vmov 8  }
  0x31   : > { %1108 = vperm.xlu2 %2794, %v3088_v56  }
  0x32   : > { %2783 = vset.pattern.permute.xlu0 %v4680_v3  ;;  %v650_v38 = vrot.slane %v649_v36, 2  ;;  %v656_v39 = vrot.slane %v655_v37, 2 }
  0x33   : > { %876 = vperm.xlu0 %2783, %v3055_v5  }
  0x34   : > { %v651_v40 = vadd.f32 %v650_v38, %v649_v36  ;;  %v657_v41 = vadd.f32 %v656_v39, %v655_v37 }
  0x36   : > { %v652_v42 = vrot.slane %v651_v40, 1  ;;  %v658_v43 = vrot.slane %v657_v41, 1  ;;  %2792 = vset.pattern.permute.xlu1 %v4674_v18 }
  0x37   : > { %1057 = vperm.xlu1 %2792, %v3088_v56  }
  0x38   : > { %v653_v44 = vadd.f32 %v652_v42, %v651_v40  ;;  %v659_v45 = vadd.f32 %v658_v43, %v657_v41 }
  0x39   : > { %2795 = vset.pattern.permute.xlu2 %v4664_v32 }
  0x3a   : > { %v660_v46 = vmul.f32 %v653_v44, %v3074_v27  ;;  %v661_v47 = vmul.f32 %v659_v45, %v3074_v27  ;;  %v1233_v45 = vld [vmem:[%s4648_s8] sm:$0xff] }
  0x3b   : > { %2784 = vset.pattern.permute.xlu0 %v4678_v15 }
  0x3c   : > { %927 = vperm.xlu0 %2784, %v3055_v5   ;;  %v662_v48 = vadd.f32 1e-05, %v660_v46  ;;  %v663_v49 = vadd.f32 1e-05, %v661_v47 }
  0x3e   : > { %2846 = vrsqrt.f32 %v662_v48  ;;  %vm670_vm1 = vweird.f32 %v662_v48  ;;  %vm680_vm3 = vweird.f32 %v663_v49 }
  0x3f   : > { %2848 = vrsqrt.f32 %v663_v49  ;;  %2793 = vset.pattern.permute.xlu1 %v4668_v20 }
  0x40   : > { %1163 = vperm.xlu1 %2793, %v3055_v5  }
  0x44   : > { %v2847_v51 = vpop.eup %2846  ;;  %2786 = vset.pattern.permute.xlu0 %v4676_v53 }
  0x45   : > { %v2849_v52 = vpop.eup %2848  ;;  %978 = vperm.xlu0 %2786, %v3055_v5   ;;  %v665_v54 = vmul.f32 %v2847_v51, %v662_v48  ;;  %vm671_vm2 = vweird.f32 %v2847_v51 }
  0x46   : > { %v675_v55 = vmul.f32 %v2849_v52, %v663_v49  ;;  %vm681_vm4 = vweird.f32 %v2849_v52  ;;  %vm672_vm5 = vmor %vm670_vm1, %vm671_vm2  ;;  %v1234_v49 = vld [vmem:[%s4648_s8 + $0x8] sm:$0xff] }
  0x47   : > { %v666_v57 = vmul.f32 %v2847_v51, %v665_v54  ;;  %vm682_vm6 = vmor %vm680_vm3, %vm681_vm4 }
  0x48   : > { %v676_v58 = vmul.f32 %v2849_v52, %v675_v55  ;;  %2797 = vset.pattern.permute.xlu1 %v4664_v32 }
  0x49   : > { %v667_v59 = vmul.f32 0.5, %v666_v57 }
  0x4a   : > { %v677_v60 = vmul.f32 0.5, %v676_v58 }
  0x4b   : > { %v668_v62 = vsub.f32 1.5, %v667_v59 }
  0x4c   : > { %v678_v63 = vsub.f32 1.5, %v677_v60 }
  0x4d   : > { %974 = vperm.xlu0 %2786, %v3088_v56   ;;  %v669_v0 = vmul.f32 %v2847_v51, %v668_v62 }
  0x4e   : > { %v679_v2 = vmul.f32 %v2849_v52, %v678_v63 }
  0x4f   : > { %v673_v6 = vsel %vm672_vm5, %v2847_v51, %v669_v0 }
  0x50   : > { %v683_v7 = vsel %vm682_vm6, %v2849_v52, %v679_v2  ;;  %v684_v8 = vmul.f32 %v673_v6, %v644_v30 }
  0x51   : > { %v685_v9 = vmul.f32 %v683_v7, %v645_v31 }
  0x55   : > { %2790 = vset.pattern.permute.xlu0 %v4672_v61 }
  0x56   : > { %1006 = vperm.xlu0 %2790, %v3088_v56  }
  0x5e   : > { %2791 = vset.pattern.permute.xlu0 %v4670_v19 }
  0x5f   : > { %1112 = vperm.xlu0 %2791, %v3055_v5  }
  0x67   : > { %2796 = vset.pattern.permute.xlu0 %v4668_v20 }
  0x70   : > { %v3170_v33 = vpop.permute.xlu2 %872 }
  0x79   : > { %v3176_v34 = vpop.permute.xlu2 %1010 }
  0x82   : > { %v3182_v35 = vpop.permute.xlu2 %1061 }
  0x87   : > { %v716_v21 = vpop.permute.xlu1 %715 }
  0x8b   : > { %v3193_v37 = vpop.permute.xlu2 %1108 }
  0x8c   : > { %v690_v4 = vpop.permute.xlu0 %689 }
  0x8d   : > { %v692_v10 = vmul.f32 %v690_v4, %v684_v8  ;;  %v693_v11 = vmul.f32 %v690_v4, %v685_v9 }
  0x8f   : > { %v711_v22 = vpop.permute.xlu1 %710 }
  0x94   : > { %v698_v12 = vpop.permute.xlu0 %697 }
  0x95   : > { %v700_v13 = vadd.f32 %v698_v12, %v692_v10  ;;  %v701_v14 = vadd.f32 %v698_v12, %v693_v11  ;;  %v800_v11 = vlaneseq  ;;  %v3269_v12 = vld [vmem:[%s4742_s29] sm:$0xff] }
  0x96   : > { %v3332_v20 = vperm.slane %v3269_v12, 2 }
  0x97   : > { %748 = vmatpush.msra.mxu0 %v700_v13  ;;  %2742 = vmatpush.msra.mxu2 %v700_v13  ;;  %v3187_v36 = vpop.permute.xlu1 %819  ;;  %v3274_v13 = vld [vmem:[%s4742_s29 + $0x8] sm:$0xff] }
  0x98   : > { %774 = vmatpush.msra.mxu1 %v701_v14  ;;  %2743 = vmatpush.msra.mxu3 %v701_v14  ;;  %v3276_v14 = vand.u32 127, %v800_v11  ;;  %4749 = vst [vmem:[#allocation14_spill] sm:$0xff] %v3332_v20  ;;  %v3335_v19 = vperm.slane %v3274_v13, 2 }
  0x99   : > { %2707 = vmatmul.msk.f32.vlgmr.msra.gmra.mxu0 %vm723_vm7, %v702_v16  ;;  %2708 = vmatmul.msk.f32.vlgmr.msra.gmra.mxu2 %vm723_vm7, %v703_v17 }
  0x9a   : > { %2710 = vmatmul.msk.f32.vlgmr.msra.gmra.mxu1 %vm723_vm7, %v702_v16  ;;  %2711 = vmatmul.msk.f32.vlgmr.msra.gmra.mxu3 %vm723_vm7, %v703_v17  ;;  %v3279_v16 = vperm.slane %v3269_v12, 4  ;;  %vm802_vm8 = vcmp.lt.s32.totalorder %v3276_v14, 17  ;;  %vm856_vm9 = vcmp.lt.s32.totalorder %v3276_v14, 16  ;;  %vm907_vm10 = vcmp.lt.s32.totalorder %v3276_v14, 15 }
  0x9b   : > { %vm958_vm11 = vcmp.lt.s32.totalorder %v3276_v14, 1  ;;  %vm1041_vm12 = vcmp.lt.s32.totalorder %v3276_v14, 127  ;;  %vm1143_vm13 = vcmp.lt.s32.totalorder %v3276_v14, 112  ;;  %vm1092_vm14 = vcmp.lt.s32.totalorder %v3276_v14, 113 }
  0x9c   : > { %v3206_v40 = vpop.permute.xlu0 %824  ;;  %4743 = vst [vmem:[#allocation8_spill] sm:$0xff] %v3279_v16  ;;  %vm1194_vm15 = vcmp.lt.s32.totalorder %v3276_v14, 111 }
  0xa0   : > { %v3196_v38 = vpop.permute.xlu1 %923 }
  0xa5   : > { %v3212_v42 = vpop.permute.xlu0 %876 }
  0xa9   : > { %v3204_v39 = vpop.permute.xlu1 %1057 }
  0xae   : > { %v3227_v46 = vpop.permute.xlu0 %927 }
  0xb2   : > { %v3215_v43 = vpop.permute.xlu1 %1163 }
  0xb7   : > { %v3236_v52 = vpop.permute.xlu0 %978 }
 0x116   : > { %v750_v23 = vpop.f32.mrf.mxu0 }
 0x117   : > { %v3120_v24 = vadd.f32 %v750_v23, %v711_v22  ;;  %v776_v25 = vpop.f32.mrf.mxu1 }
 0x118   : > { %v3122_v26 = vadd.f32 %v776_v25, %v711_v22 }
 0x119   : > { %1029 = vrot.lane.b32.xlu0 %v3120_v24, %s4702_s1  ;;  %788 = vrot.lane.b32.xlu1 %v3120_v24, %s2921_s22 }
 0x11a   : > { %794 = vrot.lane.b32.xlu2 %v3122_v26, %s2921_s22 }
 0x11c   : > { %v753_v28 = vpop.f32.mrf.mxu2 }
 0x11d   : > { %v3136_v29 = vadd.f32 %v753_v28, %v716_v21  ;;  %v779_v30 = vpop.f32.mrf.mxu3 }
 0x11e   : > { %v3144_v31 = vadd.f32 %v779_v30, %v716_v21  ;;  %v3282_v21 = vperm.slane %v3274_v13, 4  ;;  %v704_v30 = vld [vmem:[%s4645_s5 + $0x10] sm:$0xff] }
 0x11f   : > { %v1001_v23 = vmul.f32 %v3279_v16, %v3136_v29  ;;  %2709 = vmatmul.msk.f32.gmra.mxu2 %vm723_vm7, %v704_v30  ;;  %2712 = vmatmul.msk.f32.gmra.mxu3 %vm723_vm7, %v704_v30 }
 0x120   : > { %4744 = vst [vmem:[#allocation9_spill] sm:$0xff] %v3282_v21  ;;  %v1002_v25 = vmul.f32 %v3282_v21, %v3144_v31 }
 0x121   : > { %1137 = vrot.lane.b32.xlu0 %v3122_v26, %s4662_s2  ;;  %844 = vrot.lane.b32.xlu1 %v3120_v24, %s2923_s24 }
 0x122   : > { %850 = vrot.lane.b32.xlu2 %v3122_v26, %s2923_s24  ;;  %v3321_v32 = vmul.f32 %v3176_v34, %v1002_v25 }
 0x129   : > { %846 = vrot.lane.b32.xlu0 %v3136_v29, %s2923_s24  ;;  %895 = vrot.lane.b32.xlu1 %v3120_v24, %s4706_s25 }
 0x12a   : > { %901 = vrot.lane.b32.xlu2 %v3122_v26, %s4706_s25 }
 0x131   : > { %903 = vrot.lane.b32.xlu0 %v3144_v31, %s4706_s25  ;;  %946 = vrot.lane.b32.xlu1 %v3120_v24, %s4704_s3 }
 0x132   : > { %952 = vrot.lane.b32.xlu2 %v3122_v26, %s4704_s3 }
 0x139   : > { %1182 = vrot.lane.b32.xlu0 %v3120_v24, %s4698_s26  ;;  %1035 = vrot.lane.b32.xlu1 %v3122_v26, %s4702_s1 }
 0x13a   : > { %1086 = vrot.lane.b32.xlu2 %v3122_v26, %s4700_s27 }
 0x141   : > { %1159 = vperm.xlu0 %2796, %v3088_v56   ;;  %1080 = vrot.lane.b32.xlu1 %v3120_v24, %s4700_s27 }
 0x142   : > { %1131 = vrot.lane.b32.xlu2 %v3120_v24, %s4662_s2 }
 0x149   : > { %852 = vrot.lane.b32.xlu1 %v3144_v31, %s2923_s24  ;;  %2800 = vset.pattern.permute.xlu0 %v4666_v1 }
 0x14a   : > { %790 = vrot.lane.b32.xlu2 %v3136_v29, %s2921_s22 }
 0x151   : > { %1188 = vrot.lane.b32.xlu1 %v3122_v26, %s4698_s26 }
 0x152   : > { %796 = vrot.lane.b32.xlu2 %v3144_v31, %s2921_s22 }
 0x159   : > { %948 = vrot.lane.b32.xlu1 %v3136_v29, %s4704_s3 }
 0x15a   : > { %897 = vrot.lane.b32.xlu2 %v3136_v29, %s4706_s25 }
 0x161   : > { %1037 = vrot.lane.b32.xlu1 %v3144_v31, %s4702_s1 }
 0x162   : > { %1214 = vperm.xlu2 %2795, %v3055_v5  }
 0x169   : > { %1082 = vrot.lane.b32.xlu1 %v3136_v29, %s4700_s27 }
 0x16a   : > { %954 = vrot.lane.b32.xlu2 %v3144_v31, %s4704_s3 }
 0x16b   : > { %2798 = vset.pattern.permute.xlu2 %v4666_v1 }
 0x171   : > { %1133 = vrot.lane.b32.xlu1 %v3136_v29, %s4662_s2 }
 0x172   : > { %1031 = vrot.lane.b32.xlu2 %v3136_v29, %s4702_s1 }
 0x174   : > { %v3202_v5 = vpop.permute.xlu2 %794 }
 0x179   : > { %1190 = vrot.lane.b32.xlu1 %v3144_v31, %s4698_s26 }
 0x17a   : > { %1088 = vrot.lane.b32.xlu2 %v3144_v31, %s4700_s27 }
 0x17c   : > { %v851_v41 = vpop.permute.xlu2 %850 }
 0x181   : > { %1210 = vperm.xlu1 %2797, %v3088_v56   ;;  %v3242_v56 = vpop.permute.xlu0 %974 }
 0x182   : > { %1139 = vrot.lane.b32.xlu2 %v3144_v31, %s4662_s2  ;;  %v3309_v31 = vmul.f32 %v3176_v34, %v1001_v23  ;;  %v3338_v34 = vperm.slane %v3269_v12, 7  ;;  %s4781_s2 = smov 113  }
 0x184   : > { %v3219_v44 = vpop.permute.xlu2 %901 }
 0x189   : > { %2799 = vset.pattern.permute.xlu1 %v4666_v1  ;;  %v3246_v59 = vpop.permute.xlu0 %1006  ;;  %v3324_v1 = vperm.slane %v3274_v13, 0 }
 0x18a   : > { %1184 = vrot.lane.b32.xlu2 %v3136_v29, %s4698_s26  ;;  %1238 = vperm.xlu1 %2799, %v1233_v45   ;;  %v3297_v45 = vmul.f32 %v3279_v16, %v3120_v24  ;;  %v3304_v29 = vperm.slane %v3269_v12, 0  ;;  %v3315_v24 = vperm.slane %v3269_v12, 1 }
 0x18b   : > { %v789_v47 = vpop.permute.xlu1 %788  ;;  %4748 = vst [vmem:[#allocation13_spill] sm:$0xff] %v3324_v1 }
 0x18c   : > { %v3229_v48 = vpop.permute.xlu2 %952  ;;  %4745 = vst [vmem:[#allocation10_spill] sm:$0xff] %v3304_v29  ;;  %v806_v11 = vsel %vm802_vm8, %v3202_v5, %v789_v47  ;;  %v803_v61 = vsel %vm802_vm8, %v789_v47, %v3202_v5  ;;  %v3356_v5 = vperm.slane %v3269_v12, 3  ;;  %v3359_v47 = vperm.slane %v3274_v13, 3 }
 0x18d   : > { %4746 = vst [vmem:[#allocation11_spill] sm:$0xff] %v3315_v24  ;;  %v811_v18 = vmul.f32 %v3304_v29, %v806_v11 }
 0x191   : > { %v3250_v63 = vpop.permute.xlu0 %1112 }
 0x192   : > { %1243 = vperm.xlu2 %2798, %v1234_v49   ;;  %v3301_v49 = vmul.f32 %v3282_v21, %v3122_v26  ;;  %v3318_v26 = vperm.slane %v3274_v13, 1  ;;  %v3374_v21 = vperm.slane %v3274_v13, 5 }
 0x193   : > { %v845_v50 = vpop.permute.xlu1 %844 }
 0x194   : > { %v3234_v51 = vpop.permute.xlu2 %1086  ;;  %4747 = vst [vmem:[#allocation12_spill] sm:$0xff] %v3318_v26  ;;  %v857_v23 = vsel %vm856_vm9, %v845_v50, %v851_v41  ;;  %v860_v30 = vsel %vm856_vm9, %v851_v41, %v845_v50 }
 0x195   : > { %v865_v15 = vmul.f32 %v3315_v24, %v860_v30  ;;  %v866_v3 = vmul.f32 %v3318_v26, %v857_v23  ;;  %v3371_v30 = vperm.slane %v3269_v12, 5 }
 0x199   : > { %v3256_v4 = vpop.permute.xlu0 %1029 }
 0x19b   : > { %v3238_v54 = vpop.permute.xlu1 %895 }
 0x19c   : > { %v3240_v55 = vpop.permute.xlu2 %1131 }
 0x19d   : > { %4740 = vst [vmem:[#allocation6_spill] sm:$0xff] %v3240_v55  ;;  %v884_v55 = vmul.f32 %v3170_v33, %v866_v3 }
 0x1a1   : > { %v3264_v10 = vpop.permute.xlu0 %1137 }
 0x1a3   : > { %v3244_v57 = vpop.permute.xlu1 %946 }
 0x1a4   : > { %v791_v58 = vpop.permute.xlu2 %790 }
 0x1a9   : > { %v847_v28 = vpop.permute.xlu0 %846 }
 0x1ab   : > { %v3248_v60 = vpop.permute.xlu1 %1035 }
 0x1ac   : > { %v797_v62 = vpop.permute.xlu2 %796 }
 0x1ad   : > { %v804_v27 = vsel %vm802_vm8, %v791_v58, %v797_v62  ;;  %v807_v16 = vsel %vm802_vm8, %v797_v62, %v791_v58 }
 0x1ae   : > { %v813_v58 = vmul.f32 %v3304_v29, %v807_v16  ;;  %v814_v62 = vmul.f32 %v3324_v1, %v804_v27  ;;  %v3412_v29 = vperm.slane %v3269_v12, 6 }
 0x1b1   : > { %v904_v16 = vpop.permute.xlu0 %903 }
 0x1b3   : > { %v3252_v0 = vpop.permute.xlu1 %1080 }
 0x1b4   : > { %v3254_v2 = vpop.permute.xlu2 %897 }
 0x1b5   : > { %v909_v27 = vsel %vm907_vm10, %v3254_v2, %v904_v16 }
 0x1bb   : > { %v853_v6 = vpop.permute.xlu1 %852 }
 0x1bc   : > { %v3258_v7 = vpop.permute.xlu2 %1214  ;;  %v858_v41 = vsel %vm856_vm9, %v847_v28, %v853_v6  ;;  %v861_v50 = vsel %vm856_vm9, %v853_v6, %v847_v28  ;;  %v3362_v6 = vperm.slane %v3274_v13, 7  ;;  %v812_v28 = vmul.f32 %v3324_v1, %v803_v61 }
 0x1bd   : > { %v867_v11 = vmul.f32 %v3315_v24, %v861_v50  ;;  %v868_v23 = vmul.f32 %v3318_v26, %v858_v41  ;;  %v883_v61 = vmul.f32 %v3170_v33, %v865_v15  ;;  %v911_v41 = vsel %vm907_vm10, %v3219_v44, %v3238_v54 }
 0x1be   : > { %v912_v50 = vsel %vm907_vm10, %v904_v16, %v3254_v2  ;;  %v908_v2 = vsel %vm907_vm10, %v3238_v54, %v3219_v44  ;;  %v916_v16 = vmul.f32 %v3332_v20, %v911_v41  ;;  %v3415_v44 = vperm.slane %v3274_v13, 6 }
 0x1bf   : > { %v885_v33 = vmul.f32 %v3212_v42, %v867_v11  ;;  %v886_v26 = vmul.f32 %v3212_v42, %v868_v23 }
 0x1c0   : > { %v934_v12 = vmul.f32 %v3196_v38, %v916_v16 }
 0x1c3   : > { %v3260_v8 = vpop.permute.xlu1 %1188 }
 0x1c4   : > { %4741 = vst [vmem:[#allocation7_spill] sm:$0xff] %v3260_v8  ;;  %v3262_v9 = vpop.permute.xlu2 %954  ;;  %v832_v8 = vmul.f32 %v3187_v36, %v811_v18  ;;  %v833_v18 = vmul.f32 %v3187_v36, %v812_v28  ;;  %v835_v36 = vmul.f32 %v3206_v40, %v814_v62  ;;  %v919_v28 = vmul.f32 %v3335_v19, %v909_v27 }
 0x1c6   : > { %v889_v23 = vadd.f32 %v883_v61, %v832_v8  ;;  %v890_v1 = vadd.f32 %v884_v55, %v833_v18  ;;  %v892_v8 = vadd.f32 %v886_v26, %v835_v36  ;;  %v917_v55 = vmul.f32 %v3335_v19, %v908_v2 }
 0x1c7   : > { %v937_v27 = vmul.f32 %v3227_v46, %v919_v28 }
 0x1c8   : > { %v935_v2 = vmul.f32 %v3196_v38, %v917_v55  ;;  %v1042_v38 = vsel %vm1041_vm12, %v3256_v4, %v3248_v60 }
 0x1cb   : > { %v949_v17 = vpop.permute.xlu1 %948 }
 0x1cc   : > { %v3284_v22 = vpop.permute.xlu2 %1031  ;;  %v960_v15 = vsel %vm958_vm11, %v949_v17, %v3262_v9  ;;  %v963_v3 = vsel %vm958_vm11, %v3262_v9, %v949_v17  ;;  %v834_v9 = vmul.f32 %v3206_v40, %v813_v58  ;;  %v918_v17 = vmul.f32 %v3332_v20, %v912_v50 }
 0x1cd   : > { %v969_v11 = vmul.f32 %v3356_v5, %v963_v3  ;;  %v970_v42 = vmul.f32 %v3359_v47, %v960_v15  ;;  %v959_v40 = vsel %vm958_vm11, %v3244_v57, %v3229_v48  ;;  %v962_v58 = vsel %vm958_vm11, %v3229_v48, %v3244_v57 }
 0x1ce   : > { %v891_v62 = vadd.f32 %v885_v33, %v834_v9  ;;  %v936_v41 = vmul.f32 %v3227_v46, %v918_v17  ;;  %v967_v26 = vmul.f32 %v3356_v5, %v962_v58  ;;  %v968_v50 = vmul.f32 %v3359_v47, %v959_v40 }
 0x1cf   : > { %v987_v48 = vmul.f32 %v3236_v52, %v969_v11  ;;  %v988_v57 = vmul.f32 %v3236_v52, %v970_v42  ;;  %v940_v52 = vadd.f32 %v934_v12, %v889_v23  ;;  %v1045_v42 = vsel %vm1041_vm12, %v3248_v60, %v3256_v4  ;;  %v1183_v4 = vpop.permute.xlu0 %1182 }
 0x1d0   : > { %v942_v18 = vadd.f32 %v936_v41, %v891_v62  ;;  %v985_v28 = vmul.f32 %v3242_v56, %v967_v26  ;;  %v986_v11 = vmul.f32 %v3242_v56, %v968_v50  ;;  %v941_v62 = vadd.f32 %v935_v2, %v890_v1 }
 0x1d1   : > { %v1093_v56 = vsel %vm1092_vm14, %v3252_v0, %v3234_v51  ;;  %v1050_v41 = vmul.f32 %v3371_v30, %v1042_v38  ;;  %v4750_v38 = vld [vmem:[#allocation6_spill] sm:$0xff] }
 0x1d2   : > { %v993_v36 = vadd.f32 %v987_v48, %v942_v18  ;;  %v1101_v26 = vmul.f32 %v3412_v29, %v1093_v56 }
 0x1d3   : > { %v1038_v25 = vpop.permute.xlu1 %1037  ;;  %v1068_v2 = vmul.f32 %v3204_v39, %v1050_v41 }
 0x1d4   : > { %v1089_v53 = vpop.permute.xlu2 %1088  ;;  %v1043_v13 = vsel %vm1041_vm12, %v3284_v22, %v1038_v25  ;;  %v1046_v61 = vsel %vm1041_vm12, %v1038_v25, %v3284_v22  ;;  %v943_v22 = vadd.f32 %v937_v27, %v892_v8  ;;  %v1096_v8 = vsel %vm1092_vm14, %v3234_v51, %v3252_v0  ;;  %v3484_v51 = vld [vmem:[%s4742_s29 + $0x10] ss:$0 sm:$0xff]  ;;  %v3489_v0 = vld [vmem:[%s4742_s29 + $0x18] ss:$0 sm:$0xff] }
 0x1d5   : > { %v1052_v25 = vmul.f32 %v3371_v30, %v1043_v13  ;;  %v1053_v46 = vmul.f32 %v3374_v21, %v1046_v61  ;;  %v991_v13 = vadd.f32 %v985_v28, %v940_v52  ;;  %v992_v61 = vadd.f32 %v986_v11, %v941_v62 }
 0x1d6   : > { %v994_v17 = vadd.f32 %v988_v57, %v943_v22  ;;  %v1051_v27 = vmul.f32 %v3374_v21, %v1045_v42  ;;  %v1102_v50 = vmul.f32 %v3415_v44, %v1096_v8  ;;  %v1119_v28 = vmul.f32 %v3193_v37, %v1101_v26 }
 0x1d7   : > { %v1070_v23 = vmul.f32 %v3182_v35, %v1052_v25 }
 0x1d8   : > { %v1026_v55 = vadd.f32 %v3321_v32, %v994_v17  ;;  %v1069_v52 = vmul.f32 %v3204_v39, %v1051_v27  ;;  %v1120_v11 = vmul.f32 %v3193_v37, %v1102_v50  ;;  %v1147_v39 = vsel %vm1143_vm13, %v3264_v10, %v4750_v38 }
 0x1db   : > { %v1083_v24 = vpop.permute.xlu1 %1082 }
 0x1dc   : > { %v1140_v54 = vpop.permute.xlu2 %1139  ;;  %v1094_v15 = vsel %vm1092_vm14, %v1083_v24, %v1089_v53  ;;  %v1097_v3 = vsel %vm1092_vm14, %v1089_v53, %v1083_v24 }
 0x1dd   : > { %v1103_v53 = vmul.f32 %v3412_v29, %v1094_v15  ;;  %v1104_v24 = vmul.f32 %v3415_v44, %v1097_v3 }
 0x1df   : > { %v1121_v1 = vmul.f32 %v3250_v63, %v1103_v53  ;;  %v1122_v12 = vmul.f32 %v3250_v63, %v1104_v24 }
 0x1e3   : > { %v1134_v33 = vpop.permute.xlu1 %1133 }
 0x1e4   : > { %v1145_v16 = vsel %vm1143_vm13, %v1134_v33, %v1140_v54  ;;  %v1148_v9 = vsel %vm1143_vm13, %v1140_v54, %v1134_v33  ;;  %v1071_v54 = vmul.f32 %v3182_v35, %v1053_v46  ;;  %v1185_v60 = vpop.permute.xlu2 %1184  ;;  %v1025_v35 = vadd.f32 %v3309_v31, %v993_v36 }
 0x1e5   : > { %v1154_v40 = vmul.f32 %v3338_v34, %v1145_v16  ;;  %v1155_v58 = vmul.f32 %v3362_v6, %v1148_v9  ;;  %v1018_v33 = vmul.f32 %v3246_v59, %v3301_v49 }
 0x1e6   : > { %v1076_v32 = vadd.f32 %v1070_v23, %v1025_v35  ;;  %v1077_v31 = vadd.f32 %v1071_v54, %v1026_v55  ;;  %v4751_v54 = vld [vmem:[#allocation7_spill] sm:$0xff] }
 0x1e7   : > { %v1172_v63 = vmul.f32 %v3215_v43, %v1154_v40  ;;  %v1173_v48 = vmul.f32 %v3215_v43, %v1155_v58  ;;  %v1017_v43 = vmul.f32 %v3246_v59, %v3297_v45  ;;  %v1024_v53 = vadd.f32 %v1018_v33, %v992_v61  ;;  %v1160_v58 = vpop.permute.xlu0 %1159 }
 0x1e8   : > { %v1127_v18 = vadd.f32 %v1121_v1, %v1076_v32  ;;  %v1128_v22 = vadd.f32 %v1122_v12, %v1077_v31  ;;  %v1144_v59 = vsel %vm1143_vm13, %v4750_v38, %v3264_v10  ;;  %v1195_v40 = vsel %vm1194_vm15, %v1183_v4, %v4751_v54 }
 0x1e9   : > { %v1023_v24 = vadd.f32 %v1017_v43, %v991_v13  ;;  %v1075_v23 = vadd.f32 %v1069_v52, %v1024_v53  ;;  %v1198_v37 = vsel %vm1194_vm15, %v4751_v54, %v1183_v4  ;;  %v1152_v10 = vmul.f32 %v3338_v34, %v1144_v59  ;;  %v782_v52 = vpop.f32.mrf.mxu3 }
 0x1ea   : > { %v1178_v36 = vadd.f32 %v1172_v63, %v1127_v18  ;;  %v1179_v17 = vadd.f32 %v1173_v48, %v1128_v22  ;;  %v1203_v1 = vmul.f32 %v3484_v51, %v1195_v40  ;;  %v1204_v12 = vmul.f32 %v3489_v0, %v1198_v37 }
 0x1eb   : > { %v1191_v57 = vpop.permute.xlu1 %1190  ;;  %v1074_v42 = vadd.f32 %v1068_v2, %v1023_v24  ;;  %v1126_v55 = vadd.f32 %v1120_v11, %v1075_v23  ;;  %v1170_v61 = vmul.f32 %v1160_v58, %v1152_v10  ;;  %v4752_v43 = vmov 1   ;;  %v756_v2 = vpop.f32.mrf.mxu2 }
 0x1ec   : > { %v1196_v15 = vsel %vm1194_vm15, %v1185_v60, %v1191_v57  ;;  %v1199_v3 = vsel %vm1194_vm15, %v1191_v57, %v1185_v60  ;;  %v1244_v45 = vpop.permute.xlu2 %1243  ;;  %v1153_v60 = vmul.f32 %v3362_v6, %v1147_v39 }
 0x1ed   : > { %v1205_v25 = vmul.f32 %v3484_v51, %v1196_v15  ;;  %v1206_v46 = vmul.f32 %v3489_v0, %v1199_v3  ;;  %v1125_v35 = vadd.f32 %v1119_v28, %v1074_v42 }
 0x1ee   : > { %v1171_v41 = vmul.f32 %v1160_v58, %v1153_v60 }
 0x1ef   : > { %v1223_v16 = vmul.f32 %v3258_v7, %v1205_v25  ;;  %v1224_v9 = vmul.f32 %v3258_v7, %v1206_v46  ;;  %v1176_v48 = vadd.f32 %v1170_v61, %v1125_v35  ;;  %v707_v46 = vld [vmem:[%s4646_s6 + $0x10] sm:$0xff] }
 0x1f0   : > { %v1177_v63 = vadd.f32 %v1171_v41, %v1126_v55 }
 0x1f1   : > { %v1229_v7 = vadd.f32 %v1223_v16, %v1178_v36  ;;  %v1230_v49 = vadd.f32 %v1224_v9, %v1179_v17 }
 0x1f3   : > { %v3525_v62 = vadd.f32 %v1244_v45, %v1229_v7  ;;  %v3527_v56 = vadd.f32 %v1244_v45, %v1230_v49  ;;  %v1211_v8 = vpop.permute.xlu1 %1210 }
 0x1f4   : > { %v1221_v27 = vmul.f32 %v1211_v8, %v1203_v1  ;;  %v1222_v32 = vmul.f32 %v1211_v8, %v1204_v12  ;;  %v3568_v8 = vld [vmem:[%s4647_s7 + $0x10] sm:$0xff] }
 0x1f5   : > { %v1291_v13 = vmul.f32 %v3525_v62, %v3525_v62  ;;  %v1292_v4 = vmul.f32 %v3527_v56, %v3527_v56 }
 0x1f6   : > { %v1228_v57 = vadd.f32 %v1222_v32, %v1177_v63  ;;  %v1227_v26 = vadd.f32 %v1221_v27, %v1176_v48  ;;  %v4754_v63 = vmov 3  }
 0x1f7   : > { %v1293_v31 = vadd.f32 %v1292_v4, %v1291_v13 }
 0x1f9   : > { %1294 = vadd.xlane.f32.xlu2 %v1293_v31  ;;  %v4753_v31 = vmov 2  }
 0x1fc   : > { %v1239_v50 = vpop.permute.xlu1 %1238 }
 0x1fd   : > { %v3537_v15 = vadd.f32 %v1239_v50, %v1227_v26  ;;  %v3539_v3 = vadd.f32 %v1239_v50, %v1228_v57 }
 0x1ff   : > { %v1257_v18 = vmul.f32 %v3537_v15, %v3537_v15  ;;  %v1258_v22 = vmul.f32 %v3539_v3, %v3539_v3 }
 0x201   : > { %v1259_v25 = vadd.f32 %v1258_v22, %v1257_v18 }
 0x203   : > { %1260 = vadd.xlane.f32.xlu0 %v1259_v25 }
 0x211   : > { %720 = vperm.xlu2 %2798, %v707_v46  }
 0x219   : > { %2801 = vset.pattern.permute.xlu2 %v4752_v43 }
 0x26c   : > { %v1295_v33 = vpop.xlane.xlu2 %1294 }
 0x26d   : > { %2850 = vrsqrt.f32 %v1295_v33  ;;  %vm1303_vm0 = vcmp.eq.f32.partialorder %v1295_v33, inf  ;;  %v1306_v49 = vand.u32 2147483648, %v1295_v33  ;;  %vm1305_vm1 = vcmp.eq.f32.partialorder %v1295_v33, 0.0 }
 0x273   : > { %v2851_v16 = vpop.eup %2850 }
 0x274   : > { %v1297_v9 = vmul.f32 %v2851_v16, %v1295_v33  ;;  %v721_v36 = vpop.permute.xlu2 %720 }
 0x275   : > { %v3549_v17 = vadd.f32 %v756_v2, %v721_v36  ;;  %v3551_v53 = vadd.f32 %v782_v52, %v721_v36 }
 0x276   : > { %v1298_v24 = vmul.f32 %v2851_v16, %v1297_v9  ;;  %v1261_v28 = vpop.xlane.xlu0 %1260 }
 0x277   : > { %2852 = vrsqrt.f32 %v1261_v28  ;;  %798 = vrot.lane.b32.xlu1 %v3551_v53, %s2921_s22  ;;  %848 = vrot.lane.b32.xlu2 %v3549_v17, %s2923_s24  ;;  %vm1269_vm2 = vcmp.eq.f32.partialorder %v1261_v28, inf  ;;  %v1272_v35 = vand.u32 2147483648, %v1261_v28  ;;  %vm1271_vm3 = vcmp.eq.f32.partialorder %v1261_v28, 0.0 }
 0x278   : > { %v1299_v11 = vmul.f32 0.5, %v1298_v24  ;;  %792 = vrot.lane.b32.xlu0 %v3549_v17, %s2921_s22 }
 0x27a   : > { %v1300_v45 = vsub.f32 1.5, %v1299_v11 }
 0x27c   : > { %v1301_v38 = vmul.f32 %v2851_v16, %v1300_v45  ;;  %v4756_v45 = vmov 4  }
 0x27d   : > { %v2853_v59 = vpop.eup %2852 }
 0x27e   : > { %v1302_v39 = vmul.f32 %v1301_v38, %v1295_v33  ;;  %v1263_v7 = vmul.f32 %v2853_v59, %v1261_v28  ;;  %v4760_v38 = vmov 0  }
 0x27f   : > { %905 = vrot.lane.b32.xlu1 %v3551_v53, %s4706_s25  ;;  %899 = vrot.lane.b32.xlu2 %v3549_v17, %s4706_s25  ;;  %s4779_s25 = smov 1  }
 0x280   : > { %v1304_v42 = vsel %vm1303_vm0, %v1295_v33, %v1302_v39  ;;  %v1264_v23 = vmul.f32 %v2853_v59, %v1263_v7  ;;  %854 = vrot.lane.b32.xlu0 %v3551_v53, %s2923_s24 }
 0x281   : > { %v1307_v54 = vsel %vm1305_vm1, %v1306_v49, %v1304_v42  ;;  %v1366_v49 = vstv %s1365_s20 }
 0x282   : > { %v1265_v40 = vmul.f32 0.5, %v1264_v23  ;;  %v1308_v37 = vmax.f32 %v1307_v54, 1e-12 }
 0x284   : > { %v1266_v58 = vsub.f32 1.5, %v1265_v40  ;;  %2854 = vrcp.f32 %v1308_v37  ;;  %v1320_v41 = vand.u32 2147483648, %v1308_v37  ;;  %v1318_v32 = vand.u32 2147483647, %v1308_v37 }
 0x285   : > { %vm1314_vm5 = vweird.f32 %v1308_v37 }
 0x286   : > { %v1267_v10 = vmul.f32 %v2853_v59, %v1266_v58  ;;  %v1321_v57 = vor.u32 1.1754944e-38, %v1320_v41  ;;  %vm1319_vm0 = vcmp.eq.f32.partialorder %v1318_v32, 8.507059e+37  ;;  %v4761_v59 = vmov 8  }
 0x287   : > { %950 = vrot.lane.b32.xlu1 %v3549_v17, %s4704_s3  ;;  %880 = vperm.xlu2 %2801, %v3568_v8  }
 0x288   : > { %v1268_v60 = vmul.f32 %v1267_v10, %v1261_v28  ;;  %829 = vperm.xlu0 %2800, %v3568_v8  }
 0x28a   : > { %v2855_v55 = vpop.eup %2854  ;;  %v1270_v1 = vsel %vm1269_vm2, %v1261_v28, %v1268_v60 }
 0x28b   : > { %v1273_v12 = vsel %vm1271_vm3, %v1272_v35, %v1270_v1  ;;  %v1310_v13 = vmul.f32 %v2855_v55, %v1308_v37  ;;  %vm1315_vm4 = vweird.f32 %v2855_v55  ;;  %v1235_v1 = vld [vmem:[%s4648_s8 + $0x10] sm:$0xff] }
 0x28c   : > { %v1274_v4 = vmax.f32 %v1273_v12, 1e-12  ;;  %vm1316_vm6 = vmor %vm1314_vm5, %vm1315_vm4  ;;  %vm1368_vm5 = vcmask 27648  }
 0x28d   : > { %v1311_v61 = vsub.f32 1.0, %v1310_v13  ;;  %v1581_v13 = vld [vmem:[%s4650_s10] sm:$0xff] }
 0x28e   : > { %2856 = vrcp.f32 %v1274_v4  ;;  %v1286_v2 = vand.u32 2147483648, %v1274_v4  ;;  %v1284_v16 = vand.u32 2147483647, %v1274_v4  ;;  %vm1280_vm2 = vweird.f32 %v1274_v4 }
 0x28f   : > { %956 = vrot.lane.b32.xlu2 %v3551_v53, %s4704_s3  ;;  %v1312_v27 = vmul.f32 %v2855_v55, %v1311_v61  ;;  %v1688_v61 = vld [vmem:[%s4651_s11] sm:$0xff]  ;;  %s4780_s3 = smov 127  }
 0x290   : > { %2802 = vset.pattern.permute.xlu0 %v4753_v31  ;;  %2803 = vset.pattern.permute.xlu2 %v4754_v63  ;;  %vm1285_vm4 = vcmp.eq.f32.partialorder %v1284_v16, 8.507059e+37 }
 0x291   : > { %931 = vperm.xlu0 %2802, %v3568_v8   ;;  %v1313_v48 = vadd.f32 %v2855_v55, %v1312_v27  ;;  %v1696_v27 = vld [vmem:[%s4652_s12] sm:$0xff] }
 0x293   : > { %v1317_v26 = vsel %vm1316_vm6, %v2855_v55, %v1313_v48 }
 0x294   : > { %v2857_v50 = vpop.eup %2856  ;;  %v1322_v18 = vsel %vm1319_vm0, %v1321_v57, %v1317_v26  ;;  %v1708_v57 = vld [vmem:[%s4654_s14] sm:$0xff] }
 0x295   : > { %v3580_v22 = vmul.f32 %v1322_v18, %v3525_v62  ;;  %v3583_v25 = vmul.f32 %v1322_v18, %v3527_v56  ;;  %v1276_v46 = vmul.f32 %v2857_v50, %v1274_v4  ;;  %vm1281_vm1 = vweird.f32 %v2857_v50 }
 0x296   : > { %v4755_v62 = vmov 5   ;;  %vm1282_vm3 = vmor %vm1280_vm2, %vm1281_vm1  ;;  %v1287_v56 = vor.u32 1.1754944e-38, %v1286_v2 }
 0x297   : > { %1340 = vmatpush.xpose.msrb.mxu2 %v3580_v22  ;;  %1360 = vmatpush.xpose.msrb.mxu3 %v3583_v25  ;;  %v1277_v33 = vsub.f32 1.0, %v1276_v46 }
 0x298   : > { %982 = vperm.xlu2 %2803, %v3568_v8  }
 0x299   : > { %1039 = vrot.lane.b32.xlu0 %v3551_v53, %s4702_s1  ;;  %v1278_v52 = vmul.f32 %v2857_v50, %v1277_v33  ;;  %v1711_v33 = vld [vmem:[%s4654_s14 + $0x18] sm:$0xff] }
 0x29a   : > { %2805 = vset.pattern.permute.xlu0 %v4755_v62 }
 0x29b   : > { %v1279_v9 = vadd.f32 %v2857_v50, %v1278_v52  ;;  %v3653_v52 = vld [vmem:[%s4655_s15] sm:$0xff] }
 0x29d   : > { %v1283_v36 = vsel %vm1282_vm3, %v2857_v50, %v1279_v9  ;;  %v1709_v50 = vld [vmem:[%s4654_s14 + $0x8] sm:$0xff]  ;;  %vm1397_vm3 = vcmask 1043456  }
 0x29e   : > { %v1288_v24 = vsel %vm1285_vm4, %v1287_v56, %v1283_v36  ;;  %v3659_v56 = vld [vmem:[%s4655_s15 + $0x18] sm:$0xff]  ;;  %vm1393_vm4 = vcmask 31744  }
 0x29f   : > { %v3592_v28 = vmul.f32 %v1288_v24, %v3537_v15  ;;  %v3595_v11 = vmul.f32 %v1288_v24, %v3539_v3  ;;  %v4757_v15 = vmov 6   ;;  %v4758_v3 = vmov 7  }
 0x2a0   : > { %1033 = vrot.lane.b32.xlu2 %v3549_v17, %s4702_s1 }
 0x2a1   : > { %1084 = vrot.lane.b32.xlu0 %v3549_v17, %s4700_s27  ;;  %1341 = vmatmul.f32.vlgmr.msrb.gmra.mxu2 %v3592_v28 }
 0x2a2   : > { %1361 = vmatmul.f32.vlgmr.msrb.gmra.mxu3 %v3595_v11  ;;  %2804 = vset.pattern.permute.xlu2 %v4756_v45 }
 0x2a8   : > { %1014 = vperm.xlu2 %2804, %v3568_v8  }
 0x2a9   : > { %1065 = vperm.xlu0 %2805, %v3568_v8  }
 0x2b0   : > { %1090 = vrot.lane.b32.xlu2 %v3551_v53, %s4700_s27  ;;  %s4778_s27 = smov 15  }
 0x2b1   : > { %1186 = vrot.lane.b32.xlu0 %v3549_v17, %s4698_s26  ;;  %2806 = vset.pattern.permute.xlu2 %v4757_v15 }
 0x2b2   : > { %2807 = vset.pattern.permute.xlu0 %v4758_v3 }
 0x2b8   : > { %1135 = vrot.lane.b32.xlu2 %v3549_v17, %s4759_s28 }
 0x2b9   : > { %1167 = vperm.xlu0 %2807, %v3568_v8  }
 0x2c0   : > { %1116 = vperm.xlu2 %2806, %v3568_v8  }
 0x2c1   : > { %2810 = vset.pattern.permute.xlu0 %v4760_v38 }
 0x2c8   : > { %1192 = vrot.lane.b32.xlu2 %v3551_v53, %s4698_s26  ;;  %s2717_s26 = sld [smem:[#allocation2 + $0x1]] }
 0x2c9   : > { %2808 = vset.pattern.permute.xlu2 %v4761_v59 }
 0x2d0   : > { %1218 = vperm.xlu2 %2808, %v3568_v8  }
 0x2d1   : > { %v849_v12 = vpop.permute.xlu2 %848 }
 0x2d8   : > { %2809 = vset.pattern.permute.xlu2 %v4760_v38 }
 0x2d9   : > { %v900_v4 = vpop.permute.xlu2 %899 }
 0x2e1   : > { %v881_v41 = vpop.permute.xlu2 %880 }
 0x2e9   : > { %v799_v40 = vpop.permute.xlu1 %798  ;;  %v957_v48 = vpop.permute.xlu2 %956 }
 0x2ea   : > { %v793_v32 = vpop.permute.xlu0 %792 }
 0x2f1   : > { %v906_v37 = vpop.permute.xlu1 %905 }
 0x2f2   : > { %v855_v26 = vpop.permute.xlu0 %854  ;;  %v983_v18 = vpop.permute.xlu2 %982 }
 0x2f9   : > { %v951_v58 = vpop.permute.xlu1 %950 }
 0x2fa   : > { %v830_v46 = vpop.permute.xlu0 %829  ;;  %v1034_v2 = vpop.permute.xlu2 %1033 }
 0x302   : > { %v1015_v9 = vpop.permute.xlu2 %1014 }
 0x303   : > { %v932_v16 = vpop.permute.xlu0 %931 }
 0x30a   : > { %v1091_v24 = vpop.permute.xlu2 %1090 }
 0x30b   : > { %v1040_v36 = vpop.permute.xlu0 %1039 }
 0x324   : > { %v1342_v39 = vpop.f32.mrf.mxu2 }
 0x325   : > { %v1362_v7 = vpop.f32.mrf.mxu3 }
 0x326   : > { %v1363_v42 = vadd.f32 %v1362_v7, %v1342_v39  ;;  %v1085_v39 = vpop.permute.xlu0 %1084  ;;  %v1136_v7 = vpop.permute.xlu2 %1135 }
 0x328   : > { %v1367_v23 = vmul.f32 %v1366_v49, %v1363_v42  ;;  %v805_v49 = vsel %vm802_vm8, %v793_v32, %v799_v40  ;;  %v808_v42 = vsel %vm802_vm8, %v799_v40, %v793_v32  ;;  %v4765_v32 = vld [vmem:[#allocation12_spill] sm:$0xff] }
 0x32a   : > { %v1369_v54 = vsel %vm1368_vm5, %v1367_v23, -inf }
 0x32b   : > { %1370 = vmax.xlane.f32.xlu1 %v1369_v54  ;;  %v862_v54 = vsel %vm856_vm9, %v855_v26, %v849_v12 }
 0x344   : > { %1141 = vrot.lane.b32.xlu1 %v3551_v53, %s4759_s28 }
 0x39e   : > { %v1371_v10 = vpop.xlane.xlu1 %1370 }
 0x39f   : > { %v1372_v8 = vsub.f32 %v1367_v23, %v1371_v10  ;;  %v859_v23 = vsel %vm856_vm9, %v849_v12, %v855_v26  ;;  %v964_v12 = vsel %vm958_vm11, %v957_v48, %v951_v58 }
 0x3a1   : > { %v1373_v60 = vmul.f32 1.442695, %v1372_v8  ;;  %v913_v8 = vsel %vm907_vm10, %v906_v37, %v900_v4 }
 0x3a3   : > { %2858 = vpow2.f32 %v1373_v60  ;;  %v910_v60 = vsel %vm907_vm10, %v900_v4, %v906_v37  ;;  %v961_v37 = vsel %vm958_vm11, %v951_v58, %v957_v48  ;;  %v1117_v4 = vpop.permute.xlu2 %1116  ;;  %v1044_v58 = vsel %vm1041_vm12, %v1034_v2, %v1040_v36 }
 0x3a4   : > { %v921_v38 = vmul.f32 %v3335_v19, %v910_v60 }
 0x3a9   : > { %v3625_v35 = vpop.eup %2858 }
 0x3aa   : > { %v1375_v55 = vsel %vm1368_vm5, %v3625_v35, 0.0 }
 0x3ab   : > { %1376 = vadd.xlane.f32.xlu1 %v1375_v55  ;;  %v1066_v55 = vpop.permute.xlu0 %1065 }
 0x3b3   : > { %v1187_v48 = vpop.permute.xlu0 %1186 }
 0x3b6   : > { %v1142_v10 = vpop.permute.xlu1 %1141 }
 0x3c4   : > { %1248 = vperm.xlu1 %2799, %v1235_v1   ;;  %v4762_v1 = vld [vmem:[#allocation10_spill] sm:$0xff] }
 0x3cc   : > { %1584 = vperm.xlu1 %2799, %v1581_v13   ;;  %v815_v13 = vmul.f32 %v4762_v1, %v808_v42 }
 0x3ce   : > { %v836_v26 = vmul.f32 %v830_v46, %v815_v13  ;;  %v4766_v13 = vld [vmem:[#allocation9_spill] sm:$0xff] }
 0x3d4   : > { %1691 = vperm.xlu1 %2799, %v1688_v61   ;;  %v4763_v61 = vld [vmem:[#allocation13_spill] sm:$0xff] }
 0x3dc   : > { %1699 = vperm.xlu1 %2799, %v1696_v27   ;;  %v816_v27 = vmul.f32 %v4763_v61, %v805_v49  ;;  %v939_v61 = vmul.f32 %v932_v16, %v921_v38 }
 0x3de   : > { %v837_v3 = vmul.f32 %v830_v46, %v816_v27  ;;  %v1004_v27 = vmul.f32 %v4766_v13, %v3551_v53 }
 0x3e4   : > { %1714 = vperm.xlu1 %2799, %v1708_v57   ;;  %v4764_v57 = vld [vmem:[#allocation11_spill] sm:$0xff] }
 0x3e5   : > { %v869_v40 = vmul.f32 %v4764_v57, %v862_v54  ;;  %v971_v54 = vmul.f32 %v3356_v5, %v964_v12  ;;  %v1022_v12 = vmul.f32 %v1015_v9, %v1004_v27 }
 0x3e7   : > { %v887_v42 = vmul.f32 %v881_v41, %v869_v40  ;;  %v989_v38 = vmul.f32 %v983_v18, %v971_v54  ;;  %v4767_v40 = vld [vmem:[#allocation8_spill] sm:$0xff] }
 0x3ec   : > { %1719 = vperm.xlu1 %2799, %v1709_v50   ;;  %v870_v50 = vmul.f32 %v4765_v32, %v859_v23 }
 0x3ee   : > { %v888_v1 = vmul.f32 %v881_v41, %v870_v50  ;;  %v1047_v41 = vsel %vm1041_vm12, %v1040_v36, %v1034_v2  ;;  %v1003_v50 = vmul.f32 %v4767_v40, %v3549_v17  ;;  %v1146_v2 = vsel %vm1143_vm13, %v1136_v7, %v1142_v10 }
 0x3f0   : > { %v894_v32 = vadd.f32 %v888_v1, %v837_v3  ;;  %v1021_v53 = vmul.f32 %v1015_v9, %v1003_v50 }
 0x3f2   : > { %v945_v60 = vadd.f32 %v939_v61, %v894_v32  ;;  %v1055_v61 = vmul.f32 %v3374_v21, %v1047_v41  ;;  %v1193_v32 = vpop.permute.xlu2 %1192 }
 0x3f4   : > { %1729 = vperm.xlu1 %2799, %v1711_v33   ;;  %v920_v33 = vmul.f32 %v3332_v20, %v913_v8  ;;  %v972_v8 = vmul.f32 %v3359_v47, %v961_v37  ;;  %v893_v20 = vadd.f32 %v887_v42, %v836_v26  ;;  %v1073_v17 = vmul.f32 %v1066_v55, %v1055_v61 }
 0x3f5   : > { %v1095_v37 = vsel %vm1092_vm14, %v1085_v39, %v1091_v24  ;;  %v1098_v42 = vsel %vm1092_vm14, %v1091_v24, %v1085_v39  ;;  %v1197_v24 = vsel %vm1194_vm15, %v1187_v48, %v1193_v32  ;;  %v1200_v39 = vsel %vm1194_vm15, %v1193_v32, %v1187_v48 }
 0x3f6   : > { %v938_v49 = vmul.f32 %v932_v16, %v920_v33  ;;  %v990_v16 = vmul.f32 %v983_v18, %v972_v8  ;;  %v1149_v18 = vsel %vm1143_vm13, %v1142_v10, %v1136_v7  ;;  %v1168_v7 = vpop.permute.xlu0 %1167  ;;  %v1106_v9 = vmul.f32 %v3415_v44, %v1098_v42 }
 0x3f8   : > { %v944_v46 = vadd.f32 %v938_v49, %v893_v20  ;;  %v996_v33 = vadd.f32 %v990_v16, %v945_v60  ;;  %v1054_v20 = vmul.f32 %v3371_v30, %v1044_v58  ;;  %v1157_v60 = vmul.f32 %v3362_v6, %v1149_v18 }
 0x3f9   : > { %v1105_v58 = vmul.f32 %v3412_v29, %v1095_v37  ;;  %v1124_v16 = vmul.f32 %v1117_v4, %v1106_v9  ;;  %v1497_v9 = vstv %s2717_s26  ;;  %s4828_s26 = sshll.u32 %s4832_s30, 4 }
 0x3fa   : > { %v995_v1 = vadd.f32 %v989_v38, %v944_v46  ;;  %v1072_v26 = vmul.f32 %v1066_v55, %v1054_v20  ;;  %v1028_v8 = vadd.f32 %v1022_v12, %v996_v33  ;;  %v1156_v46 = vmul.f32 %v3338_v34, %v1146_v2  ;;  %v1219_v2 = vpop.permute.xlu2 %1218  ;;  %s616_s1 = scalar_lea.vmem %s4659_s19, %s4828_s26 }
 0x3fb   : > { %v1123_v38 = vmul.f32 %v1117_v4, %v1105_v58  ;;  %v1175_v50 = vmul.f32 %v1168_v7, %v1157_v60  ;;  %v1207_v4 = vmul.f32 %v3484_v51, %v1197_v24 }
 0x3fc   : > { %1840 = vperm.xlu1 %2799, %v3653_v52   ;;  %v1027_v54 = vadd.f32 %v1021_v53, %v995_v1  ;;  %v1079_v41 = vadd.f32 %v1073_v17, %v1028_v8  ;;  %v1174_v27 = vmul.f32 %v1168_v7, %v1156_v46 }
 0x3fd   : > { %v1225_v48 = vmul.f32 %v1219_v2, %v1207_v4 }
 0x3fe   : > { %v1078_v55 = vadd.f32 %v1072_v26, %v1027_v54  ;;  %v1130_v20 = vadd.f32 %v1124_v16, %v1079_v41 }
 0x400   : > { %v1129_v33 = vadd.f32 %v1123_v38, %v1078_v55  ;;  %v1181_v12 = vadd.f32 %v1175_v50, %v1130_v20 }
 0x402   : > { %v1180_v53 = vadd.f32 %v1174_v27, %v1129_v33 }
 0x404   : > { %1855 = vperm.xlu1 %2799, %v3659_v56   ;;  %v1231_v42 = vadd.f32 %v1225_v48, %v1180_v53 }
 0x40c   : > { %2813 = vset.pattern.permute.xlu1 %v4752_v43 }
 0x41e   : > { %v3686_v23 = vpop.xlane.xlu1 %1376 }
 0x41f   : > { %2860 = vrcp.f32 %v3686_v23  ;;  %v1389_v61 = vand.u32 2147483648, %v3686_v23  ;;  %vm1383_vm0 = vweird.f32 %v3686_v23  ;;  %v1387_v18 = vand.u32 2147483647, %v3686_v23 }
 0x421   : > { %v1390_v17 = vor.u32 1.1754944e-38, %v1389_v61  ;;  %vm1388_vm2 = vcmp.eq.f32.partialorder %v1387_v18, 8.507059e+37 }
 0x425   : > { %v2861_v3 = vpop.eup %2860 }
 0x426   : > { %v1379_v36 = vmul.f32 %v2861_v3, %v3686_v23  ;;  %vm1384_vm6 = vweird.f32 %v2861_v3  ;;  %v1453_v23 = vrot.slane %v3583_v25, 4  ;;  %v1447_v25 = vrot.slane %v3595_v11, 4 }
 0x427   : > { %vm1385_vm1 = vmor %vm1383_vm0, %vm1384_vm6 }
 0x428   : > { %v1380_v49 = vsub.f32 1.0, %v1379_v36  ;;  %v1208_v36 = vmul.f32 %v3489_v0, %v1200_v39  ;;  %v1452_v0 = vrot.slane %v3580_v22, 4  ;;  %v1446_v22 = vrot.slane %v3592_v28, 4 }
 0x42a   : > { %v1381_v10 = vmul.f32 %v2861_v3, %v1380_v49  ;;  %v1226_v32 = vmul.f32 %v1219_v2, %v1208_v36 }
 0x42c   : > { %v1382_v1 = vadd.f32 %v2861_v3, %v1381_v10  ;;  %v1232_v49 = vadd.f32 %v1226_v32, %v1181_v12 }
 0x42e   : > { %v1386_v26 = vsel %vm1385_vm1, %v2861_v3, %v1382_v1 }
 0x42f   : > { %v1391_v37 = vsel %vm1388_vm2, %v1390_v17, %v1386_v26 }
 0x430   : > { %v1392_v51 = vmul.f32 %v3625_v35, %v1391_v37  ;;  %v1580_v37 = vld [vmem:[%s4649_s9] sm:$0xff] }
 0x436   : > { %v1249_v54 = vpop.permute.xlu1 %1248 }
 0x437   : > { %v1255_v8 = vadd.f32 %v1249_v54, %v1231_v42  ;;  %v1256_v46 = vadd.f32 %v1249_v54, %v1232_v49  ;;  %v3747_v54 = vld [vmem:[%s4655_s15 + $0x10] sm:$0xff] }
 0x438   : > { %1915 = vperm.xlu1 %2813, %v3747_v54  }
 0x439   : > { %v1523_v60 = vrot.slane %v1255_v8, 4  ;;  %v1524_v3 = vrot.slane %v1256_v46, 4  ;;  %2713 = vmatpush.msk.msra.mxu2 %vm1397_vm3, %v1255_v8  ;;  %2715 = vmatpush.msk.msra.mxu3 %vm1397_vm3, %v1256_v46  ;;  %v3755_v8 = vld [vmem:[%s4655_s15 + $0x8] sm:$0xff] }
 0x43a   : > { %2714 = vmatmul.msk.f32.vlgmr.msra.gmra.mxu2 %vm1393_vm4, %v1392_v51  ;;  %2716 = vmatmul.msk.f32.vlgmr.msra.gmra.mxu3 %vm1393_vm4, %v1392_v51  ;;  %v1710_v51 = vld [vmem:[%s4654_s14 + $0x10] sm:$0xff] }
 0x43b   : > { %1471 = vmatpush.xpose.msrb.mxu2 %v1452_v0  ;;  %1491 = vmatpush.xpose.msrb.mxu3 %v1453_v23 }
 0x43c   : > { %2718 = vmatpush.msk.msrb.mxu0 %vm1397_vm3, %v1523_v60  ;;  %2720 = vmatpush.msk.msrb.mxu1 %vm1397_vm3, %v1524_v3 }
 0x43e   : > { %v1585_v46 = vpop.permute.xlu1 %1584 }
 0x440   : > { %2815 = vset.pattern.permute.xlu1 %v4753_v31 }
 0x441   : > { %1975 = vperm.xlu1 %2815, %v3755_v8  }
 0x442   : > { %1472 = vmatmul.f32.vlgmr.msrb.gmra.mxu2 %v1446_v22  ;;  %1492 = vmatmul.f32.vlgmr.msrb.gmra.mxu3 %v1447_v25  ;;  %v2878_v22 = vld [vmem:[%s3068_s23] sm:$0xff] }
 0x449   : > { %1983 = vperm.xlu1 %2815, %v3659_v56  }
 0x451   : > { %2818 = vset.pattern.permute.xlu1 %v4754_v63 }
 0x452   : > { %2035 = vperm.xlu1 %2818, %v3653_v52  }
 0x45a   : > { %2820 = vset.pattern.permute.xlu1 %v4756_v45 }
 0x45b   : > { %2075 = vperm.xlu1 %2820, %v3653_v52  }
 0x463   : > { %2822 = vset.pattern.permute.xlu1 %v4755_v62 }
 0x464   : > { %2139 = vperm.xlu1 %2822, %v3653_v52  }
 0x46c   : > { %2824 = vset.pattern.permute.xlu1 %v4757_v15 }
 0x46d   : > { %2203 = vperm.xlu1 %2824, %v3653_v52  }
 0x475   : > { %2826 = vset.pattern.permute.xlu1 %v4761_v59 }
 0x476   : > { %2331 = vperm.xlu1 %2826, %v3653_v52  }
 0x4bd   : > { %v1421_v35 = vpop.f32.mrf.mxu2  ;;  %v1441_v7 = vpop.f32.mrf.mxu3 }
 0x4c5   : > { %v1473_v10 = vpop.f32.mrf.mxu2  ;;  %v1493_v58 = vpop.f32.mrf.mxu3 }
 0x4c6   : > { %v1494_v55 = vadd.f32 %v1493_v58, %v1473_v10 }
 0x4c8   : > { %v1498_v41 = vmul.f32 %v1497_v9, %v1494_v55 }
 0x4ca   : > { %v1499_v38 = vsel %vm1368_vm5, %v1498_v41, -inf }
 0x4cb   : > { %1500 = vmax.xlane.f32.xlu2 %v1499_v38 }
 0x4e3   : > { %1724 = vperm.xlu2 %2809, %v1710_v51  }
 0x4eb   : > { %1845 = vperm.xlu2 %2809, %v3755_v8  }
 0x4f3   : > { %2811 = vset.pattern.permute.xlu2 %v4752_v43 }
 0x4f4   : > { %1907 = vperm.xlu2 %2811, %v3653_v52  }
 0x4fc   : > { %1919 = vperm.xlu2 %2811, %v3659_v56  }
 0x504   : > { %2816 = vset.pattern.permute.xlu2 %v4753_v31 }
 0x505   : > { %1979 = vperm.xlu2 %2816, %v3747_v54  }
 0x50d   : > { %2819 = vset.pattern.permute.xlu2 %v4756_v45 }
 0x50e   : > { %2079 = vperm.xlu2 %2819, %v3755_v8  }
 0x516   : > { %2821 = vset.pattern.permute.xlu2 %v4755_v62 }
 0x517   : > { %2143 = vperm.xlu2 %2821, %v3755_v8  }
 0x51f   : > { %2823 = vset.pattern.permute.xlu2 %v4757_v15 }
 0x520   : > { %2207 = vperm.xlu2 %2823, %v3755_v8  }
 0x53e   : > { %v1501_v16 = vpop.xlane.xlu2 %1500 }
 0x53f   : > { %v1502_v27 = vsub.f32 %v1498_v41, %v1501_v16 }
 0x541   : > { %v1503_v50 = vmul.f32 1.442695, %v1502_v27 }
 0x543   : > { %2862 = vpow2.f32 %v1503_v50 }
 0x549   : > { %v2863_v28 = vpop.eup %2862 }
 0x54a   : > { %v1505_v11 = vsel %vm1368_vm5, %v2863_v28, 0.0 }
 0x54b   : > { %1506 = vadd.xlane.f32.xlu0 %v1505_v11 }
 0x55f   : > { %1850 = vperm.xlu0 %2810, %v3747_v54  }
 0x567   : > { %2812 = vset.pattern.permute.xlu0 %v4752_v43 }
 0x568   : > { %1911 = vperm.xlu0 %2812, %v3755_v8  }
 0x570   : > { %2814 = vset.pattern.permute.xlu0 %v4753_v31  ;;  %v2362_v31 = vld [vmem:[%s4656_s16] sm:$0xff] }
 0x571   : > { %1971 = vperm.xlu0 %2814, %v3653_v52  }
 0x579   : > { %2817 = vset.pattern.permute.xlu0 %v4754_v63 }
 0x57a   : > { %2039 = vperm.xlu0 %2817, %v3755_v8  }
 0x582   : > { %2047 = vperm.xlu0 %2817, %v3659_v56  }
 0x58a   : > { %2829 = vset.pattern.permute.xlu0 %v4761_v59 }
 0x58b   : > { %2335 = vperm.xlu0 %2829, %v3755_v8  }
 0x5be   : > { %v1507_v24 = vpop.xlane.xlu0 %1506 }
 0x5bf   : > { %2864 = vrcp.f32 %v1507_v24  ;;  %v1519_v20 = vand.u32 2147483648, %v1507_v24  ;;  %v1517_v2 = vand.u32 2147483647, %v1507_v24  ;;  %vm1513_vm0 = vweird.f32 %v1507_v24 }
 0x5c1   : > { %v1520_v4 = vor.u32 1.1754944e-38, %v1519_v20  ;;  %vm1518_vm2 = vcmp.eq.f32.partialorder %v1517_v2, 8.507059e+37 }
 0x5c5   : > { %v2865_v39 = vpop.eup %2864 }
 0x5c6   : > { %v1509_v1 = vmul.f32 %v2865_v39, %v1507_v24  ;;  %vm1514_vm6 = vweird.f32 %v2865_v39 }
 0x5c7   : > { %vm1515_vm1 = vmor %vm1513_vm0, %vm1514_vm6 }
 0x5c8   : > { %v1510_v33 = vsub.f32 1.0, %v1509_v1 }
 0x5ca   : > { %v1511_v61 = vmul.f32 %v2865_v39, %v1510_v33 }
 0x5cc   : > { %v1512_v18 = vadd.f32 %v2865_v39, %v1511_v61 }
 0x5ce   : > { %v1516_v36 = vsel %vm1515_vm1, %v2865_v39, %v1512_v18  ;;  %v4770_v39 = vld [vmem:[#allocation5_spill] sm:$0xff] }
 0x5cf   : > { %v1521_v53 = vsel %vm1518_vm2, %v1520_v4, %v1516_v36 }
 0x5d0   : > { %v1522_v12 = vmul.f32 %v2863_v28, %v1521_v53 }
 0x5d2   : > { %2719 = vmatmul.msk.f32.vlgmr.msrb.gmra.mxu0 %vm1393_vm4, %v1522_v12  ;;  %2721 = vmatmul.msk.f32.vlgmr.msrb.gmra.mxu1 %vm1393_vm4, %v1522_v12 }
 0x64f   : > { %v1549_v26 = vpop.f32.mrf.mxu0  ;;  %v1569_v48 = vpop.f32.mrf.mxu1 }
 0x650   : > { %v1574_v32 = vrot.slane %v1549_v26, 4  ;;  %v1575_v17 = vrot.slane %v1569_v48, 4 }
 0x652   : > { %v1578_v42 = vsel %vm1397_vm3, %v1421_v35, %v1574_v32  ;;  %v1579_v49 = vsel %vm1397_vm3, %v1441_v7, %v1575_v17  ;;  %v2879_v35 = vld [vmem:[%s3068_s23 + $0x8] sm:$0xff] }
 0x653   : > { %1605 = vmatpush.msra.mxu2 %v1578_v42  ;;  %1625 = vmatpush.msra.mxu3 %v1579_v49 }
 0x654   : > { %2722 = vmatmul.msk.f32.vlgmr.msra.gmra.mxu2 %vm723_vm7, %v1580_v37  ;;  %2723 = vmatmul.msk.f32.vlgmr.msra.gmra.mxu3 %vm723_vm7, %v1580_v37 }
 0x6d7   : > { %v1607_v0 = vpop.f32.mrf.mxu2  ;;  %v1627_v23 = vpop.f32.mrf.mxu3 }
 0x6d8   : > { %v1608_v60 = vadd.f32 %v1607_v0, %v1585_v46  ;;  %v1628_v3 = vadd.f32 %v1627_v23, %v1585_v46 }
 0x6da   : > { %v3771_v25 = vadd.f32 %v2878_v22, %v1608_v60  ;;  %v3774_v7 = vadd.f32 %v2879_v35, %v1628_v3  ;;  %v4771_v3 = vmov 0  }
 0x6db   : > { %2828 = vset.pattern.permute.xlu1 %v4771_v3 }
 0x6dc   : > { %4768 = vst [vmem:[#allocation6_spill] sm:$0xff] %v3771_v25  ;;  %v1632_v10 = vrot.slane %v3771_v25, 4  ;;  %v1638_v58 = vrot.slane %v3774_v7, 4  ;;  %2368 = vperm.xlu1 %2828, %v2362_v31  }
 0x6dd   : > { %4769 = vst [vmem:[#allocation7_spill] sm:$0xff] %v3774_v7 }
 0x6de   : > { %v1633_v9 = vadd.f32 %v1632_v10, %v3771_v25  ;;  %v1639_v55 = vadd.f32 %v1638_v58, %v3774_v7 }
 0x6e0   : > { %v1634_v41 = vrot.slane %v1633_v9, 2  ;;  %v1640_v38 = vrot.slane %v1639_v55, 2 }
 0x6e2   : > { %v1635_v16 = vadd.f32 %v1634_v41, %v1633_v9  ;;  %v1641_v27 = vadd.f32 %v1640_v38, %v1639_v55  ;;  %v1692_v55 = vpop.permute.xlu1 %1691 }
 0x6e4   : > { %v1636_v50 = vrot.slane %v1635_v16, 1  ;;  %v1642_v28 = vrot.slane %v1641_v27, 1  ;;  %2830 = vset.pattern.permute.xlu1 %v4754_v63  ;;  %v1704_v63 = vld [vmem:[%s4653_s13] sm:$0xff] }
 0x6e5   : > { %2043 = vperm.xlu1 %2830, %v3747_v54  }
 0x6e6   : > { %v1637_v11 = vadd.f32 %v1636_v50, %v1635_v16  ;;  %v1643_v24 = vadd.f32 %v1642_v28, %v1641_v27 }
 0x6e8   : > { %v1644_v1 = vmul.f32 %v1637_v11, %v4770_v39  ;;  %v1645_v33 = vmul.f32 %v1643_v24, %v4770_v39 }
 0x6ea   : > { %v1646_v20 = vsub.f32 %v3771_v25, %v1644_v1  ;;  %v1647_v61 = vsub.f32 %v3774_v7, %v1645_v33 }
 0x6ec   : > { %v1648_v2 = vmul.f32 %v1646_v20, %v1646_v20  ;;  %v1649_v43 = vmul.f32 %v1647_v61, %v1647_v61 }
 0x6ed   : > { %2832 = vset.pattern.permute.xlu1 %v4756_v45 }
 0x6ee   : > { %v1650_v18 = vrot.slane %v1648_v2, 4  ;;  %v1656_v4 = vrot.slane %v1649_v43, 4  ;;  %2083 = vperm.xlu1 %2832, %v3747_v54  }
 0x6f0   : > { %v1651_v36 = vadd.f32 %v1650_v18, %v1648_v2  ;;  %v1657_v53 = vadd.f32 %v1656_v4, %v1649_v43  ;;  %v1700_v2 = vpop.permute.xlu1 %1699 }
 0x6f2   : > { %v1652_v12 = vrot.slane %v1651_v36, 2  ;;  %v1658_v26 = vrot.slane %v1657_v53, 2 }
 0x6f4   : > { %v1653_v48 = vadd.f32 %v1652_v12, %v1651_v36  ;;  %v1659_v32 = vadd.f32 %v1658_v26, %v1657_v53  ;;  %v1706_v36 = vld [vmem:[%s4653_s13 + $0x10] sm:$0xff]  ;;  %v1707_v53 = vld [vmem:[%s4653_s13 + $0x18] sm:$0xff]  ;;  %v3857_v26 = vpop.permute.xlu2 %1724 }
 0x6f6   : > { %v1654_v17 = vrot.slane %v1653_v48, 1  ;;  %v1660_v37 = vrot.slane %v1659_v32, 1  ;;  %2834 = vset.pattern.permute.xlu1 %v4755_v62 }
 0x6f7   : > { %2147 = vperm.xlu1 %2834, %v3747_v54  }
 0x6f8   : > { %v1655_v42 = vadd.f32 %v1654_v17, %v1653_v48  ;;  %v1661_v49 = vadd.f32 %v1660_v37, %v1659_v32 }
 0x6fa   : > { %v1662_v46 = vmul.f32 %v1655_v42, %v4770_v39  ;;  %v1663_v51 = vmul.f32 %v1661_v49, %v4770_v39 }
 0x6fc   : > { %v1664_v0 = vadd.f32 1e-05, %v1662_v46  ;;  %v1665_v23 = vadd.f32 1e-05, %v1663_v51 }
 0x6fe   : > { %2866 = vrsqrt.f32 %v1664_v0  ;;  %vm1672_vm4 = vweird.f32 %v1664_v0  ;;  %vm1682_vm0 = vweird.f32 %v1665_v23 }
 0x6ff   : > { %2868 = vrsqrt.f32 %v1665_v23  ;;  %2836 = vset.pattern.permute.xlu1 %v4757_v15 }
 0x700   : > { %2211 = vperm.xlu1 %2836, %v3747_v54  }
 0x704   : > { %v2867_v60 = vpop.eup %2866 }
 0x705   : > { %v2869_v22 = vpop.eup %2868  ;;  %v1667_v35 = vmul.f32 %v2867_v60, %v1664_v0  ;;  %vm1673_vm5 = vweird.f32 %v2867_v60 }
 0x706   : > { %v1677_v10 = vmul.f32 %v2869_v22, %v1665_v23  ;;  %vm1683_vm3 = vweird.f32 %v2869_v22  ;;  %vm1674_vm6 = vmor %vm1672_vm4, %vm1673_vm5 }
 0x707   : > { %v1668_v58 = vmul.f32 %v2867_v60, %v1667_v35  ;;  %vm1684_vm1 = vmor %vm1682_vm0, %vm1683_vm3 }
 0x708   : > { %v1678_v9 = vmul.f32 %v2869_v22, %v1677_v10  ;;  %2838 = vset.pattern.permute.xlu1 %v4761_v59 }
 0x709   : > { %v1669_v41 = vmul.f32 0.5, %v1668_v58 }
 0x70a   : > { %v1679_v38 = vmul.f32 0.5, %v1678_v9 }
 0x70b   : > { %v1670_v16 = vsub.f32 1.5, %v1669_v41 }
 0x70c   : > { %v1680_v27 = vsub.f32 1.5, %v1679_v38 }
 0x70d   : > { %v1671_v50 = vmul.f32 %v2867_v60, %v1670_v16 }
 0x70e   : > { %v1681_v28 = vmul.f32 %v2869_v22, %v1680_v27 }
 0x70f   : > { %v1675_v11 = vsel %vm1674_vm6, %v2867_v60, %v1671_v50 }
 0x710   : > { %v1686_v24 = vmul.f32 %v1675_v11, %v1646_v20  ;;  %v1685_v39 = vsel %vm1684_vm1, %v2869_v22, %v1681_v28  ;;  %v1705_v20 = vld [vmem:[%s4653_s13 + $0x8] sm:$0xff] }
 0x711   : > { %v1687_v1 = vmul.f32 %v1685_v39, %v1647_v61  ;;  %v4772_v61 = vmov 7  }
 0x712   : > { %v1694_v33 = vmul.f32 %v1692_v55, %v1686_v24  ;;  %2825 = vset.pattern.permute.xlu2 %v4772_v61 }
 0x713   : > { %v1695_v43 = vmul.f32 %v1692_v55, %v1687_v1  ;;  %2271 = vperm.xlu2 %2825, %v3755_v8   ;;  %v2363_v8 = vld [vmem:[%s4656_s16 + $0x8] sm:$0xff] }
 0x714   : > { %v1702_v18 = vadd.f32 %v1700_v2, %v1694_v33 }
 0x715   : > { %v1703_v4 = vadd.f32 %v1700_v2, %v1695_v43  ;;  %v3943_v2 = vpop.permute.xlu0 %1850 }
 0x716   : > { %1759 = vmatpush.msra.mxu0 %v1702_v18  ;;  %4786 = vst [vmem:[#allocation19_spill] sm:$0xff] %v3943_v2 }
 0x717   : > { %1788 = vmatpush.msra.mxu1 %v1703_v4  ;;  %2724 = vmatmul.msk.f32.vlgmr.msra.gmra.mxu0 %vm723_vm7, %v1704_v63 }
 0x718   : > { %2728 = vmatmul.msk.f32.vlgmr.msra.gmra.mxu1 %vm723_vm7, %v1704_v63 }
 0x71b   : > { %2267 = vperm.xlu2 %2825, %v3653_v52   ;;  %v1715_v52 = vpop.permute.xlu1 %1714 }
 0x71d   : > { %v3957_v63 = vpop.permute.xlu0 %1911 }
 0x71f   : > { %2725 = vmatmul.msk.f32.gmra.mxu0 %vm723_vm7, %v1705_v20 }
 0x720   : > { %2729 = vmatmul.msk.f32.gmra.mxu1 %vm723_vm7, %v1705_v20 }
 0x723   : > { %2827 = vset.pattern.permute.xlu2 %v4771_v3  ;;  %v1720_v12 = vpop.permute.xlu1 %1719 }
 0x724   : > { %2373 = vperm.xlu2 %2827, %v2363_v8  }
 0x727   : > { %2726 = vmatmul.msk.f32.gmra.mxu0 %vm723_vm7, %v1706_v36 }
 0x728   : > { %2730 = vmatmul.msk.f32.gmra.mxu1 %vm723_vm7, %v1706_v36  ;;  %v3969_v36 = vpop.permute.xlu0 %1971 }
 0x72b   : > { %v3859_v59 = vpop.permute.xlu1 %1729 }
 0x72c   : > { %2831 = vset.pattern.permute.xlu2 %v4756_v45  ;;  %v3862_v45 = vpop.permute.xlu2 %1845 }
 0x72d   : > { %2087 = vperm.xlu2 %2831, %v3659_v56  }
 0x72f   : > { %2727 = vmatmul.msk.f32.gmra.mxu0 %vm723_vm7, %v1707_v53 }
 0x730   : > { %2731 = vmatmul.msk.f32.gmra.mxu1 %vm723_vm7, %v1707_v53 }
 0x735   : > { %2833 = vset.pattern.permute.xlu2 %v4755_v62  ;;  %v3864_v62 = vpop.permute.xlu1 %1840 }
 0x736   : > { %2151 = vperm.xlu2 %2833, %v3659_v56  }
 0x73d   : > { %v3869_v48 = vpop.permute.xlu1 %1855 }
 0x73e   : > { %2835 = vset.pattern.permute.xlu2 %v4757_v15  ;;  %v3867_v15 = vpop.permute.xlu2 %1907  ;;  %4773 = vst [vmem:[#allocation11_spill] sm:$0xff] %v3869_v48 }
 0x73f   : > { %2215 = vperm.xlu2 %2835, %v3659_v56  }
 0x745   : > { %v3871_v32 = vpop.permute.xlu1 %1915 }
 0x746   : > { %4774 = vst [vmem:[#allocation9_spill] sm:$0xff] %v3871_v32  ;;  %v3873_v17 = vpop.permute.xlu2 %1919 }
 0x747   : > { %2837 = vset.pattern.permute.xlu2 %v4772_v61  ;;  %4775 = vst [vmem:[#allocation8_spill] sm:$0xff] %v3873_v17 }
 0x748   : > { %2279 = vperm.xlu2 %2837, %v3659_v56  }
 0x74d   : > { %v3875_v56 = vpop.permute.xlu1 %1975 }
 0x74e   : > { %v3877_v37 = vpop.permute.xlu2 %1979 }
 0x74f   : > { %4776 = vst [vmem:[#allocation5_spill] sm:$0xff] %v3877_v37  ;;  %v4798_v37 = vld [vmem:[#allocation14_spill] sm:$0xff] }
 0x750   : > { %2275 = vperm.xlu2 %2837, %v3747_v54  }
 0x755   : > { %v3879_v42 = vpop.permute.xlu1 %1983 }
 0x756   : > { %4777 = vst [vmem:[#allocation15_spill] sm:$0xff] %v3879_v42  ;;  %v3881_v49 = vpop.permute.xlu2 %2079  ;;  %v4795_v42 = vld [vmem:[#allocation12_spill] sm:$0xff] }
 0x758   : > { %2839 = vset.pattern.permute.xlu2 %v4771_v3 }
 0x75d   : > { %v3883_v46 = vpop.permute.xlu1 %2035 }
 0x75e   : > { %v3885_v51 = vpop.permute.xlu2 %2143 }
 0x765   : > { %v2076_v35 = vpop.permute.xlu1 %2075 }
 0x766   : > { %v3892_v58 = vpop.permute.xlu2 %2207 }
 0x76d   : > { %v3919_v11 = vpop.permute.xlu1 %2139 }
 0x76e   : > { %v3901_v41 = vpop.permute.xlu2 %2271 }
 0x775   : > { %v3929_v1 = vpop.permute.xlu1 %2203 }
 0x776   : > { %v3906_v38 = vpop.permute.xlu2 %2267 }
 0x77d   : > { %v3945_v43 = vpop.permute.xlu1 %2331 }
 0x77e   : > { %v3913_v50 = vpop.permute.xlu2 %2373 }
 0x77f   : > { %4782 = vst [vmem:[#allocation16_spill] sm:$0xff] %v3913_v50 }
 0x785   : > { %v3959_v4 = vpop.permute.xlu1 %2368 }
 0x787   : > { %v3927_v39 = vpop.permute.xlu2 %2087 }
 0x788   : > { %4784 = vst [vmem:[#allocation17_spill] sm:$0xff] %v3927_v39 }
 0x78d   : > { %v3971_v8 = vpop.permute.xlu1 %2043 }
 0x78e   : > { %4789 = vst [vmem:[#allocation22_spill] sm:$0xff] %v3971_v8 }
 0x790   : > { %v3937_v33 = vpop.permute.xlu2 %2151 }
 0x791   : > { %4785 = vst [vmem:[#allocation18_spill] sm:$0xff] %v3937_v33 }
 0x794   : > { %v1761_v0 = vpop.f32.mrf.mxu0 }
 0x795   : > { %v1762_v23 = vadd.f32 %v1761_v0, %v1715_v52  ;;  %v1790_v31 = vpop.f32.mrf.mxu1 }
 0x796   : > { %v1791_v60 = vadd.f32 %v1790_v31, %v1715_v52  ;;  %v3989_v31 = vpop.permute.xlu1 %2083 }
 0x797   : > { %1874 = vrot.lane.b32.xlu2 %v1762_v23, %s2923_s24  ;;  %1806 = vrot.lane.b32.xlu0 %v1762_v23, %s2921_s22  ;;  %v2066_v22 = vmul.f32 %v1762_v23, %v4767_v40  ;;  %4791 = vst [vmem:[#allocation24_spill] sm:$0xff] %v3989_v31  ;;  %v4797_v31 = vld [vmem:[#allocation13_spill] sm:$0xff] }
 0x798   : > { %1882 = vrot.lane.b32.xlu1 %v1791_v60, %s2923_s24  ;;  %v2067_v10 = vmul.f32 %v1791_v60, %v4766_v13 }
 0x799   : > { %v3894_v9 = vmul.f32 %v2076_v35, %v2066_v22  ;;  %v3949_v18 = vpop.permute.xlu2 %2215 }
 0x79a   : > { %v3896_v55 = vmul.f32 %v2076_v35, %v2067_v10  ;;  %4787 = vst [vmem:[#allocation20_spill] sm:$0xff] %v3949_v18 }
 0x79c   : > { %v1764_v28 = vpop.f32.mrf.mxu0 }
 0x79d   : > { %v1793_v16 = vpop.f32.mrf.mxu1  ;;  %v3921_v24 = vadd.f32 %v1764_v28, %v1720_v12 }
 0x79e   : > { %v3911_v27 = vadd.f32 %v1793_v16, %v1720_v12  ;;  %v3997_v22 = vpop.permute.xlu1 %2147 }
 0x79f   : > { %1946 = vrot.lane.b32.xlu2 %v1791_v60, %s4778_s27  ;;  %1814 = vrot.lane.b32.xlu0 %v1791_v60, %s2921_s22  ;;  %4792 = vst [vmem:[#allocation25_spill] sm:$0xff] %v3997_v22 }
 0x7a0   : > { %1938 = vrot.lane.b32.xlu1 %v1762_v23, %s4778_s27 }
 0x7a2   : > { %v3961_v20 = vpop.permute.xlu2 %2279 }
 0x7a3   : > { %4788 = vst [vmem:[#allocation21_spill] sm:$0xff] %v3961_v20 }
 0x7a4   : > { %v1767_v12 = vpop.f32.mrf.mxu0 }
 0x7a5   : > { %v1796_v61 = vpop.f32.mrf.mxu1  ;;  %v3985_v0 = vadd.f32 %v1767_v12, %v3857_v26 }
 0x7a6   : > { %v3974_v53 = vadd.f32 %v1796_v61, %v3857_v26  ;;  %v4018_v61 = vpop.permute.xlu1 %2211 }
 0x7a7   : > { %2002 = vrot.lane.b32.xlu2 %v1762_v23, %s4779_s25  ;;  %2106 = vrot.lane.b32.xlu0 %v1762_v23, %s4780_s3  ;;  %4794 = vst [vmem:[#allocation27_spill] sm:$0xff] %v4018_v61  ;;  %v4796_v61 = vld [vmem:[#allocation10_spill] sm:$0xff] }
 0x7a8   : > { %2114 = vrot.lane.b32.xlu1 %v1791_v60, %s4780_s3 }
 0x7aa   : > { %v3980_v52 = vpop.permute.xlu2 %2275 }
 0x7ab   : > { %4790 = vst [vmem:[#allocation23_spill] sm:$0xff] %v3980_v52 }
 0x7ac   : > { %v1770_v10 = vpop.f32.mrf.mxu0 }
 0x7ad   : > { %v4008_v16 = vadd.f32 %v1770_v10, %v3859_v59  ;;  %v1799_v7 = vpop.f32.mrf.mxu1 }
 0x7ae   : > { %v4021_v25 = vadd.f32 %v1799_v7, %v3859_v59 }
 0x7af   : > { %2010 = vrot.lane.b32.xlu2 %v1791_v60, %s4779_s25  ;;  %2170 = vrot.lane.b32.xlu0 %v1762_v23, %s4781_s2 }
 0x7b0   : > { %2178 = vrot.lane.b32.xlu1 %v1791_v60, %s4781_s2 }
 0x7b7   : > { %1884 = vrot.lane.b32.xlu2 %v3911_v27, %s2923_s24  ;;  %2234 = vrot.lane.b32.xlu0 %v1762_v23, %s4759_s28 }
 0x7b8   : > { %2242 = vrot.lane.b32.xlu1 %v1791_v60, %s4759_s28 }
 0x7bf   : > { %1940 = vrot.lane.b32.xlu2 %v3921_v24, %s4778_s27  ;;  %2298 = vrot.lane.b32.xlu0 %v1762_v23, %s4783_s21  ;;  %v3987_v23 = vpop.permute.xlu0 %2039 }
 0x7c0   : > { %2306 = vrot.lane.b32.xlu1 %v1791_v60, %s4783_s21 }
 0x7c7   : > { %2116 = vrot.lane.b32.xlu2 %v3911_v27, %s4780_s3  ;;  %1948 = vrot.lane.b32.xlu0 %v3911_v27, %s4778_s27  ;;  %v3999_v35 = vpop.permute.xlu0 %2047 }
 0x7c8   : > { %1808 = vrot.lane.b32.xlu1 %v3921_v24, %s2921_s22  ;;  %4793 = vst [vmem:[#allocation26_spill] sm:$0xff] %v3999_v35 }
 0x7cf   : > { %2172 = vrot.lane.b32.xlu2 %v3921_v24, %s4781_s2  ;;  %2004 = vrot.lane.b32.xlu0 %v3921_v24, %s4779_s25  ;;  %v4014_v28 = vpop.permute.xlu0 %2335 }
 0x7d0   : > { %1816 = vrot.lane.b32.xlu1 %v3911_v27, %s2921_s22 }
 0x7d7   : > { %2236 = vrot.lane.b32.xlu2 %v3921_v24, %s4759_s28  ;;  %2180 = vrot.lane.b32.xlu0 %v3911_v27, %s4781_s2 }
 0x7d8   : > { %1876 = vrot.lane.b32.xlu1 %v3921_v24, %s2923_s24 }
 0x7df   : > { %2300 = vrot.lane.b32.xlu2 %v3921_v24, %s4783_s21  ;;  %2244 = vrot.lane.b32.xlu0 %v3911_v27, %s4759_s28 }
 0x7e0   : > { %2012 = vrot.lane.b32.xlu1 %v3911_v27, %s4779_s25 }
 0x7e7   : > { %2308 = vrot.lane.b32.xlu0 %v3911_v27, %s4783_s21  ;;  %1818 = vrot.lane.b32.xlu2 %v3974_v53, %s2921_s22 }
 0x7e8   : > { %2108 = vrot.lane.b32.xlu1 %v3921_v24, %s4780_s3 }
 0x7ef   : > { %1886 = vrot.lane.b32.xlu0 %v3974_v53, %s2923_s24  ;;  %1878 = vrot.lane.b32.xlu2 %v3985_v0, %s2923_s24 }
 0x7f0   : > { %1810 = vrot.lane.b32.xlu1 %v3985_v0, %s2921_s22 }
 0x7f1   : > { %v1875_v60 = vpop.permute.xlu2 %1874 }
 0x7f7   : > { %1942 = vrot.lane.b32.xlu0 %v3985_v0, %s4778_s27  ;;  %2014 = vrot.lane.b32.xlu2 %v3974_v53, %s4779_s25 }
 0x7f8   : > { %1950 = vrot.lane.b32.xlu1 %v3974_v53, %s4778_s27 }
 0x7f9   : > { %v1947_v26 = vpop.permute.xlu2 %1946 }
 0x7ff   : > { %2110 = vrot.lane.b32.xlu0 %v3985_v0, %s4780_s3  ;;  %1812 = vrot.lane.b32.xlu2 %v4008_v16, %s2921_s22 }
 0x800   : > { %2006 = vrot.lane.b32.xlu1 %v3985_v0, %s4779_s25 }
 0x801   : > { %v2003_v12 = vpop.permute.xlu2 %2002 }
 0x807   : > { %2174 = vrot.lane.b32.xlu0 %v3985_v0, %s4781_s2  ;;  %1952 = vrot.lane.b32.xlu2 %v4021_v25, %s4778_s27 }
 0x808   : > { %2118 = vrot.lane.b32.xlu1 %v3974_v53, %s4780_s3 }
 0x809   : > { %v1807_v10 = vpop.permute.xlu0 %1806  ;;  %v2011_v20 = vpop.permute.xlu2 %2010 }
 0x80a   : > { %v1883_v18 = vpop.permute.xlu1 %1882  ;;  %v2018_v33 = vsel %vm958_vm11, %v2003_v12, %v2011_v20  ;;  %v2022_v35 = vsel %vm958_vm11, %v2011_v20, %v2003_v12 }
 0x80b   : > { %v1890_v7 = vsel %vm856_vm9, %v1875_v60, %v1883_v18  ;;  %v1894_v59 = vsel %vm856_vm9, %v1883_v18, %v1875_v60  ;;  %v2027_v8 = vmul.f32 %v2018_v33, %v3359_v47 }
 0x80c   : > { %v1898_v52 = vmul.f32 %v1894_v59, %v4764_v57  ;;  %v1899_v48 = vmul.f32 %v1890_v7, %v4795_v42  ;;  %v2026_v7 = vmul.f32 %v2022_v35, %v3356_v5 }
 0x80f   : > { %2238 = vrot.lane.b32.xlu0 %v3985_v0, %s4759_s28  ;;  %2008 = vrot.lane.b32.xlu2 %v4008_v16, %s4779_s25 }
 0x810   : > { %2182 = vrot.lane.b32.xlu1 %v3974_v53, %s4781_s2 }
 0x811   : > { %v1815_v20 = vpop.permute.xlu0 %1814 }
 0x812   : > { %v1939_v12 = vpop.permute.xlu1 %1938  ;;  %v1822_v17 = vsel %vm802_vm8, %v1807_v10, %v1815_v20  ;;  %v1826_v18 = vsel %vm802_vm8, %v1815_v20, %v1807_v10  ;;  %v1922_v10 = vmul.f32 %v3867_v15, %v1898_v52  ;;  %v1923_v20 = vmul.f32 %v3867_v15, %v1899_v48 }
 0x813   : > { %v1954_v60 = vsel %vm907_vm10, %v1939_v12, %v1947_v26  ;;  %v1958_v39 = vsel %vm907_vm10, %v1947_v26, %v1939_v12  ;;  %v1830_v22 = vmul.f32 %v1826_v18, %v4796_v61  ;;  %v1831_v59 = vmul.f32 %v1822_v17, %v4797_v31 }
 0x814   : > { %v1962_v50 = vmul.f32 %v1958_v39, %v4798_v37  ;;  %v1963_v2 = vmul.f32 %v1954_v60, %v3335_v19  ;;  %v2050_v15 = vmul.f32 %v3883_v46, %v2026_v7  ;;  %v2051_v48 = vmul.f32 %v3883_v46, %v2027_v8 }
 0x815   : > { %v1858_v32 = vmul.f32 %v3864_v62, %v1830_v22  ;;  %v1859_v26 = vmul.f32 %v3864_v62, %v1831_v59 }
 0x816   : > { %v1986_v12 = vmul.f32 %v3969_v36, %v1962_v50  ;;  %v1987_v17 = vmul.f32 %v3969_v36, %v1963_v2  ;;  %v4073_v2 = vpop.permute.xlu2 %1884 }
 0x817   : > { %v1930_v18 = vadd.f32 %v1922_v10, %v1858_v32  ;;  %v1931_v35 = vadd.f32 %v1923_v20, %v1859_v26  ;;  %2302 = vrot.lane.b32.xlu0 %v3985_v0, %s4783_s21  ;;  %2120 = vrot.lane.b32.xlu2 %v4021_v25, %s4780_s3 }
 0x818   : > { %2246 = vrot.lane.b32.xlu1 %v3974_v53, %s4759_s28 }
 0x819   : > { %v1994_v62 = vadd.f32 %v1986_v12, %v1930_v18  ;;  %v1995_v39 = vadd.f32 %v1987_v17, %v1931_v35  ;;  %v2107_v50 = vpop.permute.xlu0 %2106 }
 0x81a   : > { %v2115_v33 = vpop.permute.xlu1 %2114 }
 0x81b   : > { %v2058_v32 = vadd.f32 %v2050_v15, %v1994_v62  ;;  %v2059_v36 = vadd.f32 %v2051_v48, %v1995_v39  ;;  %v2122_v52 = vsel %vm1041_vm12, %v2107_v50, %v2115_v33  ;;  %v2126_v22 = vsel %vm1041_vm12, %v2115_v33, %v2107_v50 }
 0x81c   : > { %v2130_v60 = vmul.f32 %v2122_v52, %v3371_v30  ;;  %v2131_v59 = vmul.f32 %v2126_v22, %v3374_v21 }
 0x81d   : > { %v2098_v46 = vadd.f32 %v3894_v9, %v2058_v32  ;;  %v2099_v8 = vadd.f32 %v3896_v55, %v2059_v36 }
 0x81e   : > { %v2154_v7 = vmul.f32 %v3919_v11, %v2130_v60  ;;  %v2155_v10 = vmul.f32 %v3919_v11, %v2131_v59  ;;  %v4097_v35 = vpop.permute.xlu2 %1940 }
 0x81f   : > { %1820 = vrot.lane.b32.xlu0 %v4021_v25, %s2921_s22  ;;  %2176 = vrot.lane.b32.xlu2 %v4008_v16, %s4781_s2 }
 0x820   : > { %v2162_v20 = vadd.f32 %v2154_v7, %v2098_v46  ;;  %v2163_v26 = vadd.f32 %v2155_v10, %v2099_v8  ;;  %2310 = vrot.lane.b32.xlu1 %v3974_v53, %s4783_s21 }
 0x821   : > { %v2171_v12 = vpop.permute.xlu0 %2170 }
 0x822   : > { %v2179_v17 = vpop.permute.xlu1 %2178 }
 0x823   : > { %v2186_v9 = vsel %vm1092_vm14, %v2171_v12, %v2179_v17  ;;  %v2190_v55 = vsel %vm1092_vm14, %v2179_v17, %v2171_v12  ;;  %v4136_v17 = vld [vmem:[%s4742_s29 + $0x18] ss:$0 sm:$0xff] }
 0x824   : > { %v2194_v11 = vmul.f32 %v2186_v9, %v3412_v29  ;;  %v2195_v18 = vmul.f32 %v2190_v55, %v3415_v44 }
 0x826   : > { %v2218_v15 = vmul.f32 %v3929_v1, %v2194_v11  ;;  %v2219_v48 = vmul.f32 %v3929_v1, %v2195_v18  ;;  %v4115_v59 = vpop.permute.xlu2 %2116 }
 0x827   : > { %1880 = vrot.lane.b32.xlu0 %v4008_v16, %s2923_s24  ;;  %2240 = vrot.lane.b32.xlu2 %v4008_v16, %s4759_s28 }
 0x828   : > { %v2226_v62 = vadd.f32 %v2218_v15, %v2162_v20  ;;  %v2227_v39 = vadd.f32 %v2219_v48, %v2163_v26  ;;  %1888 = vrot.lane.b32.xlu1 %v4021_v25, %s2923_s24  ;;  %v4130_v26 = vld [vmem:[%s4742_s29 + $0x10] ss:$0 sm:$0xff] }
 0x829   : > { %v2235_v50 = vpop.permute.xlu0 %2234 }
 0x82a   : > { %v2243_v33 = vpop.permute.xlu1 %2242 }
 0x82b   : > { %v2250_v32 = vsel %vm1143_vm13, %v2235_v50, %v2243_v33  ;;  %v2254_v36 = vsel %vm1143_vm13, %v2243_v33, %v2235_v50 }
 0x82c   : > { %v2258_v1 = vmul.f32 %v2250_v32, %v3338_v34  ;;  %v2259_v52 = vmul.f32 %v2254_v36, %v3362_v6  ;;  %v2365_v32 = vld [vmem:[%s4656_s16 + $0x18] sm:$0xff] }
 0x82e   : > { %v2282_v22 = vmul.f32 %v3906_v38, %v2258_v1  ;;  %v2283_v60 = vmul.f32 %v3906_v38, %v2259_v52  ;;  %v4145_v48 = vpop.permute.xlu2 %2172  ;;  %v2364_v52 = vld [vmem:[%s4656_s16 + $0x10] sm:$0xff] }
 0x82f   : > { %2016 = vrot.lane.b32.xlu0 %v4021_v25, %s4779_s25  ;;  %2304 = vrot.lane.b32.xlu2 %v4008_v16, %s4783_s21 }
 0x830   : > { %v2290_v46 = vadd.f32 %v2282_v22, %v2226_v62  ;;  %v2291_v8 = vadd.f32 %v2283_v60, %v2227_v39  ;;  %1944 = vrot.lane.b32.xlu1 %v4008_v16, %s4778_s27 }
 0x831   : > { %v2299_v7 = vpop.permute.xlu0 %2298 }
 0x832   : > { %v2307_v10 = vpop.permute.xlu1 %2306 }
 0x833   : > { %v2314_v20 = vsel %vm1194_vm15, %v2299_v7, %v2307_v10  ;;  %v2318_v38 = vsel %vm1194_vm15, %v2307_v10, %v2299_v7 }
 0x834   : > { %v2322_v12 = vmul.f32 %v4130_v26, %v2314_v20  ;;  %v2323_v9 = vmul.f32 %v4136_v17, %v2318_v38  ;;  %v2575_v20 = vld [vmem:[%s4658_s18] sm:$0xff] }
 0x836   : > { %v2346_v55 = vmul.f32 %v3945_v43, %v2322_v12  ;;  %v2347_v11 = vmul.f32 %v3945_v43, %v2323_v9  ;;  %v4150_v43 = vpop.permute.xlu2 %2236 }
 0x837   : > { %2184 = vrot.lane.b32.xlu0 %v4021_v25, %s4781_s2  ;;  %2383 = vperm.xlu2 %2839, %v2365_v32  }
 0x838   : > { %v2354_v18 = vadd.f32 %v2346_v55, %v2290_v46  ;;  %v2355_v15 = vadd.f32 %v2347_v11, %v2291_v8  ;;  %2112 = vrot.lane.b32.xlu1 %v4008_v16, %s4780_s3 }
 0x839   : > { %v1949_v62 = vpop.permute.xlu0 %1948 }
 0x83a   : > { %v1809_v39 = vpop.permute.xlu1 %1808  ;;  %v4156_v36 = vadd.f32 %v3959_v4, %v2354_v18  ;;  %v4159_v1 = vadd.f32 %v3959_v4, %v2355_v15  ;;  %v1959_v15 = vsel %vm907_vm10, %v1949_v62, %v4097_v35 }
 0x83c   : > { %4799 = vst [vmem:[#allocation12_spill] sm:$0xff] %v4156_v36  ;;  %v4170_v22 = vmul.f32 0.70710677, %v4159_v1 }
 0x83d   : > { %4800 = vst [vmem:[#allocation10_spill] sm:$0xff] %v4159_v1 }
 0x83e   : > { %v2442_v12 = vmul.f32 %v4170_v22, %v4170_v22 }
 0x83f   : > { %2248 = vrot.lane.b32.xlu0 %v4021_v25, %s4759_s28  ;;  %2578 = vperm.xlu2 %2839, %v2575_v20  }
 0x840   : > { %2339 = vperm.xlu1 %2838, %v3747_v54   ;;  %v4167_v54 = vmul.f32 0.70710677, %v4156_v36 }
 0x841   : > { %v2005_v50 = vpop.permute.xlu0 %2004 }
 0x842   : > { %v1817_v33 = vpop.permute.xlu1 %1816  ;;  %v2402_v38 = vmul.f32 %v4167_v54, %v4167_v54 }
 0x843   : > { %v1823_v4 = vsel %vm802_vm8, %v1809_v39, %v1817_v33  ;;  %v1827_v60 = vsel %vm802_vm8, %v1817_v33, %v1809_v39  ;;  %v2301_v39 = vpop.permute.xlu2 %2300 }
 0x844   : > { %v1832_v9 = vmul.f32 %v1827_v60, %v4796_v61  ;;  %v1833_v55 = vmul.f32 %v1823_v4, %v4797_v31  ;;  %v4205_v4 = vmin.f32 %v2402_v38, 16.0  ;;  %v4207_v60 = vmin.f32 %v2442_v12, 16.0 }
 0x845   : > { %v2069_v38 = vmul.f32 %v3911_v27, %v4766_v13 }
 0x847   : > { %2312 = vrot.lane.b32.xlu0 %v4021_v25, %s4783_s21 }
 0x848   : > { %2840 = vset.pattern.permute.xlu1 %v4771_v3 }
 0x849   : > { %2378 = vperm.xlu1 %2840, %v2364_v52   ;;  %v2181_v46 = vpop.permute.xlu0 %2180  ;;  %v2882_v52 = vld [vmem:[%s4655_s15 + $0x18] sm:$0xff] }
 0x84a   : > { %v1877_v8 = vpop.permute.xlu1 %1876 }
 0x84b   : > { %v1891_v7 = vsel %vm856_vm9, %v1877_v8, %v4073_v2  ;;  %v1895_v10 = vsel %vm856_vm9, %v4073_v2, %v1877_v8  ;;  %v1955_v2 = vsel %vm907_vm10, %v4097_v35, %v1949_v62  ;;  %v1964_v8 = vmul.f32 %v1959_v15, %v4798_v37 }
 0x84c   : > { %v1900_v11 = vmul.f32 %v1895_v10, %v4764_v57  ;;  %v1901_v18 = vmul.f32 %v1891_v7, %v4795_v42  ;;  %v1965_v7 = vmul.f32 %v1955_v2, %v3335_v19  ;;  %v1860_v35 = vmul.f32 %v3862_v45, %v1832_v9 }
 0x84d   : > { %v1861_v62 = vmul.f32 %v3862_v45, %v1833_v55  ;;  %v2415_v9 = vmul.f32 3.8918573e-05, %v4205_v4  ;;  %v2455_v45 = vmul.f32 3.8918573e-05, %v4207_v60  ;;  %v1988_v55 = vmul.f32 %v3875_v56, %v1964_v8 }
 0x84e   : > { %v1924_v33 = vmul.f32 %v3957_v63, %v1900_v11  ;;  %v1925_v32 = vmul.f32 %v3957_v63, %v1901_v18  ;;  %v2068_v18 = vmul.f32 %v3921_v24, %v4767_v40  ;;  %v1989_v15 = vmul.f32 %v3875_v56, %v1965_v7 }
 0x84f   : > { %2343 = vperm.xlu0 %2829, %v2882_v52   ;;  %v2093_v56 = vmul.f32 %v3881_v49, %v2069_v38  ;;  %v2187_v7 = vsel %vm1092_vm14, %v4145_v48, %v2181_v46 }
 0x850   : > { %v1932_v20 = vadd.f32 %v1924_v33, %v1860_v35  ;;  %v1933_v63 = vadd.f32 %v1925_v32, %v1861_v62  ;;  %v1819_v62 = vpop.permute.xlu2 %1818  ;;  %v2092_v8 = vmul.f32 %v3881_v49, %v2068_v18 }
 0x851   : > { %v2245_v10 = vpop.permute.xlu0 %2244 }
 0x852   : > { %v2013_v11 = vpop.permute.xlu1 %2012  ;;  %v1996_v32 = vadd.f32 %v1988_v55, %v1932_v20  ;;  %v1997_v27 = vadd.f32 %v1989_v15, %v1933_v63  ;;  %v2191_v20 = vsel %vm1092_vm14, %v2181_v46, %v4145_v48 }
 0x853   : > { %v2019_v12 = vsel %vm958_vm11, %v2005_v50, %v2013_v11  ;;  %v2023_v2 = vsel %vm958_vm11, %v2013_v11, %v2005_v50  ;;  %v2416_v50 = vadd.f32 0.001143296, %v2415_v9  ;;  %v2456_v11 = vadd.f32 0.001143296, %v2455_v45 }
 0x854   : > { %v2028_v33 = vmul.f32 %v2023_v2, %v3356_v5  ;;  %v2029_v24 = vmul.f32 %v2019_v12, %v3359_v47 }
 0x856   : > { %v2052_v52 = vmul.f32 %v3987_v23, %v2028_v33  ;;  %v2053_v35 = vmul.f32 %v3987_v23, %v2029_v24  ;;  %v2251_v23 = vsel %vm1143_vm13, %v4150_v43, %v2245_v10 }
 0x857   : > { %2841 = vset.pattern.permute.xlu0 %v4771_v3  ;;  %v2255_v3 = vsel %vm1143_vm13, %v2245_v10, %v4150_v43  ;;  %v2417_v43 = vmul.f32 %v2416_v50, %v4205_v4  ;;  %v2457_v10 = vmul.f32 %v2456_v11, %v4207_v60  ;;  %v2260_v45 = vmul.f32 %v2251_v23, %v3338_v34 }
 0x858   : > { %v2060_v1 = vadd.f32 %v2052_v52, %v1996_v32  ;;  %v2061_v36 = vadd.f32 %v2053_v35, %v1997_v27  ;;  %v2261_v55 = vmul.f32 %v2255_v3, %v3362_v6 }
 0x859   : > { %v2309_v63 = vpop.permute.xlu0 %2308  ;;  %v2418_v32 = vadd.f32 0.014752088, %v2417_v43  ;;  %v2458_v27 = vadd.f32 0.014752088, %v2457_v10  ;;  %v4801_v10 = vld [vmem:[#allocation9_spill] sm:$0xff] }
 0x85a   : > { %v2109_v18 = vpop.permute.xlu1 %2108  ;;  %v2100_v12 = vadd.f32 %v2092_v8, %v2060_v1  ;;  %v2101_v49 = vadd.f32 %v2093_v56, %v2061_v36  ;;  %v2315_v38 = vsel %vm1194_vm15, %v2301_v39, %v2309_v63  ;;  %v2319_v2 = vsel %vm1194_vm15, %v2309_v63, %v2301_v39  ;;  %v1879_v8 = vpop.permute.xlu2 %1878 }
 0x85b   : > { %v2123_v48 = vsel %vm1041_vm12, %v2109_v18, %v4115_v59  ;;  %v2127_v46 = vsel %vm1041_vm12, %v4115_v59, %v2109_v18  ;;  %v2196_v36 = vmul.f32 %v2187_v7, %v3412_v29  ;;  %v2197_v1 = vmul.f32 %v2191_v20, %v3415_v44 }
 0x85c   : > { %v2132_v9 = vmul.f32 %v2123_v48, %v3371_v30  ;;  %v2133_v39 = vmul.f32 %v2127_v46, %v3374_v21  ;;  %v2324_v15 = vmul.f32 %v4130_v26, %v2315_v38  ;;  %v2325_v59 = vmul.f32 %v4136_v17, %v2319_v2 }
 0x85d   : > { %v2220_v52 = vmul.f32 %v3892_v58, %v2196_v36  ;;  %v2221_v35 = vmul.f32 %v3892_v58, %v2197_v1  ;;  %v2284_v56 = vmul.f32 %v3901_v41, %v2260_v45  ;;  %v2285_v7 = vmul.f32 %v3901_v41, %v2261_v55 }
 0x85e   : > { %v2156_v33 = vmul.f32 %v3885_v51, %v2132_v9  ;;  %v2157_v24 = vmul.f32 %v3885_v51, %v2133_v39  ;;  %v2348_v20 = vmul.f32 %v4014_v28, %v2324_v15  ;;  %v2349_v23 = vmul.f32 %v4014_v28, %v2325_v59  ;;  %v4802_v15 = vld [vmem:[#allocation19_spill] sm:$0xff] }
 0x85f   : > { %v2419_v9 = vmul.f32 %v2418_v32, %v4205_v4  ;;  %v2459_v39 = vmul.f32 %v2458_v27, %v4207_v60 }
 0x860   : > { %v2164_v50 = vadd.f32 %v2156_v33, %v2100_v12  ;;  %v2165_v11 = vadd.f32 %v2157_v24, %v2101_v49  ;;  %v4803_v33 = vld [vmem:[#allocation16_spill] sm:$0xff] }
 0x861   : > { %v1887_v3 = vpop.permute.xlu0 %1886 }
 0x862   : > { %v2228_v63 = vadd.f32 %v2220_v52, %v2164_v50  ;;  %v2229_v51 = vadd.f32 %v2221_v35, %v2165_v11  ;;  %v1892_v18 = vsel %vm856_vm9, %v1879_v8, %v1887_v3  ;;  %v1896_v58 = vsel %vm856_vm9, %v1887_v3, %v1879_v8  ;;  %v1811_v12 = vpop.permute.xlu1 %1810 }
 0x863   : > { %v1902_v49 = vmul.f32 %v1896_v58, %v4764_v57  ;;  %v1903_v38 = vmul.f32 %v1892_v18, %v4795_v42  ;;  %v1824_v41 = vsel %vm802_vm8, %v1811_v12, %v1819_v62  ;;  %v1828_v28 = vsel %vm802_vm8, %v1819_v62, %v1811_v12 }
 0x864   : > { %v2292_v2 = vadd.f32 %v2284_v56, %v2228_v63  ;;  %v2293_v48 = vadd.f32 %v2285_v7, %v2229_v51  ;;  %v1834_v46 = vmul.f32 %v1828_v28, %v4796_v61  ;;  %v1835_v43 = vmul.f32 %v1824_v41, %v4797_v31  ;;  %v4804_v41 = vld [vmem:[#allocation5_spill] sm:$0xff] }
 0x865   : > { %v1926_v36 = vmul.f32 %v4801_v10, %v1902_v49  ;;  %v1927_v1 = vmul.f32 %v4801_v10, %v1903_v38  ;;  %v2420_v8 = vadd.f32 0.112945676, %v2419_v9  ;;  %v2460_v56 = vadd.f32 0.112945676, %v2459_v39 }
 0x866   : > { %v2356_v45 = vadd.f32 %v2348_v20, %v2292_v2  ;;  %v2357_v55 = vadd.f32 %v2349_v23, %v2293_v48  ;;  %v1862_v59 = vmul.f32 %v4802_v15, %v1834_v46  ;;  %v1863_v62 = vmul.f32 %v4802_v15, %v1835_v43 }
 0x867   : > { %v2421_v58 = vmul.f32 %v2420_v8, %v4205_v4  ;;  %v2461_v12 = vmul.f32 %v2460_v56, %v4207_v60  ;;  %v2404_v43 = vmul.f32 2.1237322e-06, %v4205_v4  ;;  %v2444_v10 = vmul.f32 2.1237322e-06, %v4207_v60 }
 0x868   : > { %v4291_v24 = vadd.f32 %v4803_v33, %v2356_v45  ;;  %v4294_v52 = vadd.f32 %v4803_v33, %v2357_v55  ;;  %v1934_v35 = vadd.f32 %v1926_v36, %v1862_v59  ;;  %v1935_v50 = vadd.f32 %v1927_v1, %v1863_v62  ;;  %v2015_v45 = vpop.permute.xlu2 %2014 }
 0x869   : > { %v1943_v11 = vpop.permute.xlu0 %1942  ;;  %v2422_v1 = vadd.f32 0.4994258, %v2421_v58  ;;  %v2462_v15 = vadd.f32 0.4994258, %v2461_v12  ;;  %v4806_v12 = vld [vmem:[#allocation24_spill] sm:$0xff] }
 0x86a   : > { %v4297_v32 = vmul.f32 0.70710677, %v4291_v24  ;;  %v4300_v27 = vmul.f32 0.70710677, %v4294_v52  ;;  %v1951_v7 = vpop.permute.xlu1 %1950 }
 0x86b   : > { %v1956_v20 = vsel %vm907_vm10, %v1943_v11, %v1951_v7  ;;  %v1960_v23 = vsel %vm907_vm10, %v1951_v7, %v1943_v11  ;;  %v2071_v11 = vmul.f32 %v3974_v53, %v4766_v13  ;;  %v2405_v7 = vadd.f32 0.00028619796, %v2404_v43 }
 0x86c   : > { %v2482_v3 = vmul.f32 %v4297_v32, %v4297_v32  ;;  %v2522_v63 = vmul.f32 %v4300_v27, %v4300_v27  ;;  %v1966_v51 = vmul.f32 %v1960_v23, %v4798_v37  ;;  %v1967_v18 = vmul.f32 %v1956_v20, %v3335_v19 }
 0x86d   : > { %v2423_v20 = vmul.f32 %v2422_v1, %v4205_v4  ;;  %v2445_v23 = vadd.f32 0.00028619796, %v2444_v10  ;;  %v2406_v1 = vmul.f32 %v2405_v7, %v4205_v4 }
 0x86e   : > { %v4314_v49 = vmin.f32 %v2482_v3, 16.0  ;;  %v4316_v38 = vmin.f32 %v2522_v63, 16.0  ;;  %v1990_v28 = vmul.f32 %v4804_v41, %v1966_v51  ;;  %v1991_v2 = vmul.f32 %v4804_v41, %v1967_v18  ;;  %v4805_v3 = vld [vmem:[#allocation22_spill] sm:$0xff] }
 0x86f   : > { %v2463_v18 = vmul.f32 %v2462_v15, %v4207_v60  ;;  %v2095_v41 = vmul.f32 %v4806_v12, %v2071_v11  ;;  %v4343_v10 = vadd.f32 1.0, %v2423_v20 }
 0x870   : > { %v1998_v48 = vadd.f32 %v1990_v28, %v1934_v35  ;;  %v1999_v46 = vadd.f32 %v1991_v2, %v1935_v50  ;;  %v2495_v9 = vmul.f32 3.8918573e-05, %v4314_v49  ;;  %v2535_v39 = vmul.f32 3.8918573e-05, %v4316_v38 }
 0x871   : > { %v2111_v36 = vpop.permute.xlu0 %2110  ;;  %v2070_v50 = vmul.f32 %v3985_v0, %v4767_v40  ;;  %v4346_v15 = vadd.f32 1.0, %v2463_v18  ;;  %2870 = vrcp.f32 %v4343_v10  ;;  %vm2430_vm5 = vweird.f32 %v4343_v10 }
 0x872   : > { %v2007_v55 = vpop.permute.xlu1 %2006  ;;  %v2496_v33 = vadd.f32 0.001143296, %v2495_v9  ;;  %v2536_v35 = vadd.f32 0.001143296, %v2535_v39  ;;  %v2446_v9 = vmul.f32 %v2445_v23, %v4207_v60 }
 0x873   : > { %v2020_v59 = vsel %vm958_vm11, %v2007_v55, %v2015_v45  ;;  %v2024_v62 = vsel %vm958_vm11, %v2015_v45, %v2007_v55  ;;  %v2094_v53 = vmul.f32 %v4806_v12, %v2070_v50  ;;  %v2407_v50 = vadd.f32 0.0036580483, %v2406_v1 }
 0x874   : > { %v2030_v8 = vmul.f32 %v2024_v62, %v3356_v5  ;;  %v2031_v56 = vmul.f32 %v2020_v59, %v3359_v47  ;;  %v2497_v58 = vmul.f32 %v2496_v33, %v4314_v49  ;;  %v2537_v0 = vmul.f32 %v2536_v35, %v4316_v38 }
 0x875   : > { %v2447_v11 = vadd.f32 0.0036580483, %v2446_v9  ;;  %2872 = vrcp.f32 %v4346_v15  ;;  %v2408_v18 = vmul.f32 %v2407_v50, %v4205_v4  ;;  %vm2470_vm4 = vweird.f32 %v4346_v15 }
 0x876   : > { %v2054_v63 = vmul.f32 %v4805_v3, %v2030_v8  ;;  %v2055_v51 = vmul.f32 %v4805_v3, %v2031_v56  ;;  %v2498_v59 = vadd.f32 0.014752088, %v2497_v58  ;;  %v4807_v8 = vld [vmem:[#allocation25_spill] sm:$0xff] }
 0x877   : > { %v2448_v58 = vmul.f32 %v2447_v11, %v4207_v60 }
 0x878   : > { %v2062_v28 = vadd.f32 %v2054_v63, %v1998_v48  ;;  %v2063_v2 = vadd.f32 %v2055_v51, %v1999_v46  ;;  %v2538_v46 = vadd.f32 0.014752088, %v2537_v0  ;;  %v2499_v20 = vmul.f32 %v2498_v59, %v4314_v49 }
 0x879   : > { %v2175_v43 = vpop.permute.xlu0 %2174  ;;  %v2484_v0 = vmul.f32 2.1237322e-06, %v4314_v49  ;;  %v2409_v59 = vadd.f32 0.05243302, %v2408_v18 }
 0x87a   : > { %v2119_v39 = vpop.permute.xlu1 %2118  ;;  %v2102_v45 = vadd.f32 %v2094_v53, %v2062_v28  ;;  %v2103_v55 = vadd.f32 %v2095_v41, %v2063_v2  ;;  %v2539_v23 = vmul.f32 %v2538_v46, %v4316_v38  ;;  %v2500_v53 = vadd.f32 0.112945676, %v2499_v20  ;;  %v4367_v41 = vpop.eup %2870 }
 0x87b   : > { %v2124_v62 = vsel %vm1041_vm12, %v2111_v36, %v2119_v39  ;;  %v2128_v48 = vsel %vm1041_vm12, %v2119_v39, %v2111_v36  ;;  %v4360_v36 = vpop.permute.xlu2 %1812  ;;  %v2524_v28 = vmul.f32 2.1237322e-06, %v4316_v38  ;;  %v4374_v39 = vpop.eup %2872  ;;  %v2485_v11 = vadd.f32 0.00028619796, %v2484_v0 }
 0x87c   : > { %v2134_v33 = vmul.f32 %v2124_v62, %v3371_v30  ;;  %v2135_v35 = vmul.f32 %v2128_v48, %v3374_v21  ;;  %v2540_v9 = vadd.f32 0.112945676, %v2539_v23  ;;  %v2449_v62 = vadd.f32 0.05243302, %v2448_v58  ;;  %v4808_v48 = vld [vmem:[#allocation27_spill] sm:$0xff] }
 0x87d   : > { %v2501_v50 = vmul.f32 %v2500_v53, %v4314_v49  ;;  %v2410_v18 = vmul.f32 %v2409_v59, %v4205_v4  ;;  %vm2431_vm7 = vweird.f32 %v4367_v41  ;;  %vm2471_vm2 = vweird.f32 %v4374_v39 }
 0x87e   : > { %v2158_v56 = vmul.f32 %v4807_v8, %v2134_v33  ;;  %v2159_v7 = vmul.f32 %v4807_v8, %v2135_v35  ;;  %v2426_v35 = vmul.f32 %v4367_v41, %v4343_v10  ;;  %v2466_v8 = vmul.f32 %v4374_v39, %v4346_v15  ;;  %vm4425_vm3 = vmor %vm2430_vm5, %vm2431_vm7 }
 0x87f   : > { %v2450_v58 = vmul.f32 %v2449_v62, %v4207_v60  ;;  %vm2472_vm6 = vmor %vm2470_vm4, %vm2471_vm2 }
 0x880   : > { %v2166_v3 = vadd.f32 %v2158_v56, %v2102_v45  ;;  %v2167_v63 = vadd.f32 %v2159_v7, %v2103_v55  ;;  %v2541_v56 = vmul.f32 %v2540_v9, %v4316_v38  ;;  %v2427_v0 = vsub.f32 1.0, %v2426_v35 }
 0x881   : > { %v4362_v51 = vpop.permute.xlu0 %2238 }
 0x882   : > { %v2183_v12 = vpop.permute.xlu1 %2182  ;;  %v2542_v9 = vadd.f32 0.4994258, %v2541_v56 }
 0x883   : > { %v2188_v2 = vsel %vm1092_vm14, %v2175_v43, %v2183_v12  ;;  %v2192_v1 = vsel %vm1092_vm14, %v2183_v12, %v2175_v43  ;;  %v2525_v43 = vadd.f32 0.00028619796, %v2524_v28  ;;  %v4394_v12 = vpop.permute.xlu2 %1952  ;;  %v2502_v28 = vadd.f32 0.4994258, %v2501_v50 }
 0x884   : > { %v2198_v45 = vmul.f32 %v2188_v2, %v3412_v29  ;;  %v2199_v55 = vmul.f32 %v2192_v1, %v3415_v44  ;;  %v2486_v2 = vmul.f32 %v2485_v11, %v4314_v49 }
 0x885   : > { %v2526_v1 = vmul.f32 %v2525_v43, %v4316_v38  ;;  %v2503_v59 = vmul.f32 %v2502_v28, %v4314_v49 }
 0x886   : > { %v2222_v46 = vmul.f32 %v4808_v48, %v2198_v45  ;;  %v2223_v33 = vmul.f32 %v4808_v48, %v2199_v55  ;;  %v2451_v45 = vadd.f32 0.18741608, %v2450_v58  ;;  %v2428_v55 = vmul.f32 %v4367_v41, %v2427_v0 }
 0x887   : > { %v2487_v48 = vadd.f32 0.0036580483, %v2486_v2  ;;  %v2527_v62 = vadd.f32 0.0036580483, %v2526_v1  ;;  %v4413_v56 = vadd.f32 1.0, %v2503_v59  ;;  %v2476_v2 = vand.u32 2147483648, %v4346_v15 }
 0x888   : > { %v4386_v7 = vadd.f32 %v2222_v46, %v2166_v3  ;;  %v4388_v20 = vadd.f32 %v2223_v33, %v2167_v63  ;;  %v2467_v3 = vsub.f32 1.0, %v2466_v8  ;;  %v2411_v63 = vadd.f32 0.18741608, %v2410_v18 }
 0x889   : > { %v4390_v23 = vpop.permute.xlu0 %2302  ;;  %v2543_v33 = vmul.f32 %v2542_v9, %v4316_v38  ;;  %v2452_v11 = vmul.f32 %v2451_v45, %v4207_v60  ;;  %v2429_v8 = vadd.f32 %v4367_v41, %v2428_v55  ;;  %v2488_v18 = vmul.f32 %v2487_v48, %v4314_v49 }
 0x88a   : > { %v4396_v53 = vpop.permute.xlu1 %2246  ;;  %v2468_v46 = vmul.f32 %v4374_v39, %v2467_v3  ;;  %v2412_v50 = vmul.f32 %v2411_v63, %v4205_v4  ;;  %v2528_v58 = vmul.f32 %v2527_v62, %v4316_v38  ;;  %v2436_v60 = vand.u32 2147483648, %v4343_v10 }
 0x88b   : > { %v4418_v28 = vadd.f32 1.0, %v2543_v33  ;;  %v4420_v4 = vpop.permute.xlu2 %2008  ;;  %v2434_v3 = vand.u32 2147483647, %v4343_v10  ;;  %v2474_v9 = vand.u32 2147483647, %v4346_v15  ;;  %v2433_v45 = vsel %vm4425_vm3, %v4367_v41, %v2429_v8 }
 0x88c   : > { %v2469_v0 = vadd.f32 %v4374_v39, %v2468_v46  ;;  %v2413_v63 = vadd.f32 1.1283791, %v2412_v50  ;;  %v2453_v55 = vadd.f32 1.1283791, %v2452_v11  ;;  %2874 = vrcp.f32 %v4413_v56 }
 0x88d   : > { %v2489_v59 = vadd.f32 0.05243302, %v2488_v18  ;;  %v2529_v48 = vadd.f32 0.05243302, %v2528_v58  ;;  %2876 = vrcp.f32 %v4418_v28  ;;  %v2437_v10 = vor.u32 1.1754944e-38, %v2436_v60 }
 0x88e   : > { %v2473_v62 = vsel %vm2472_vm6, %v4374_v39, %v2469_v0  ;;  %v2477_v46 = vor.u32 1.1754944e-38, %v2476_v2  ;;  %vm2435_vm0 = vcmp.eq.f32.partialorder %v2434_v3, 8.507059e+37  ;;  %vm2475_vm1 = vcmp.eq.f32.partialorder %v2474_v9, 8.507059e+37 }
 0x88f   : > { %v2438_v50 = vsel %vm2435_vm0, %v2437_v10, %v2433_v45  ;;  %v2490_v11 = vmul.f32 %v2489_v59, %v4314_v49  ;;  %v2530_v8 = vmul.f32 %v2529_v48, %v4316_v38  ;;  %v2414_v1 = vmul.f32 %v2413_v63, %v4167_v54 }
 0x890   : > { %v2478_v41 = vsel %vm2475_vm1, %v2477_v46, %v2473_v62  ;;  %v2454_v18 = vmul.f32 %v2453_v55, %v4170_v22  ;;  %v2072_v2 = vmul.f32 %v4008_v16, %v4767_v40  ;;  %v2073_v9 = vmul.f32 %v4021_v25, %v4766_v13  ;;  %v4811_v62 = vld [vmem:[#allocation17_spill] sm:$0xff]  ;;  %v4812_v46 = vld [vmem:[#allocation12_spill] sm:$0xff] }
 0x891   : > { %v4404_v35 = vpop.permute.xlu0 %1820  ;;  %v2439_v0 = vmul.f32 %v2438_v50, %v2414_v1  ;;  %v2491_v45 = vadd.f32 0.18741608, %v2490_v11  ;;  %v2531_v59 = vadd.f32 0.18741608, %v2530_v8  ;;  %v4467_v50 = vmul.f32 0.5, %v4812_v46 }
 0x892   : > { %v4408_v43 = vpop.permute.xlu1 %2310  ;;  %v4444_v58 = vpop.eup %2874  ;;  %v2479_v60 = vmul.f32 %v2478_v41, %v2454_v18  ;;  %v4459_v10 = vmul.f32 %v4811_v62, %v2072_v2  ;;  %v4462_v16 = vmul.f32 %v4811_v62, %v2073_v9  ;;  %v4813_v18 = vld [vmem:[#allocation10_spill] sm:$0xff] }
 0x893   : > { %v4446_v39 = vpop.eup %2876  ;;  %v4450_v3 = vpop.permute.xlu2 %2120  ;;  %v2506_v54 = vmul.f32 %v4444_v58, %v4413_v56  ;;  %v2732_v55 = vclamps-f32 %v2439_v0, 1.0  ;;  %v2492_v13 = vmul.f32 %v2491_v45, %v4314_v49  ;;  %v2532_v25 = vmul.f32 %v2531_v59, %v4316_v38 }
 0x894   : > { %v2546_v22 = vmul.f32 %v4446_v39, %v4418_v28  ;;  %v2733_v48 = vclamps-f32 %v2479_v60, 1.0  ;;  %v4474_v0 = vmul.f32 0.5, %v4813_v18  ;;  %v2516_v49 = vand.u32 2147483648, %v4413_v56 }
 0x895   : > { %v2507_v8 = vsub.f32 1.0, %v2506_v54  ;;  %v4476_v60 = vadd.f32 1.0, %v2732_v55  ;;  %v1825_v38 = vsel %vm802_vm8, %v4360_v36, %v4404_v35  ;;  %v4495_v45 = vadd.f32 1.1283791, %v2492_v13 }
 0x896   : > { %v2547_v1 = vsub.f32 1.0, %v2546_v22  ;;  %v4478_v2 = vadd.f32 1.0, %v2733_v48  ;;  %v2514_v22 = vand.u32 2147483647, %v4413_v56  ;;  %v2533_v55 = vadd.f32 1.1283791, %v2532_v25 }
 0x897   : > { %v2252_v13 = vsel %vm1143_vm13, %v4362_v51, %v4396_v53  ;;  %v2256_v25 = vsel %vm1143_vm13, %v4396_v53, %v4362_v51  ;;  %vm2551_vm2 = vweird.f32 %v4446_v39 }
 0x898   : > { %vm4521_vm7 = vcmp.eq.f32.partialorder %v2514_v22, 8.507059e+37 }
 0x899   : > { %v1881_v15 = vpop.permute.xlu0 %1880 }
 0x89a   : > { %v1889_v33 = vpop.permute.xlu1 %1888 }
 0x89b   : > { %v1893_v41 = vsel %vm856_vm9, %v1881_v15, %v1889_v33  ;;  %v1897_v11 = vsel %vm856_vm9, %v1889_v33, %v1881_v15  ;;  %v1829_v15 = vsel %vm802_vm8, %v4404_v35, %v4360_v36  ;;  %v4500_v48 = vpop.permute.xlu2 %2176  ;;  %v2508_v36 = vmul.f32 %v4444_v58, %v2507_v8 }
 0x89c   : > { %v1904_v59 = vmul.f32 %v1897_v11, %v4764_v57  ;;  %v1905_v54 = vmul.f32 %v1893_v41, %v4795_v42  ;;  %vm2510_vm8 = vweird.f32 %v4413_v56  ;;  %v2548_v35 = vmul.f32 %v4446_v39, %v2547_v1  ;;  %v4817_v1 = vld [vmem:[#allocation11_spill] sm:$0xff] }
 0x89d   : > { %v1836_v62 = vmul.f32 %v1829_v15, %v4796_v61  ;;  %v2517_v41 = vor.u32 1.1754944e-38, %v2516_v49  ;;  %vm2550_vm9 = vweird.f32 %v4418_v28  ;;  %v2509_v11 = vadd.f32 %v4444_v58, %v2508_v36 }
 0x89e   : > { %v2549_v8 = vadd.f32 %v4446_v39, %v2548_v35 }
 0x89f   : > { %v1864_v18 = vmul.f32 %v4817_v1, %v1836_v62 }
 0x8a1   : > { %v2017_v63 = vpop.permute.xlu0 %2016 }
 0x8a2   : > { %v1945_v40 = vpop.permute.xlu1 %1944  ;;  %v2021_v51 = vsel %vm958_vm11, %v4420_v4, %v2017_v63  ;;  %v2025_v53 = vsel %vm958_vm11, %v2017_v63, %v4420_v4  ;;  %v2554_v63 = vand.u32 2147483647, %v4418_v28  ;;  %vm4554_vm11 = vmor %vm2550_vm9, %vm2551_vm2 }
 0x8a3   : > { %v1957_v33 = vsel %vm907_vm10, %v1945_v40, %v4394_v12  ;;  %v1961_v9 = vsel %vm907_vm10, %v4394_v12, %v1945_v40  ;;  %v1837_v12 = vmul.f32 %v1825_v38, %v4797_v31  ;;  %v4814_v31 = vld [vmem:[#allocation8_spill] sm:$0xff]  ;;  %vm2511_vm10 = vweird.f32 %v4444_v58  ;;  %v4818_v38 = vld [vmem:[#allocation15_spill] sm:$0xff] }
 0x8a4   : > { %v1968_v40 = vmul.f32 %v1961_v9, %v4798_v37  ;;  %v1969_v57 = vmul.f32 %v1957_v33, %v3335_v19  ;;  %v1928_v61 = vmul.f32 %v4814_v31, %v1904_v59  ;;  %v1929_v37 = vmul.f32 %v4814_v31, %v1905_v54  ;;  %vm4542_vm5 = vmor %vm2510_vm8, %vm2511_vm10 }
 0x8a5   : > { %v1865_v49 = vmul.f32 %v4817_v1, %v1837_v12  ;;  %v2262_v9 = vmul.f32 %v2252_v13, %v3338_v34  ;;  %v2263_v59 = vmul.f32 %v2256_v25, %v3362_v6  ;;  %v2556_v54 = vand.u32 2147483648, %v4418_v28 }
 0x8a6   : > { %v1992_v15 = vmul.f32 %v4818_v38, %v1968_v40  ;;  %v1993_v33 = vmul.f32 %v4818_v38, %v1969_v57  ;;  %v1936_v22 = vadd.f32 %v1928_v61, %v1864_v18  ;;  %v2032_v35 = vmul.f32 %v2025_v53, %v3356_v5 }
 0x8a7   : > { %v1937_v36 = vadd.f32 %v1929_v37, %v1865_v49  ;;  %v2033_v62 = vmul.f32 %v2021_v51, %v3359_v47  ;;  %v2316_v12 = vsel %vm1194_vm15, %v4390_v23, %v4408_v43  ;;  %v2320_v5 = vsel %vm1194_vm15, %v4408_v43, %v4390_v23  ;;  %v2241_v23 = vpop.permute.xlu2 %2240  ;;  %v4823_v43 = vld [vmem:[#allocation23_spill] sm:$0xff] }
 0x8a8   : > { %v2513_v47 = vsel %vm4542_vm5, %v4444_v58, %v2509_v11  ;;  %v2553_v28 = vsel %vm4554_vm11, %v4446_v39, %v2549_v8  ;;  %v2000_v40 = vadd.f32 %v1992_v15, %v1936_v22  ;;  %v2286_v61 = vmul.f32 %v4823_v43, %v2262_v9  ;;  %v4824_v11 = vld [vmem:[#allocation26_spill] sm:$0xff] }
 0x8a9   : > { %v2185_v42 = vpop.permute.xlu0 %2184  ;;  %v2001_v57 = vadd.f32 %v1993_v33, %v1937_v36  ;;  %v2287_v58 = vmul.f32 %v4823_v43, %v2263_v59  ;;  %vm2555_vm3 = vcmp.eq.f32.partialorder %v2554_v63, 8.507059e+37  ;;  %v2557_v51 = vor.u32 1.1754944e-38, %v2556_v54 }
 0x8aa   : > { %v2113_v46 = vpop.permute.xlu1 %2112  ;;  %v2326_v39 = vmul.f32 %v4130_v26, %v2316_v12  ;;  %v2327_v53 = vmul.f32 %v4136_v17, %v2320_v5  ;;  %v2056_v8 = vmul.f32 %v4824_v11, %v2032_v35  ;;  %v2057_v1 = vmul.f32 %v4824_v11, %v2033_v62 }
 0x8ab   : > { %v2125_v13 = vsel %vm1041_vm12, %v2113_v46, %v4450_v3  ;;  %v2129_v25 = vsel %vm1041_vm12, %v4450_v3, %v2113_v46  ;;  %v2518_v46 = vsel %vm4521_vm7, %v2517_v41, %v2513_v47  ;;  %v2558_v49 = vsel %vm2555_vm3, %v2557_v51, %v2553_v28 }
 0x8ac   : > { %v2136_v18 = vmul.f32 %v2125_v13, %v3371_v30  ;;  %v2137_v3 = vmul.f32 %v2129_v25, %v3374_v21  ;;  %v2494_v38 = vmul.f32 %v4495_v45, %v4297_v32  ;;  %v2534_v15 = vmul.f32 %v2533_v55, %v4300_v27  ;;  %v4825_v55 = vld [vmem:[#allocation18_spill] sm:$0xff]  ;;  %v4826_v25 = vld [vmem:[#allocation20_spill] sm:$0xff] }
 0x8ad   : > { %v2064_v33 = vadd.f32 %v2056_v8, %v2000_v40  ;;  %v2065_v9 = vadd.f32 %v2057_v1, %v2001_v57  ;;  %v2189_v59 = vsel %vm1092_vm14, %v4500_v48, %v2185_v42  ;;  %v2193_v30 = vsel %vm1092_vm14, %v2185_v42, %v4500_v48 }
 0x8ae   : > { %v2519_v45 = vmul.f32 %v2518_v46, %v2494_v38  ;;  %v2559_v27 = vmul.f32 %v2558_v49, %v2534_v15  ;;  %v2160_v19 = vmul.f32 %v4825_v55, %v2136_v18  ;;  %v2161_v63 = vmul.f32 %v4825_v55, %v2137_v3  ;;  %v4830_v55 = vld [vmem:[#allocation7_spill] sm:$0xff] }
 0x8af   : > { %v2294_v54 = vadd.f32 %v2286_v61, %v4386_v7  ;;  %v2295_v22 = vadd.f32 %v2287_v58, %v4388_v20  ;;  %v2200_v48 = vmul.f32 %v2189_v59, %v3412_v29  ;;  %v2201_v42 = vmul.f32 %v2193_v30, %v3415_v44  ;;  %v2305_v40 = vpop.permute.xlu2 %2304 }
 0x8b0   : > { %v2104_v36 = vadd.f32 %v4459_v10, %v2064_v33  ;;  %v2105_v35 = vadd.f32 %v4462_v16, %v2065_v9  ;;  %v2566_v7 = vmul.f32 %v4476_v60, %v4467_v50  ;;  %v2567_v29 = vmul.f32 %v4478_v2, %v4474_v0  ;;  %v4827_v60 = vld [vmem:[#allocation21_spill] sm:$0xff] }
 0x8b1   : > { %v2249_v31 = vpop.permute.xlu0 %2248  ;;  %v2734_v20 = vclamps-f32 %v2519_v45, 1.0  ;;  %v2735_v44 = vclamps-f32 %v2559_v27, 1.0  ;;  %v2396_v49 = vmul.f32 0.5, %v4291_v24  ;;  %v2397_v38 = vmul.f32 0.5, %v4294_v52  ;;  %v4829_v45 = vld [vmem:[#allocation6_spill] sm:$0xff] }
 0x8b2   : > { %v2340_v37 = vpop.permute.xlu1 %2339  ;;  %v2253_v41 = vsel %vm1143_vm13, %v2241_v23, %v2249_v31  ;;  %v2257_v32 = vsel %vm1143_vm13, %v2249_v31, %v2241_v23  ;;  %v2168_v10 = vadd.f32 %v2160_v19, %v2104_v36  ;;  %v2169_v57 = vadd.f32 %v2161_v63, %v2105_v35 }
 0x8b3   : > { %v2350_v21 = vmul.f32 %v2340_v37, %v2326_v39  ;;  %v2351_v4 = vmul.f32 %v2340_v37, %v2327_v53  ;;  %v2264_v56 = vmul.f32 %v2253_v41, %v3338_v34  ;;  %v2265_v12 = vmul.f32 %v2257_v32, %v3362_v6 }
 0x8b4   : > { %v2224_v34 = vmul.f32 %v4826_v25, %v2200_v48  ;;  %v2225_v6 = vmul.f32 %v4826_v25, %v2201_v42  ;;  %v2564_v53 = vadd.f32 1.0, %v2734_v20  ;;  %v2565_v11 = vadd.f32 1.0, %v2735_v44 }
 0x8b5   : > { %v2358_v5 = vadd.f32 %v2350_v21, %v2294_v54  ;;  %v2359_v47 = vadd.f32 %v2351_v4, %v2295_v22  ;;  %v2288_v23 = vmul.f32 %v4827_v60, %v2264_v56  ;;  %v2289_v0 = vmul.f32 %v4827_v60, %v2265_v12  ;;  %v2574_v21 = vld [vmem:[%s4657_s17] sm:$0xff] }
 0x8b6   : > { %v2232_v61 = vadd.f32 %v2224_v34, %v2168_v10  ;;  %v2233_v58 = vadd.f32 %v2225_v6, %v2169_v57  ;;  %v2568_v59 = vmul.f32 %v2564_v53, %v2396_v49  ;;  %vm2581_vm12 = vcmask 130048  }
 0x8b7   : > { %v2384_v15 = vpop.permute.xlu2 %2383 }
 0x8b8   : > { %v2296_v8 = vadd.f32 %v2288_v23, %v2232_v61  ;;  %v2297_v1 = vadd.f32 %v2289_v0, %v2233_v58 }
 0x8b9   : > { %v2313_v62 = vpop.permute.xlu0 %2312 }
 0x8ba   : > { %v2317_v31 = vsel %vm1194_vm15, %v2305_v40, %v2313_v62  ;;  %v2321_v50 = vsel %vm1194_vm15, %v2313_v62, %v2305_v40 }
 0x8bb   : > { %v2379_v28 = vpop.permute.xlu1 %2378  ;;  %v2328_v37 = vmul.f32 %v4130_v26, %v2317_v31  ;;  %v2329_v51 = vmul.f32 %v4136_v17, %v2321_v50  ;;  %v2569_v26 = vmul.f32 %v2565_v11, %v2397_v38 }
 0x8bc   : > { %v2390_v16 = vadd.f32 %v2379_v28, %v2358_v5  ;;  %v2391_v13 = vadd.f32 %v2379_v28, %v2359_v47 }
 0x8be   : > { %v2570_v2 = vmul.f32 %v2566_v7, %v2390_v16  ;;  %v2571_v43 = vmul.f32 %v2567_v29, %v2391_v13 }
 0x8bf   : > { %v2579_v24 = vpop.permute.xlu2 %2578 }
 0x8c1   : > { %v2344_v39 = vpop.permute.xlu0 %2343 }
 0x8c2   : > { %v2352_v18 = vmul.f32 %v2344_v39, %v2328_v37  ;;  %v2353_v14 = vmul.f32 %v2344_v39, %v2329_v51 }
 0x8c4   : > { %v2360_v3 = vadd.f32 %v2352_v18, %v2296_v8  ;;  %v2361_v46 = vadd.f32 %v2353_v14, %v2297_v1 }
 0x8c6   : > { %v2392_v33 = vadd.f32 %v2384_v15, %v2360_v3  ;;  %v2393_v9 = vadd.f32 %v2384_v15, %v2361_v46 }
 0x8c8   : > { %v2572_v17 = vmul.f32 %v2568_v59, %v2392_v33  ;;  %v2573_v30 = vmul.f32 %v2569_v26, %v2393_v9 }
 0x8ca   : > { %2599 = vmatpush.msrb.mxu2 %v2572_v17  ;;  %2619 = vmatpush.msrb.mxu3 %v2573_v30 }
 0x8cc   : > { %2600 = vmatpush.msrb.mxu2 %v2570_v2  ;;  %2620 = vmatpush.msrb.mxu3 %v2571_v43 }
 0x8cd   : > { %2736 = vmatmul.msk.f32.vlgmr.msrb.gmra.mxu2 %vm2581_vm12, %v2574_v21  ;;  %2737 = vmatmul.msk.f32.vlgmr.msrb.gmra.mxu3 %vm2581_vm12, %v2574_v21 }
 0x950   : > { %v2602_v52 = vpop.f32.mrf.mxu2  ;;  %v2622_v4 = vpop.f32.mrf.mxu3 }
 0x951   : > { %v2603_v41 = vadd.f32 %v2602_v52, %v2579_v24  ;;  %v2623_v32 = vadd.f32 %v2622_v4, %v2579_v24 }
 0x953   : > { %v2625_v27 = vadd.f32 %v2603_v41, %v4829_v45  ;;  %v2626_v19 = vadd.f32 %v2623_v32, %v4830_v55 }
 0x955   : > { %2627 = vst [vmem:[%s616_s1] sm:$0xff] %v2625_v27 }
 0x956   : > { %2628 = vst [vmem:[%s616_s1 + $0x8] sm:$0xff] %v2626_v19 }
 0x957 PF: > { %s30_s0 = sadd.s32 1, %s2908_s0  }
 0x958   : > { %p27_p7 = scmp.ge.s32.totalorder %s30_s0, 4  }
 0x95a   :  { %29 = sbr.rel (!%p27_p7) target bundleno = 6 (0x6), region = 131 }
 0x95f   :  { %2650 = vsyncpa [#allocation3], 1 }
 0x960   :  { %2652 = vsyncpa [#allocation3 + $0x1], 1 }

</bundles_post_ra>
